<compile_context>
chip_gen: v7x
topology: tpu7x:2x2x1
jax: 0.10.0
libtpu: 0.0.40
codegen_flags: <defaults>
</compile_context>

<pallas_src>
import jax
import jax.numpy as jnp
from jax.experimental import pallas as pl
from jax.experimental.pallas import tpu as pltpu

SUBLANES = 8  # f32 sublane width


def char_lstm_kernel(emb_ref, h0_ref, c0_ref, wih0_ref, wihr_ref, whh_ref,
                     b_ref, linw_ref, logits_ref, hN_ref, cN_ref,
                     seq_ref, xw_ref):
    """Stacked-LSTM forward + output projection, fully VMEM-resident (no grid).

    emb_ref  : (T*B, E)      embedded inputs, t-major rows (row = t*B + b)
    h0_ref   : (L, B, H)     initial hidden state (f32)
    c0_ref   : (L, B, H)     initial cell state   (f32)
    wih0_ref : (E, 4H)       layer-0 input weights (transposed, matmul dtype)
    wihr_ref : (L-1, H, 4H)  layer>=1 input weights (transposed)
    whh_ref  : (L, H, 4H)    recurrent weights (transposed)
    b_ref    : (L, 1, 4H)    combined bias b_ih + b_hh (f32)
    linw_ref : (H, A)        output projection weights (transposed, no bias)
    logits_ref : (T*B, A)    t-major logits (reordered to b*T+t in the wrapper)
    hN_ref, cN_ref : (L, B, H) final states (f32)
    seq_ref  : scratch (T*B, H)  current layer's outputs (matmul dtype)
    xw_ref   : scratch (T*B, 4H) hoisted per-layer input projection (f32)
    """
    TB, _E = emb_ref.shape
    L, B, H = h0_ref.shape
    T = TB // B
    mm_dtype = seq_ref.dtype

    for l in range(L):                                   # L = 3, static
        # ---- Hoisted input projection + bias: ONE matmul per layer. ----
        if l == 0:
            x_all = emb_ref[...]                         # (T*B, E)
            w_in = wih0_ref[...]                         # (E, 4H)
        else:
            x_all = seq_ref[...]                         # (T*B, H) prev layer out
            w_in = wihr_ref[l - 1]                       # (H, 4H)
        xw_ref[...] = (jnp.dot(x_all, w_in, preferred_element_type=jnp.float32)
                       + b_ref[l])                       # bias broadcast once/layer

        whh_t = whh_ref[l]                               # (H, 4H), hoisted
        h = h0_ref[l]                                    # (B, H) f32
        c = c0_ref[l]                                    # (B, H) f32

        # T is small (8) -> static unroll.  For long sequences switch to
        # lax.fori_loop(..., unroll=True) carrying (h, c).
        for t in range(T):
            # Only the recurrent matmul remains on the serial path.
            gates = xw_ref[t * B:(t + 1) * B, :] + jnp.dot(
                h.astype(mm_dtype), whh_t,
                preferred_element_type=jnp.float32)      # (B, 4H) f32, order i,f,g,o

            # Two full-vreg transcendentals + one XLU roll instead of four
            # 32-lane gate slices feeding four separate EUP calls.
            sig = jax.nn.sigmoid(gates)                  # [sig(i)|sig(f)|sig(g)|sig(o)]
            tnh = pltpu.roll(jnp.tanh(gates), shift=2 * H, axis=1)
            ig = sig * tnh                               # lanes [0,H): sig(i)*tanh(g)

            c = sig[:, H:2 * H] * c + ig[:, :H]
            h = sig[:, 3 * H:4 * H] * jnp.tanh(c)
            seq_ref[t * B:(t + 1) * B, :] = h.astype(mm_dtype)

        hN_ref[l] = h
        cN_ref[l] = c

    # ---- Fused output projection: one (T*B, H) @ (H, A) matmul, one store. ----
    logits_ref[...] = jnp.dot(seq_ref[...], linw_ref[...],
                              preferred_element_type=jnp.float32)


def char_lstm_forward(tokens, h0, c0, params, matmul_dtype=jnp.bfloat16):
    """JAX glue: embedding gather, batch padding, dtype casts, one pallas_call.

    matmul_dtype: bf16 for v6e/v7x (f32 accumulation, f32 cell/hidden state).
                  Pass jnp.float32 on v5e (no bf16 VPU/EUP path there).
    """
    emb = params["embed"][tokens]                        # (B, T, E) gather in JAX glue
    B, T, _E = emb.shape
    L, _, H = h0.shape
    A = params["linw_T"].shape[1]

    # Pad batch to the sublane width: same vreg count, denser MXU rows.
    Bp = ((B + SUBLANES - 1) // SUBLANES) * SUBLANES
    if Bp != B:
        emb = jnp.pad(emb, ((0, Bp - B), (0, 0), (0, 0)))
        h0 = jnp.pad(h0, ((0, 0), (0, Bp - B), (0, 0)))
        c0 = jnp.pad(c0, ((0, 0), (0, Bp - B), (0, 0)))

    # t-major flatten so every per-timestep access in the kernel is contiguous.
    emb_tb = emb.transpose(1, 0, 2).reshape(T * Bp, emb.shape[2]).astype(matmul_dtype)

    wih0_T = params["wih0_T"].astype(matmul_dtype)       # (E, 4H)
    wihr_T = params["wihr_T"].astype(matmul_dtype)       # (L-1, H, 4H)
    whh_T = params["whh_T"].astype(matmul_dtype)         # (L, H, 4H)
    linw_T = params["linw_T"].astype(matmul_dtype)       # (H, A)
    bias = params["bias"]                                # (L, 1, 4H) f32

    vmem = pl.BlockSpec(memory_space=pltpu.MemorySpace.VMEM)
    out_shapes = (jax.ShapeDtypeStruct((T * Bp, A), jnp.float32),
                  jax.ShapeDtypeStruct((L, Bp, H), jnp.float32),
                  jax.ShapeDtypeStruct((L, Bp, H), jnp.float32))
    # NOTE: footprint is KB-scale, so the whole model lives in VMEM and no grid
    # is needed.  If B ever grows, add a batch-parallel grid axis with
    # dimension_semantics=("parallel",) to use both v7x TensorCores.
    logits_tb, hN, cN = pl.pallas_call(
        char_lstm_kernel,
        out_shape=out_shapes,
        in_specs=[vmem] * 8,
        out_specs=(vmem, vmem, vmem),
        scratch_shapes=[pltpu.VMEM((T * Bp, H), matmul_dtype),
                        pltpu.VMEM((T * Bp, 4 * H), jnp.float32)],
    )(emb_tb, h0.astype(jnp.float32), c0.astype(jnp.float32),
      wih0_T, wihr_T, whh_T, bias, linw_T)

    # Restore PyTorch's `out.flatten(end_dim=1)` (b-major) row order and un-pad.
    logits = (logits_tb.reshape(T, Bp, A)[:, :B, :]
              .transpose(1, 0, 2).reshape(B * T, A))
    return logits, hN[:, :B, :], cN[:, :B, :]


def make_params(key, alph_len, embed_dim, latent_size, num_layers):
    """Deterministic parameter init mirroring CharLSTM.__init__."""
    H, E, A, L = latent_size, embed_dim, alph_len, num_layers
    keys = jax.random.split(key, 3 + 2 * L)
    ortho = jax.nn.initializers.orthogonal()

    embed = jax.random.normal(keys[0], (A, E), jnp.float32)   # nn.Embedding default

    # nn.init.orthogonal_ on weight_ih_l{n} (4H, in) and weight_hh_l{n} (4H, H)
    wih_list, whh_list = [], []
    for n in range(L):
        in_dim = E if n == 0 else H
        wih_list.append(ortho(keys[3 + 2 * n], (4 * H, in_dim), jnp.float32))
        whh_list.append(ortho(keys[4 + 2 * n], (4 * H, H), jnp.float32))

    # biases: zeros, ones on the forget-gate slice of BOTH b_ih and b_hh -> combined 2.0
    b = jnp.zeros((L, 4 * H), jnp.float32)
    b = b.at[:, H:2 * H].set(2.0)

    # nn.Linear(latent_size, alph_len, bias=False): uniform(-1/sqrt(H), 1/sqrt(H))
    bound = 1.0 / jnp.sqrt(jnp.float32(H))
    lin_w = jax.random.uniform(keys[1], (A, H), jnp.float32, -bound, bound)

    return {
        "embed": embed,
        "wih0_T": wih_list[0].T,                                   # (E, 4H)
        "wihr_T": jnp.stack([w.T for w in wih_list[1:]], axis=0),  # (L-1, H, 4H)
        "whh_T": jnp.stack([w.T for w in whh_list], axis=0),       # (L, H, 4H)
        "bias": b[:, None, :],                                     # (L, 1, 4H)
        "linw_T": lin_w.T,                                         # (H, A)
    }


def char_lstm_reference(tokens, h0, c0, params, matmul_dtype=jnp.bfloat16):
    """Pure-JAX reference using the same matmul dtype / f32 accumulation."""
    emb = params["embed"][tokens].astype(matmul_dtype)
    B, T, _ = emb.shape
    L, _, H = h0.shape
    x_seq = emb
    hN, cN = [], []
    for l in range(L):
        wih_t = (params["wih0_T"] if l == 0
                 else params["wihr_T"][l - 1]).astype(matmul_dtype)
        whh_t = params["whh_T"][l].astype(matmul_dtype)
        bias = params["bias"][l]
        h, c = h0[l], c0[l]
        outs = []
        for t in range(T):
            g = (jnp.dot(x_seq[:, t, :], wih_t, preferred_element_type=jnp.float32)
                 + jnp.dot(h.astype(matmul_dtype), whh_t,
                           preferred_element_type=jnp.float32)
                 + bias)
            i_g = jax.nn.sigmoid(g[:, :H])
            f_g = jax.nn.sigmoid(g[:, H:2 * H])
            g_g = jnp.tanh(g[:, 2 * H:3 * H])
            o_g = jax.nn.sigmoid(g[:, 3 * H:])
            c = f_g * c + i_g * g_g
            h = o_g * jnp.tanh(c)
            outs.append(h)
        x_seq = jnp.stack(outs, axis=1).astype(matmul_dtype)
        hN.append(h)
        cN.append(c)
    logits = jnp.dot(x_seq.reshape(B * T, H),
                     params["linw_T"].astype(matmul_dtype),
                     preferred_element_type=jnp.float32)
    return logits, jnp.stack(hN), jnp.stack(cN)


if __name__ == "__main__":
    # Small shapes consistent with the module's forward.
    B, T = 2, 8
    latent_size, alph_len, embed_dim, num_layers = 32, 16, 32, 3

    key = jax.random.PRNGKey(0)
    k_tok, k_h, k_c, k_param = jax.random.split(key, 4)

    params = make_params(k_param, alph_len, embed_dim, latent_size, num_layers)
    tokens = jax.random.randint(k_tok, (B, T), 0, alph_len, dtype=jnp.int32)
    h0 = jax.random.normal(k_h, (num_layers, B, latent_size), jnp.float32)
    c0 = jax.random.normal(k_c, (num_layers, B, latent_size), jnp.float32)

    logits, hN, cN = char_lstm_forward(tokens, h0, c0, params)
    jax.block_until_ready((logits, hN, cN))

    # Sanity check against a pure-JAX reference of the same math (same matmul dtype).
    ref_logits, ref_hN, ref_cN = char_lstm_reference(tokens, h0, c0, params)
    assert logits.shape == (B * T, alph_len)
    assert hN.shape == (num_layers, B, latent_size)
    assert cN.shape == (num_layers, B, latent_size)
    assert jnp.allclose(logits, ref_logits, rtol=1e-2, atol=1e-2)
    assert jnp.allclose(hN, ref_hN, rtol=1e-2, atol=1e-2)
    assert jnp.allclose(cN, ref_cN, rtol=1e-2, atol=1e-2)

    print("KERNEL_OK")
</pallas_src>

<mosaic_0001>
module attributes {stable_mosaic.version = 11 : i64} {
  func.func @char_lstm_kernel(%arg0: memref<64x32xbf16, #tpu.memory_space<vmem>>, %arg1: memref<3x8x32xf32, #tpu.memory_space<vmem>>, %arg2: memref<3x8x32xf32, #tpu.memory_space<vmem>>, %arg3: memref<32x128xbf16, #tpu.memory_space<vmem>>, %arg4: memref<2x32x128xbf16, #tpu.memory_space<vmem>>, %arg5: memref<3x32x128xbf16, #tpu.memory_space<vmem>>, %arg6: memref<3x1x128xf32, #tpu.memory_space<vmem>>, %arg7: memref<32x16xbf16, #tpu.memory_space<vmem>>, %arg8: memref<64x16xf32, #tpu.memory_space<vmem>>, %arg9: memref<3x8x32xf32, #tpu.memory_space<vmem>>, %arg10: memref<3x8x32xf32, #tpu.memory_space<vmem>>, %arg11: memref<64x32xbf16, #tpu.memory_space<vmem>>, %arg12: memref<64x128xf32, #tpu.memory_space<vmem>>) attributes {dimension_semantics = [], scalar_prefetch = 0 : i64, scratch_operands = 2 : i64, tpu.core_type = #tpu.core_type<tc>} {
    %c0 = arith.constant 0 : index
    %c0_0 = arith.constant 0 : index
    %0 = vector.load %arg0[%c0, %c0_0] : memref<64x32xbf16, #tpu.memory_space<vmem>>, vector<64x32xbf16>
    %c0_1 = arith.constant 0 : index
    %c0_2 = arith.constant 0 : index
    %1 = vector.load %arg3[%c0_1, %c0_2] : memref<32x128xbf16, #tpu.memory_space<vmem>>, vector<32x128xbf16>
    %cst = arith.constant dense<0.000000e+00> : vector<64x128xf32>
    %2 = tpu.matmul %0, %1, %cst {dimension_numbers = #tpu.dot_dimension_numbers<[1], [0], [0], [1], [0, 0, 1, 1], [], []>} : vector<64x32xbf16>, vector<32x128xbf16>, vector<64x128xf32> -> vector<64x128xf32>
    %c0_3 = arith.constant 0 : index
    %c0_4 = arith.constant 0 : index
    %c0_5 = arith.constant 0 : index
    %3 = vector.load %arg6[%c0_3, %c0_4, %c0_5] : memref<3x1x128xf32, #tpu.memory_space<vmem>>, vector<1x1x128xf32>
    %4 = vector.shape_cast %3 : vector<1x1x128xf32> to vector<1x128xf32>
    %5 = vector.broadcast %4 : vector<1x128xf32> to vector<64x128xf32>
    %6 = arith.addf %2, %5 : vector<64x128xf32>
    %c0_6 = arith.constant 0 : index
    %c0_7 = arith.constant 0 : index
    %7 = vector.load %arg12[%c0_6, %c0_7] : memref<64x128xf32, #tpu.memory_space<vmem>>, vector<64x128xf32>
    tpu.vector_store %arg12[%c0_6, %c0_7], %6 {strides = array<i32>} : memref<64x128xf32, #tpu.memory_space<vmem>>, vector<64x128xf32>,
    %c0_8 = arith.constant 0 : index
    %c0_9 = arith.constant 0 : index
    %c0_10 = arith.constant 0 : index
    %8 = vector.load %arg5[%c0_8, %c0_9, %c0_10] : memref<3x32x128xbf16, #tpu.memory_space<vmem>>, vector<1x32x128xbf16>
    %9 = vector.shape_cast %8 : vector<1x32x128xbf16> to vector<32x128xbf16>
    %c0_11 = arith.constant 0 : index
    %c0_12 = arith.constant 0 : index
    %c0_13 = arith.constant 0 : index
    %10 = vector.load %arg1[%c0_11, %c0_12, %c0_13] : memref<3x8x32xf32, #tpu.memory_space<vmem>>, vector<1x8x32xf32>
    %11 = vector.shape_cast %10 : vector<1x8x32xf32> to vector<8x32xf32>
    %c0_14 = arith.constant 0 : index
    %c0_15 = arith.constant 0 : index
    %c0_16 = arith.constant 0 : index
    %12 = vector.load %arg2[%c0_14, %c0_15, %c0_16] : memref<3x8x32xf32, #tpu.memory_space<vmem>>, vector<1x8x32xf32>
    %13 = vector.shape_cast %12 : vector<1x8x32xf32> to vector<8x32xf32>
    %c0_17 = arith.constant 0 : index
    %c0_18 = arith.constant 0 : index
    %14 = vector.load %arg12[%c0_17, %c0_18] : memref<64x128xf32, #tpu.memory_space<vmem>>, vector<8x128xf32>
    %15 = arith.truncf %11 : vector<8x32xf32> to vector<8x32xbf16>
    %cst_19 = arith.constant dense<0.000000e+00> : vector<8x128xf32>
    %16 = tpu.matmul %15, %9, %cst_19 {dimension_numbers = #tpu.dot_dimension_numbers<[1], [0], [0], [1], [0, 0, 1, 1], [], []>} : vector<8x32xbf16>, vector<32x128xbf16>, vector<8x128xf32> -> vector<8x128xf32>
    %17 = arith.addf %14, %16 : vector<8x128xf32>
    %18 = arith.negf %17 : vector<8x128xf32>
    %19 = math.exp %18 : vector<8x128xf32>
    %cst_20 = arith.constant 1.000000e+00 : f32
    %20 = vector.broadcast %cst_20 : f32 to vector<8x128xf32>
    %21 = arith.addf %20, %19 : vector<8x128xf32>
    %22 = arith.divf %20, %21 : vector<8x128xf32>
    %23 = math.tanh %17 : vector<8x128xf32>
    %c64_i32 = arith.constant 64 : i32
    %24 = tpu.dynamic_rotate %23 by %c64_i32 dim 1 : vector<8x128xf32>, i32 -> vector<8x128xf32>
    %25 = arith.mulf %22, %24 : vector<8x128xf32>
    %26 = vector.extract_strided_slice %22 {offsets = [0, 32], sizes = [8, 32], strides = [1, 1]} : vector<8x128xf32> to vector<8x32xf32>
    %27 = arith.mulf %26, %13 : vector<8x32xf32>
    %28 = vector.extract_strided_slice %25 {offsets = [0, 0], sizes = [8, 32], strides = [1, 1]} : vector<8x128xf32> to vector<8x32xf32>
    %29 = arith.addf %27, %28 : vector<8x32xf32>
    %30 = vector.extract_strided_slice %22 {offsets = [0, 96], sizes = [8, 32], strides = [1, 1]} : vector<8x128xf32> to vector<8x32xf32>
    %31 = math.tanh %29 : vector<8x32xf32>
    %32 = arith.mulf %30, %31 : vector<8x32xf32>
    %33 = arith.truncf %32 : vector<8x32xf32> to vector<8x32xbf16>
    %c0_21 = arith.constant 0 : index
    %c0_22 = arith.constant 0 : index
    %34 = vector.load %arg11[%c0_21, %c0_22] : memref<64x32xbf16, #tpu.memory_space<vmem>>, vector<8x32xbf16>
    tpu.vector_store %arg11[%c0_21, %c0_22], %33 {strides = array<i32>} : memref<64x32xbf16, #tpu.memory_space<vmem>>, vector<8x32xbf16>,
    %c8 = arith.constant 8 : index
    %c0_23 = arith.constant 0 : index
    %35 = vector.load %arg12[%c8, %c0_23] : memref<64x128xf32, #tpu.memory_space<vmem>>, vector<8x128xf32>
    %36 = arith.truncf %32 : vector<8x32xf32> to vector<8x32xbf16>
    %cst_24 = arith.constant dense<0.000000e+00> : vector<8x128xf32>
    %37 = tpu.matmul %36, %9, %cst_24 {dimension_numbers = #tpu.dot_dimension_numbers<[1], [0], [0], [1], [0, 0, 1, 1], [], []>} : vector<8x32xbf16>, vector<32x128xbf16>, vector<8x128xf32> -> vector<8x128xf32>
    %38 = arith.addf %35, %37 : vector<8x128xf32>
    %39 = arith.negf %38 : vector<8x128xf32>
    %40 = math.exp %39 : vector<8x128xf32>
    %cst_25 = arith.constant 1.000000e+00 : f32
    %41 = vector.broadcast %cst_25 : f32 to vector<8x128xf32>
    %42 = arith.addf %41, %40 : vector<8x128xf32>
    %43 = arith.divf %41, %42 : vector<8x128xf32>
    %44 = math.tanh %38 : vector<8x128xf32>
    %c64_i32_26 = arith.constant 64 : i32
    %45 = tpu.dynamic_rotate %44 by %c64_i32_26 dim 1 : vector<8x128xf32>, i32 -> vector<8x128xf32>
    %46 = arith.mulf %43, %45 : vector<8x128xf32>
    %47 = vector.extract_strided_slice %43 {offsets = [0, 32], sizes = [8, 32], strides = [1, 1]} : vector<8x128xf32> to vector<8x32xf32>
    %48 = arith.mulf %47, %29 : vector<8x32xf32>
    %49 = vector.extract_strided_slice %46 {offsets = [0, 0], sizes = [8, 32], strides = [1, 1]} : vector<8x128xf32> to vector<8x32xf32>
    %50 = arith.addf %48, %49 : vector<8x32xf32>
    %51 = vector.extract_strided_slice %43 {offsets = [0, 96], sizes = [8, 32], strides = [1, 1]} : vector<8x128xf32> to vector<8x32xf32>
    %52 = math.tanh %50 : vector<8x32xf32>
    %53 = arith.mulf %51, %52 : vector<8x32xf32>
    %54 = arith.truncf %53 : vector<8x32xf32> to vector<8x32xbf16>
    %c8_27 = arith.constant 8 : index
    %c0_28 = arith.constant 0 : index
    %55 = vector.load %arg11[%c8_27, %c0_28] : memref<64x32xbf16, #tpu.memory_space<vmem>>, vector<8x32xbf16>
    tpu.vector_store %arg11[%c8_27, %c0_28], %54 {strides = array<i32>} : memref<64x32xbf16, #tpu.memory_space<vmem>>, vector<8x32xbf16>,
    %c16 = arith.constant 16 : index
    %c0_29 = arith.constant 0 : index
    %56 = vector.load %arg12[%c16, %c0_29] : memref<64x128xf32, #tpu.memory_space<vmem>>, vector<8x128xf32>
    %57 = arith.truncf %53 : vector<8x32xf32> to vector<8x32xbf16>
    %cst_30 = arith.constant dense<0.000000e+00> : vector<8x128xf32>
    %58 = tpu.matmul %57, %9, %cst_30 {dimension_numbers = #tpu.dot_dimension_numbers<[1], [0], [0], [1], [0, 0, 1, 1], [], []>} : vector<8x32xbf16>, vector<32x128xbf16>, vector<8x128xf32> -> vector<8x128xf32>
    %59 = arith.addf %56, %58 : vector<8x128xf32>
    %60 = arith.negf %59 : vector<8x128xf32>
    %61 = math.exp %60 : vector<8x128xf32>
    %cst_31 = arith.constant 1.000000e+00 : f32
    %62 = vector.broadcast %cst_31 : f32 to vector<8x128xf32>
    %63 = arith.addf %62, %61 : vector<8x128xf32>
    %64 = arith.divf %62, %63 : vector<8x128xf32>
    %65 = math.tanh %59 : vector<8x128xf32>
    %c64_i32_32 = arith.constant 64 : i32
    %66 = tpu.dynamic_rotate %65 by %c64_i32_32 dim 1 : vector<8x128xf32>, i32 -> vector<8x128xf32>
    %67 = arith.mulf %64, %66 : vector<8x128xf32>
    %68 = vector.extract_strided_slice %64 {offsets = [0, 32], sizes = [8, 32], strides = [1, 1]} : vector<8x128xf32> to vector<8x32xf32>
    %69 = arith.mulf %68, %50 : vector<8x32xf32>
    %70 = vector.extract_strided_slice %67 {offsets = [0, 0], sizes = [8, 32], strides = [1, 1]} : vector<8x128xf32> to vector<8x32xf32>
    %71 = arith.addf %69, %70 : vector<8x32xf32>
    %72 = vector.extract_strided_slice %64 {offsets = [0, 96], sizes = [8, 32], strides = [1, 1]} : vector<8x128xf32> to vector<8x32xf32>
    %73 = math.tanh %71 : vector<8x32xf32>
    %74 = arith.mulf %72, %73 : vector<8x32xf32>
    %75 = arith.truncf %74 : vector<8x32xf32> to vector<8x32xbf16>
    %c16_33 = arith.constant 16 : index
    %c0_34 = arith.constant 0 : index
    %76 = vector.load %arg11[%c16_33, %c0_34] : memref<64x32xbf16, #tpu.memory_space<vmem>>, vector<8x32xbf16>
    tpu.vector_store %arg11[%c16_33, %c0_34], %75 {strides = array<i32>} : memref<64x32xbf16, #tpu.memory_space<vmem>>, vector<8x32xbf16>,
    %c24 = arith.constant 24 : index
    %c0_35 = arith.constant 0 : index
    %77 = vector.load %arg12[%c24, %c0_35] : memref<64x128xf32, #tpu.memory_space<vmem>>, vector<8x128xf32>
    %78 = arith.truncf %74 : vector<8x32xf32> to vector<8x32xbf16>
    %cst_36 = arith.constant dense<0.000000e+00> : vector<8x128xf32>
    %79 = tpu.matmul %78, %9, %cst_36 {dimension_numbers = #tpu.dot_dimension_numbers<[1], [0], [0], [1], [0, 0, 1, 1], [], []>} : vector<8x32xbf16>, vector<32x128xbf16>, vector<8x128xf32> -> vector<8x128xf32>
    %80 = arith.addf %77, %79 : vector<8x128xf32>
    %81 = arith.negf %80 : vector<8x128xf32>
    %82 = math.exp %81 : vector<8x128xf32>
    %cst_37 = arith.constant 1.000000e+00 : f32
    %83 = vector.broadcast %cst_37 : f32 to vector<8x128xf32>
    %84 = arith.addf %83, %82 : vector<8x128xf32>
    %85 = arith.divf %83, %84 : vector<8x128xf32>
    %86 = math.tanh %80 : vector<8x128xf32>
    %c64_i32_38 = arith.constant 64 : i32
    %87 = tpu.dynamic_rotate %86 by %c64_i32_38 dim 1 : vector<8x128xf32>, i32 -> vector<8x128xf32>
    %88 = arith.mulf %85, %87 : vector<8x128xf32>
    %89 = vector.extract_strided_slice %85 {offsets = [0, 32], sizes = [8, 32], strides = [1, 1]} : vector<8x128xf32> to vector<8x32xf32>
    %90 = arith.mulf %89, %71 : vector<8x32xf32>
    %91 = vector.extract_strided_slice %88 {offsets = [0, 0], sizes = [8, 32], strides = [1, 1]} : vector<8x128xf32> to vector<8x32xf32>
    %92 = arith.addf %90, %91 : vector<8x32xf32>
    %93 = vector.extract_strided_slice %85 {offsets = [0, 96], sizes = [8, 32], strides = [1, 1]} : vector<8x128xf32> to vector<8x32xf32>
    %94 = math.tanh %92 : vector<8x32xf32>
    %95 = arith.mulf %93, %94 : vector<8x32xf32>
    %96 = arith.truncf %95 : vector<8x32xf32> to vector<8x32xbf16>
    %c24_39 = arith.constant 24 : index
    %c0_40 = arith.constant 0 : index
    %97 = vector.load %arg11[%c24_39, %c0_40] : memref<64x32xbf16, #tpu.memory_space<vmem>>, vector<8x32xbf16>
    tpu.vector_store %arg11[%c24_39, %c0_40], %96 {strides = array<i32>} : memref<64x32xbf16, #tpu.memory_space<vmem>>, vector<8x32xbf16>,
    %c32 = arith.constant 32 : index
    %c0_41 = arith.constant 0 : index
    %98 = vector.load %arg12[%c32, %c0_41] : memref<64x128xf32, #tpu.memory_space<vmem>>, vector<8x128xf32>
    %99 = arith.truncf %95 : vector<8x32xf32> to vector<8x32xbf16>
    %cst_42 = arith.constant dense<0.000000e+00> : vector<8x128xf32>
    %100 = tpu.matmul %99, %9, %cst_42 {dimension_numbers = #tpu.dot_dimension_numbers<[1], [0], [0], [1], [0, 0, 1, 1], [], []>} : vector<8x32xbf16>, vector<32x128xbf16>, vector<8x128xf32> -> vector<8x128xf32>
    %101 = arith.addf %98, %100 : vector<8x128xf32>
    %102 = arith.negf %101 : vector<8x128xf32>
    %103 = math.exp %102 : vector<8x128xf32>
    %cst_43 = arith.constant 1.000000e+00 : f32
    %104 = vector.broadcast %cst_43 : f32 to vector<8x128xf32>
    %105 = arith.addf %104, %103 : vector<8x128xf32>
    %106 = arith.divf %104, %105 : vector<8x128xf32>
    %107 = math.tanh %101 : vector<8x128xf32>
    %c64_i32_44 = arith.constant 64 : i32
    %108 = tpu.dynamic_rotate %107 by %c64_i32_44 dim 1 : vector<8x128xf32>, i32 -> vector<8x128xf32>
    %109 = arith.mulf %106, %108 : vector<8x128xf32>
    %110 = vector.extract_strided_slice %106 {offsets = [0, 32], sizes = [8, 32], strides = [1, 1]} : vector<8x128xf32> to vector<8x32xf32>
    %111 = arith.mulf %110, %92 : vector<8x32xf32>
    %112 = vector.extract_strided_slice %109 {offsets = [0, 0], sizes = [8, 32], strides = [1, 1]} : vector<8x128xf32> to vector<8x32xf32>
    %113 = arith.addf %111, %112 : vector<8x32xf32>
    %114 = vector.extract_strided_slice %106 {offsets = [0, 96], sizes = [8, 32], strides = [1, 1]} : vector<8x128xf32> to vector<8x32xf32>
    %115 = math.tanh %113 : vector<8x32xf32>
    %116 = arith.mulf %114, %115 : vector<8x32xf32>
    %117 = arith.truncf %116 : vector<8x32xf32> to vector<8x32xbf16>
    %c32_45 = arith.constant 32 : index
    %c0_46 = arith.constant 0 : index
    %118 = vector.load %arg11[%c32_45, %c0_46] : memref<64x32xbf16, #tpu.memory_space<vmem>>, vector<8x32xbf16>
    tpu.vector_store %arg11[%c32_45, %c0_46], %117 {strides = array<i32>} : memref<64x32xbf16, #tpu.memory_space<vmem>>, vector<8x32xbf16>,
    %c40 = arith.constant 40 : index
    %c0_47 = arith.constant 0 : index
    %119 = vector.load %arg12[%c40, %c0_47] : memref<64x128xf32, #tpu.memory_space<vmem>>, vector<8x128xf32>
    %120 = arith.truncf %116 : vector<8x32xf32> to vector<8x32xbf16>
    %cst_48 = arith.constant dense<0.000000e+00> : vector<8x128xf32>
    %121 = tpu.matmul %120, %9, %cst_48 {dimension_numbers = #tpu.dot_dimension_numbers<[1], [0], [0], [1], [0, 0, 1, 1], [], []>} : vector<8x32xbf16>, vector<32x128xbf16>, vector<8x128xf32> -> vector<8x128xf32>
    %122 = arith.addf %119, %121 : vector<8x128xf32>
    %123 = arith.negf %122 : vector<8x128xf32>
    %124 = math.exp %123 : vector<8x128xf32>
    %cst_49 = arith.constant 1.000000e+00 : f32
    %125 = vector.broadcast %cst_49 : f32 to vector<8x128xf32>
    %126 = arith.addf %125, %124 : vector<8x128xf32>
    %127 = arith.divf %125, %126 : vector<8x128xf32>
    %128 = math.tanh %122 : vector<8x128xf32>
    %c64_i32_50 = arith.constant 64 : i32
    %129 = tpu.dynamic_rotate %128 by %c64_i32_50 dim 1 : vector<8x128xf32>, i32 -> vector<8x128xf32>
    %130 = arith.mulf %127, %129 : vector<8x128xf32>
    %131 = vector.extract_strided_slice %127 {offsets = [0, 32], sizes = [8, 32], strides = [1, 1]} : vector<8x128xf32> to vector<8x32xf32>
    %132 = arith.mulf %131, %113 : vector<8x32xf32>
    %133 = vector.extract_strided_slice %130 {offsets = [0, 0], sizes = [8, 32], strides = [1, 1]} : vector<8x128xf32> to vector<8x32xf32>
    %134 = arith.addf %132, %133 : vector<8x32xf32>
    %135 = vector.extract_strided_slice %127 {offsets = [0, 96], sizes = [8, 32], strides = [1, 1]} : vector<8x128xf32> to vector<8x32xf32>
    %136 = math.tanh %134 : vector<8x32xf32>
    %137 = arith.mulf %135, %136 : vector<8x32xf32>
    %138 = arith.truncf %137 : vector<8x32xf32> to vector<8x32xbf16>
    %c40_51 = arith.constant 40 : index
    %c0_52 = arith.constant 0 : index
    %139 = vector.load %arg11[%c40_51, %c0_52] : memref<64x32xbf16, #tpu.memory_space<vmem>>, vector<8x32xbf16>
    tpu.vector_store %arg11[%c40_51, %c0_52], %138 {strides = array<i32>} : memref<64x32xbf16, #tpu.memory_space<vmem>>, vector<8x32xbf16>,
    %c48 = arith.constant 48 : index
    %c0_53 = arith.constant 0 : index
    %140 = vector.load %arg12[%c48, %c0_53] : memref<64x128xf32, #tpu.memory_space<vmem>>, vector<8x128xf32>
    %141 = arith.truncf %137 : vector<8x32xf32> to vector<8x32xbf16>
    %cst_54 = arith.constant dense<0.000000e+00> : vector<8x128xf32>
    %142 = tpu.matmul %141, %9, %cst_54 {dimension_numbers = #tpu.dot_dimension_numbers<[1], [0], [0], [1], [0, 0, 1, 1], [], []>} : vector<8x32xbf16>, vector<32x128xbf16>, vector<8x128xf32> -> vector<8x128xf32>
    %143 = arith.addf %140, %142 : vector<8x128xf32>
    %144 = arith.negf %143 : vector<8x128xf32>
    %145 = math.exp %144 : vector<8x128xf32>
    %cst_55 = arith.constant 1.000000e+00 : f32
    %146 = vector.broadcast %cst_55 : f32 to vector<8x128xf32>
    %147 = arith.addf %146, %145 : vector<8x128xf32>
    %148 = arith.divf %146, %147 : vector<8x128xf32>
    %149 = math.tanh %143 : vector<8x128xf32>
    %c64_i32_56 = arith.constant 64 : i32
    %150 = tpu.dynamic_rotate %149 by %c64_i32_56 dim 1 : vector<8x128xf32>, i32 -> vector<8x128xf32>
    %151 = arith.mulf %148, %150 : vector<8x128xf32>
    %152 = vector.extract_strided_slice %148 {offsets = [0, 32], sizes = [8, 32], strides = [1, 1]} : vector<8x128xf32> to vector<8x32xf32>
    %153 = arith.mulf %152, %134 : vector<8x32xf32>
    %154 = vector.extract_strided_slice %151 {offsets = [0, 0], sizes = [8, 32], strides = [1, 1]} : vector<8x128xf32> to vector<8x32xf32>
    %155 = arith.addf %153, %154 : vector<8x32xf32>
    %156 = vector.extract_strided_slice %148 {offsets = [0, 96], sizes = [8, 32], strides = [1, 1]} : vector<8x128xf32> to vector<8x32xf32>
    %157 = math.tanh %155 : vector<8x32xf32>
    %158 = arith.mulf %156, %157 : vector<8x32xf32>
    %159 = arith.truncf %158 : vector<8x32xf32> to vector<8x32xbf16>
    %c48_57 = arith.constant 48 : index
    %c0_58 = arith.constant 0 : index
    %160 = vector.load %arg11[%c48_57, %c0_58] : memref<64x32xbf16, #tpu.memory_space<vmem>>, vector<8x32xbf16>
    tpu.vector_store %arg11[%c48_57, %c0_58], %159 {strides = array<i32>} : memref<64x32xbf16, #tpu.memory_space<vmem>>, vector<8x32xbf16>,
    %c56 = arith.constant 56 : index
    %c0_59 = arith.constant 0 : index
    %161 = vector.load %arg12[%c56, %c0_59] : memref<64x128xf32, #tpu.memory_space<vmem>>, vector<8x128xf32>
    %162 = arith.truncf %158 : vector<8x32xf32> to vector<8x32xbf16>
    %cst_60 = arith.constant dense<0.000000e+00> : vector<8x128xf32>
    %163 = tpu.matmul %162, %9, %cst_60 {dimension_numbers = #tpu.dot_dimension_numbers<[1], [0], [0], [1], [0, 0, 1, 1], [], []>} : vector<8x32xbf16>, vector<32x128xbf16>, vector<8x128xf32> -> vector<8x128xf32>
    %164 = arith.addf %161, %163 : vector<8x128xf32>
    %165 = arith.negf %164 : vector<8x128xf32>
    %166 = math.exp %165 : vector<8x128xf32>
    %cst_61 = arith.constant 1.000000e+00 : f32
    %167 = vector.broadcast %cst_61 : f32 to vector<8x128xf32>
    %168 = arith.addf %167, %166 : vector<8x128xf32>
    %169 = arith.divf %167, %168 : vector<8x128xf32>
    %170 = math.tanh %164 : vector<8x128xf32>
    %c64_i32_62 = arith.constant 64 : i32
    %171 = tpu.dynamic_rotate %170 by %c64_i32_62 dim 1 : vector<8x128xf32>, i32 -> vector<8x128xf32>
    %172 = arith.mulf %169, %171 : vector<8x128xf32>
    %173 = vector.extract_strided_slice %169 {offsets = [0, 32], sizes = [8, 32], strides = [1, 1]} : vector<8x128xf32> to vector<8x32xf32>
    %174 = arith.mulf %173, %155 : vector<8x32xf32>
    %175 = vector.extract_strided_slice %172 {offsets = [0, 0], sizes = [8, 32], strides = [1, 1]} : vector<8x128xf32> to vector<8x32xf32>
    %176 = arith.addf %174, %175 : vector<8x32xf32>
    %177 = vector.extract_strided_slice %169 {offsets = [0, 96], sizes = [8, 32], strides = [1, 1]} : vector<8x128xf32> to vector<8x32xf32>
    %178 = math.tanh %176 : vector<8x32xf32>
    %179 = arith.mulf %177, %178 : vector<8x32xf32>
    %180 = arith.truncf %179 : vector<8x32xf32> to vector<8x32xbf16>
    %c56_63 = arith.constant 56 : index
    %c0_64 = arith.constant 0 : index
    %181 = vector.load %arg11[%c56_63, %c0_64] : memref<64x32xbf16, #tpu.memory_space<vmem>>, vector<8x32xbf16>
    tpu.vector_store %arg11[%c56_63, %c0_64], %180 {strides = array<i32>} : memref<64x32xbf16, #tpu.memory_space<vmem>>, vector<8x32xbf16>,
    %c0_65 = arith.constant 0 : index
    %c0_66 = arith.constant 0 : index
    %c0_67 = arith.constant 0 : index
    %182 = vector.load %arg9[%c0_65, %c0_66, %c0_67] : memref<3x8x32xf32, #tpu.memory_space<vmem>>, vector<1x8x32xf32>
    %183 = vector.shape_cast %182 : vector<1x8x32xf32> to vector<8x32xf32>
    %184 = vector.shape_cast %179 : vector<8x32xf32> to vector<1x8x32xf32>
    tpu.vector_store %arg9[%c0_65, %c0_66, %c0_67], %184 {strides = array<i32>} : memref<3x8x32xf32, #tpu.memory_space<vmem>>, vector<1x8x32xf32>,
    %c0_68 = arith.constant 0 : index
    %c0_69 = arith.constant 0 : index
    %c0_70 = arith.constant 0 : index
    %185 = vector.load %arg10[%c0_68, %c0_69, %c0_70] : memref<3x8x32xf32, #tpu.memory_space<vmem>>, vector<1x8x32xf32>
    %186 = vector.shape_cast %185 : vector<1x8x32xf32> to vector<8x32xf32>
    %187 = vector.shape_cast %176 : vector<8x32xf32> to vector<1x8x32xf32>
    tpu.vector_store %arg10[%c0_68, %c0_69, %c0_70], %187 {strides = array<i32>} : memref<3x8x32xf32, #tpu.memory_space<vmem>>, vector<1x8x32xf32>,
    %c0_71 = arith.constant 0 : index
    %c0_72 = arith.constant 0 : index
    %188 = vector.load %arg11[%c0_71, %c0_72] : memref<64x32xbf16, #tpu.memory_space<vmem>>, vector<64x32xbf16>
    %c0_73 = arith.constant 0 : index
    %c0_74 = arith.constant 0 : index
    %c0_75 = arith.constant 0 : index
    %189 = vector.load %arg4[%c0_73, %c0_74, %c0_75] : memref<2x32x128xbf16, #tpu.memory_space<vmem>>, vector<1x32x128xbf16>
    %190 = vector.shape_cast %189 : vector<1x32x128xbf16> to vector<32x128xbf16>
    %cst_76 = arith.constant dense<0.000000e+00> : vector<64x128xf32>
    %191 = tpu.matmul %188, %190, %cst_76 {dimension_numbers = #tpu.dot_dimension_numbers<[1], [0], [0], [1], [0, 0, 1, 1], [], []>} : vector<64x32xbf16>, vector<32x128xbf16>, vector<64x128xf32> -> vector<64x128xf32>
    %c1 = arith.constant 1 : index
    %c0_77 = arith.constant 0 : index
    %c0_78 = arith.constant 0 : index
    %192 = vector.load %arg6[%c1, %c0_77, %c0_78] : memref<3x1x128xf32, #tpu.memory_space<vmem>>, vector<1x1x128xf32>
    %193 = vector.shape_cast %192 : vector<1x1x128xf32> to vector<1x128xf32>
    %194 = vector.broadcast %193 : vector<1x128xf32> to vector<64x128xf32>
    %195 = arith.addf %191, %194 : vector<64x128xf32>
    %c0_79 = arith.constant 0 : index
    %c0_80 = arith.constant 0 : index
    %196 = vector.load %arg12[%c0_79, %c0_80] : memref<64x128xf32, #tpu.memory_space<vmem>>, vector<64x128xf32>
    tpu.vector_store %arg12[%c0_79, %c0_80], %195 {strides = array<i32>} : memref<64x128xf32, #tpu.memory_space<vmem>>, vector<64x128xf32>,
    %c1_81 = arith.constant 1 : index
    %c0_82 = arith.constant 0 : index
    %c0_83 = arith.constant 0 : index
    %197 = vector.load %arg5[%c1_81, %c0_82, %c0_83] : memref<3x32x128xbf16, #tpu.memory_space<vmem>>, vector<1x32x128xbf16>
    %198 = vector.shape_cast %197 : vector<1x32x128xbf16> to vector<32x128xbf16>
    %c1_84 = arith.constant 1 : index
    %c0_85 = arith.constant 0 : index
    %c0_86 = arith.constant 0 : index
    %199 = vector.load %arg1[%c1_84, %c0_85, %c0_86] : memref<3x8x32xf32, #tpu.memory_space<vmem>>, vector<1x8x32xf32>
    %200 = vector.shape_cast %199 : vector<1x8x32xf32> to vector<8x32xf32>
    %c1_87 = arith.constant 1 : index
    %c0_88 = arith.constant 0 : index
    %c0_89 = arith.constant 0 : index
    %201 = vector.load %arg2[%c1_87, %c0_88, %c0_89] : memref<3x8x32xf32, #tpu.memory_space<vmem>>, vector<1x8x32xf32>
    %202 = vector.shape_cast %201 : vector<1x8x32xf32> to vector<8x32xf32>
    %c0_90 = arith.constant 0 : index
    %c0_91 = arith.constant 0 : index
    %203 = vector.load %arg12[%c0_90, %c0_91] : memref<64x128xf32, #tpu.memory_space<vmem>>, vector<8x128xf32>
    %204 = arith.truncf %200 : vector<8x32xf32> to vector<8x32xbf16>
    %cst_92 = arith.constant dense<0.000000e+00> : vector<8x128xf32>
    %205 = tpu.matmul %204, %198, %cst_92 {dimension_numbers = #tpu.dot_dimension_numbers<[1], [0], [0], [1], [0, 0, 1, 1], [], []>} : vector<8x32xbf16>, vector<32x128xbf16>, vector<8x128xf32> -> vector<8x128xf32>
    %206 = arith.addf %203, %205 : vector<8x128xf32>
    %207 = arith.negf %206 : vector<8x128xf32>
    %208 = math.exp %207 : vector<8x128xf32>
    %cst_93 = arith.constant 1.000000e+00 : f32
    %209 = vector.broadcast %cst_93 : f32 to vector<8x128xf32>
    %210 = arith.addf %209, %208 : vector<8x128xf32>
    %211 = arith.divf %209, %210 : vector<8x128xf32>
    %212 = math.tanh %206 : vector<8x128xf32>
    %c64_i32_94 = arith.constant 64 : i32
    %213 = tpu.dynamic_rotate %212 by %c64_i32_94 dim 1 : vector<8x128xf32>, i32 -> vector<8x128xf32>
    %214 = arith.mulf %211, %213 : vector<8x128xf32>
    %215 = vector.extract_strided_slice %211 {offsets = [0, 32], sizes = [8, 32], strides = [1, 1]} : vector<8x128xf32> to vector<8x32xf32>
    %216 = arith.mulf %215, %202 : vector<8x32xf32>
    %217 = vector.extract_strided_slice %214 {offsets = [0, 0], sizes = [8, 32], strides = [1, 1]} : vector<8x128xf32> to vector<8x32xf32>
    %218 = arith.addf %216, %217 : vector<8x32xf32>
    %219 = vector.extract_strided_slice %211 {offsets = [0, 96], sizes = [8, 32], strides = [1, 1]} : vector<8x128xf32> to vector<8x32xf32>
    %220 = math.tanh %218 : vector<8x32xf32>
    %221 = arith.mulf %219, %220 : vector<8x32xf32>
    %222 = arith.truncf %221 : vector<8x32xf32> to vector<8x32xbf16>
    %c0_95 = arith.constant 0 : index
    %c0_96 = arith.constant 0 : index
    %223 = vector.load %arg11[%c0_95, %c0_96] : memref<64x32xbf16, #tpu.memory_space<vmem>>, vector<8x32xbf16>
    tpu.vector_store %arg11[%c0_95, %c0_96], %222 {strides = array<i32>} : memref<64x32xbf16, #tpu.memory_space<vmem>>, vector<8x32xbf16>,
    %c8_97 = arith.constant 8 : index
    %c0_98 = arith.constant 0 : index
    %224 = vector.load %arg12[%c8_97, %c0_98] : memref<64x128xf32, #tpu.memory_space<vmem>>, vector<8x128xf32>
    %225 = arith.truncf %221 : vector<8x32xf32> to vector<8x32xbf16>
    %cst_99 = arith.constant dense<0.000000e+00> : vector<8x128xf32>
    %226 = tpu.matmul %225, %198, %cst_99 {dimension_numbers = #tpu.dot_dimension_numbers<[1], [0], [0], [1], [0, 0, 1, 1], [], []>} : vector<8x32xbf16>, vector<32x128xbf16>, vector<8x128xf32> -> vector<8x128xf32>
    %227 = arith.addf %224, %226 : vector<8x128xf32>
    %228 = arith.negf %227 : vector<8x128xf32>
    %229 = math.exp %228 : vector<8x128xf32>
    %cst_100 = arith.constant 1.000000e+00 : f32
    %230 = vector.broadcast %cst_100 : f32 to vector<8x128xf32>
    %231 = arith.addf %230, %229 : vector<8x128xf32>
    %232 = arith.divf %230, %231 : vector<8x128xf32>
    %233 = math.tanh %227 : vector<8x128xf32>
    %c64_i32_101 = arith.constant 64 : i32
    %234 = tpu.dynamic_rotate %233 by %c64_i32_101 dim 1 : vector<8x128xf32>, i32 -> vector<8x128xf32>
    %235 = arith.mulf %232, %234 : vector<8x128xf32>
    %236 = vector.extract_strided_slice %232 {offsets = [0, 32], sizes = [8, 32], strides = [1, 1]} : vector<8x128xf32> to vector<8x32xf32>
    %237 = arith.mulf %236, %218 : vector<8x32xf32>
    %238 = vector.extract_strided_slice %235 {offsets = [0, 0], sizes = [8, 32], strides = [1, 1]} : vector<8x128xf32> to vector<8x32xf32>
    %239 = arith.addf %237, %238 : vector<8x32xf32>
    %240 = vector.extract_strided_slice %232 {offsets = [0, 96], sizes = [8, 32], strides = [1, 1]} : vector<8x128xf32> to vector<8x32xf32>
    %241 = math.tanh %239 : vector<8x32xf32>
    %242 = arith.mulf %240, %241 : vector<8x32xf32>
    %243 = arith.truncf %242 : vector<8x32xf32> to vector<8x32xbf16>
    %c8_102 = arith.constant 8 : index
    %c0_103 = arith.constant 0 : index
    %244 = vector.load %arg11[%c8_102, %c0_103] : memref<64x32xbf16, #tpu.memory_space<vmem>>, vector<8x32xbf16>
    tpu.vector_store %arg11[%c8_102, %c0_103], %243 {strides = array<i32>} : memref<64x32xbf16, #tpu.memory_space<vmem>>, vector<8x32xbf16>,
    %c16_104 = arith.constant 16 : index
    %c0_105 = arith.constant 0 : index
    %245 = vector.load %arg12[%c16_104, %c0_105] : memref<64x128xf32, #tpu.memory_space<vmem>>, vector<8x128xf32>
    %246 = arith.truncf %242 : vector<8x32xf32> to vector<8x32xbf16>
    %cst_106 = arith.constant dense<0.000000e+00> : vector<8x128xf32>
    %247 = tpu.matmul %246, %198, %cst_106 {dimension_numbers = #tpu.dot_dimension_numbers<[1], [0], [0], [1], [0, 0, 1, 1], [], []>} : vector<8x32xbf16>, vector<32x128xbf16>, vector<8x128xf32> -> vector<8x128xf32>
    %248 = arith.addf %245, %247 : vector<8x128xf32>
    %249 = arith.negf %248 : vector<8x128xf32>
    %250 = math.exp %249 : vector<8x128xf32>
    %cst_107 = arith.constant 1.000000e+00 : f32
    %251 = vector.broadcast %cst_107 : f32 to vector<8x128xf32>
    %252 = arith.addf %251, %250 : vector<8x128xf32>
    %253 = arith.divf %251, %252 : vector<8x128xf32>
    %254 = math.tanh %248 : vector<8x128xf32>
    %c64_i32_108 = arith.constant 64 : i32
    %255 = tpu.dynamic_rotate %254 by %c64_i32_108 dim 1 : vector<8x128xf32>, i32 -> vector<8x128xf32>
    %256 = arith.mulf %253, %255 : vector<8x128xf32>
    %257 = vector.extract_strided_slice %253 {offsets = [0, 32], sizes = [8, 32], strides = [1, 1]} : vector<8x128xf32> to vector<8x32xf32>
    %258 = arith.mulf %257, %239 : vector<8x32xf32>
    %259 = vector.extract_strided_slice %256 {offsets = [0, 0], sizes = [8, 32], strides = [1, 1]} : vector<8x128xf32> to vector<8x32xf32>
    %260 = arith.addf %258, %259 : vector<8x32xf32>
    %261 = vector.extract_strided_slice %253 {offsets = [0, 96], sizes = [8, 32], strides = [1, 1]} : vector<8x128xf32> to vector<8x32xf32>
    %262 = math.tanh %260 : vector<8x32xf32>
    %263 = arith.mulf %261, %262 : vector<8x32xf32>
    %264 = arith.truncf %263 : vector<8x32xf32> to vector<8x32xbf16>
    %c16_109 = arith.constant 16 : index
    %c0_110 = arith.constant 0 : index
    %265 = vector.load %arg11[%c16_109, %c0_110] : memref<64x32xbf16, #tpu.memory_space<vmem>>, vector<8x32xbf16>
    tpu.vector_store %arg11[%c16_109, %c0_110], %264 {strides = array<i32>} : memref<64x32xbf16, #tpu.memory_space<vmem>>, vector<8x32xbf16>,
    %c24_111 = arith.constant 24 : index
    %c0_112 = arith.constant 0 : index
    %266 = vector.load %arg12[%c24_111, %c0_112] : memref<64x128xf32, #tpu.memory_space<vmem>>, vector<8x128xf32>
    %267 = arith.truncf %263 : vector<8x32xf32> to vector<8x32xbf16>
    %cst_113 = arith.constant dense<0.000000e+00> : vector<8x128xf32>
    %268 = tpu.matmul %267, %198, %cst_113 {dimension_numbers = #tpu.dot_dimension_numbers<[1], [0], [0], [1], [0, 0, 1, 1], [], []>} : vector<8x32xbf16>, vector<32x128xbf16>, vector<8x128xf32> -> vector<8x128xf32>
    %269 = arith.addf %266, %268 : vector<8x128xf32>
    %270 = arith.negf %269 : vector<8x128xf32>
    %271 = math.exp %270 : vector<8x128xf32>
    %cst_114 = arith.constant 1.000000e+00 : f32
    %272 = vector.broadcast %cst_114 : f32 to vector<8x128xf32>
    %273 = arith.addf %272, %271 : vector<8x128xf32>
    %274 = arith.divf %272, %273 : vector<8x128xf32>
    %275 = math.tanh %269 : vector<8x128xf32>
    %c64_i32_115 = arith.constant 64 : i32
    %276 = tpu.dynamic_rotate %275 by %c64_i32_115 dim 1 : vector<8x128xf32>, i32 -> vector<8x128xf32>
    %277 = arith.mulf %274, %276 : vector<8x128xf32>
    %278 = vector.extract_strided_slice %274 {offsets = [0, 32], sizes = [8, 32], strides = [1, 1]} : vector<8x128xf32> to vector<8x32xf32>
    %279 = arith.mulf %278, %260 : vector<8x32xf32>
    %280 = vector.extract_strided_slice %277 {offsets = [0, 0], sizes = [8, 32], strides = [1, 1]} : vector<8x128xf32> to vector<8x32xf32>
    %281 = arith.addf %279, %280 : vector<8x32xf32>
    %282 = vector.extract_strided_slice %274 {offsets = [0, 96], sizes = [8, 32], strides = [1, 1]} : vector<8x128xf32> to vector<8x32xf32>
    %283 = math.tanh %281 : vector<8x32xf32>
    %284 = arith.mulf %282, %283 : vector<8x32xf32>
    %285 = arith.truncf %284 : vector<8x32xf32> to vector<8x32xbf16>
    %c24_116 = arith.constant 24 : index
    %c0_117 = arith.constant 0 : index
    %286 = vector.load %arg11[%c24_116, %c0_117] : memref<64x32xbf16, #tpu.memory_space<vmem>>, vector<8x32xbf16>
    tpu.vector_store %arg11[%c24_116, %c0_117], %285 {strides = array<i32>} : memref<64x32xbf16, #tpu.memory_space<vmem>>, vector<8x32xbf16>,
    %c32_118 = arith.constant 32 : index
    %c0_119 = arith.constant 0 : index
    %287 = vector.load %arg12[%c32_118, %c0_119] : memref<64x128xf32, #tpu.memory_space<vmem>>, vector<8x128xf32>
    %288 = arith.truncf %284 : vector<8x32xf32> to vector<8x32xbf16>
    %cst_120 = arith.constant dense<0.000000e+00> : vector<8x128xf32>
    %289 = tpu.matmul %288, %198, %cst_120 {dimension_numbers = #tpu.dot_dimension_numbers<[1], [0], [0], [1], [0, 0, 1, 1], [], []>} : vector<8x32xbf16>, vector<32x128xbf16>, vector<8x128xf32> -> vector<8x128xf32>
    %290 = arith.addf %287, %289 : vector<8x128xf32>
    %291 = arith.negf %290 : vector<8x128xf32>
    %292 = math.exp %291 : vector<8x128xf32>
    %cst_121 = arith.constant 1.000000e+00 : f32
    %293 = vector.broadcast %cst_121 : f32 to vector<8x128xf32>
    %294 = arith.addf %293, %292 : vector<8x128xf32>
    %295 = arith.divf %293, %294 : vector<8x128xf32>
    %296 = math.tanh %290 : vector<8x128xf32>
    %c64_i32_122 = arith.constant 64 : i32
    %297 = tpu.dynamic_rotate %296 by %c64_i32_122 dim 1 : vector<8x128xf32>, i32 -> vector<8x128xf32>
    %298 = arith.mulf %295, %297 : vector<8x128xf32>
    %299 = vector.extract_strided_slice %295 {offsets = [0, 32], sizes = [8, 32], strides = [1, 1]} : vector<8x128xf32> to vector<8x32xf32>
    %300 = arith.mulf %299, %281 : vector<8x32xf32>
    %301 = vector.extract_strided_slice %298 {offsets = [0, 0], sizes = [8, 32], strides = [1, 1]} : vector<8x128xf32> to vector<8x32xf32>
    %302 = arith.addf %300, %301 : vector<8x32xf32>
    %303 = vector.extract_strided_slice %295 {offsets = [0, 96], sizes = [8, 32], strides = [1, 1]} : vector<8x128xf32> to vector<8x32xf32>
    %304 = math.tanh %302 : vector<8x32xf32>
    %305 = arith.mulf %303, %304 : vector<8x32xf32>
    %306 = arith.truncf %305 : vector<8x32xf32> to vector<8x32xbf16>
    %c32_123 = arith.constant 32 : index
    %c0_124 = arith.constant 0 : index
    %307 = vector.load %arg11[%c32_123, %c0_124] : memref<64x32xbf16, #tpu.memory_space<vmem>>, vector<8x32xbf16>
    tpu.vector_store %arg11[%c32_123, %c0_124], %306 {strides = array<i32>} : memref<64x32xbf16, #tpu.memory_space<vmem>>, vector<8x32xbf16>,
    %c40_125 = arith.constant 40 : index
    %c0_126 = arith.constant 0 : index
    %308 = vector.load %arg12[%c40_125, %c0_126] : memref<64x128xf32, #tpu.memory_space<vmem>>, vector<8x128xf32>
    %309 = arith.truncf %305 : vector<8x32xf32> to vector<8x32xbf16>
    %cst_127 = arith.constant dense<0.000000e+00> : vector<8x128xf32>
    %310 = tpu.matmul %309, %198, %cst_127 {dimension_numbers = #tpu.dot_dimension_numbers<[1], [0], [0], [1], [0, 0, 1, 1], [], []>} : vector<8x32xbf16>, vector<32x128xbf16>, vector<8x128xf32> -> vector<8x128xf32>
    %311 = arith.addf %308, %310 : vector<8x128xf32>
    %312 = arith.negf %311 : vector<8x128xf32>
    %313 = math.exp %312 : vector<8x128xf32>
    %cst_128 = arith.constant 1.000000e+00 : f32
    %314 = vector.broadcast %cst_128 : f32 to vector<8x128xf32>
    %315 = arith.addf %314, %313 : vector<8x128xf32>
    %316 = arith.divf %314, %315 : vector<8x128xf32>
    %317 = math.tanh %311 : vector<8x128xf32>
    %c64_i32_129 = arith.constant 64 : i32
    %318 = tpu.dynamic_rotate %317 by %c64_i32_129 dim 1 : vector<8x128xf32>, i32 -> vector<8x128xf32>
    %319 = arith.mulf %316, %318 : vector<8x128xf32>
    %320 = vector.extract_strided_slice %316 {offsets = [0, 32], sizes = [8, 32], strides = [1, 1]} : vector<8x128xf32> to vector<8x32xf32>
    %321 = arith.mulf %320, %302 : vector<8x32xf32>
    %322 = vector.extract_strided_slice %319 {offsets = [0, 0], sizes = [8, 32], strides = [1, 1]} : vector<8x128xf32> to vector<8x32xf32>
    %323 = arith.addf %321, %322 : vector<8x32xf32>
    %324 = vector.extract_strided_slice %316 {offsets = [0, 96], sizes = [8, 32], strides = [1, 1]} : vector<8x128xf32> to vector<8x32xf32>
    %325 = math.tanh %323 : vector<8x32xf32>
    %326 = arith.mulf %324, %325 : vector<8x32xf32>
    %327 = arith.truncf %326 : vector<8x32xf32> to vector<8x32xbf16>
    %c40_130 = arith.constant 40 : index
    %c0_131 = arith.constant 0 : index
    %328 = vector.load %arg11[%c40_130, %c0_131] : memref<64x32xbf16, #tpu.memory_space<vmem>>, vector<8x32xbf16>
    tpu.vector_store %arg11[%c40_130, %c0_131], %327 {strides = array<i32>} : memref<64x32xbf16, #tpu.memory_space<vmem>>, vector<8x32xbf16>,
    %c48_132 = arith.constant 48 : index
    %c0_133 = arith.constant 0 : index
    %329 = vector.load %arg12[%c48_132, %c0_133] : memref<64x128xf32, #tpu.memory_space<vmem>>, vector<8x128xf32>
    %330 = arith.truncf %326 : vector<8x32xf32> to vector<8x32xbf16>
    %cst_134 = arith.constant dense<0.000000e+00> : vector<8x128xf32>
    %331 = tpu.matmul %330, %198, %cst_134 {dimension_numbers = #tpu.dot_dimension_numbers<[1], [0], [0], [1], [0, 0, 1, 1], [], []>} : vector<8x32xbf16>, vector<32x128xbf16>, vector<8x128xf32> -> vector<8x128xf32>
    %332 = arith.addf %329, %331 : vector<8x128xf32>
    %333 = arith.negf %332 : vector<8x128xf32>
    %334 = math.exp %333 : vector<8x128xf32>
    %cst_135 = arith.constant 1.000000e+00 : f32
    %335 = vector.broadcast %cst_135 : f32 to vector<8x128xf32>
    %336 = arith.addf %335, %334 : vector<8x128xf32>
    %337 = arith.divf %335, %336 : vector<8x128xf32>
    %338 = math.tanh %332 : vector<8x128xf32>
    %c64_i32_136 = arith.constant 64 : i32
    %339 = tpu.dynamic_rotate %338 by %c64_i32_136 dim 1 : vector<8x128xf32>, i32 -> vector<8x128xf32>
    %340 = arith.mulf %337, %339 : vector<8x128xf32>
    %341 = vector.extract_strided_slice %337 {offsets = [0, 32], sizes = [8, 32], strides = [1, 1]} : vector<8x128xf32> to vector<8x32xf32>
    %342 = arith.mulf %341, %323 : vector<8x32xf32>
    %343 = vector.extract_strided_slice %340 {offsets = [0, 0], sizes = [8, 32], strides = [1, 1]} : vector<8x128xf32> to vector<8x32xf32>
    %344 = arith.addf %342, %343 : vector<8x32xf32>
    %345 = vector.extract_strided_slice %337 {offsets = [0, 96], sizes = [8, 32], strides = [1, 1]} : vector<8x128xf32> to vector<8x32xf32>
    %346 = math.tanh %344 : vector<8x32xf32>
    %347 = arith.mulf %345, %346 : vector<8x32xf32>
    %348 = arith.truncf %347 : vector<8x32xf32> to vector<8x32xbf16>
    %c48_137 = arith.constant 48 : index
    %c0_138 = arith.constant 0 : index
    %349 = vector.load %arg11[%c48_137, %c0_138] : memref<64x32xbf16, #tpu.memory_space<vmem>>, vector<8x32xbf16>
    tpu.vector_store %arg11[%c48_137, %c0_138], %348 {strides = array<i32>} : memref<64x32xbf16, #tpu.memory_space<vmem>>, vector<8x32xbf16>,
    %c56_139 = arith.constant 56 : index
    %c0_140 = arith.constant 0 : index
    %350 = vector.load %arg12[%c56_139, %c0_140] : memref<64x128xf32, #tpu.memory_space<vmem>>, vector<8x128xf32>
    %351 = arith.truncf %347 : vector<8x32xf32> to vector<8x32xbf16>
    %cst_141 = arith.constant dense<0.000000e+00> : vector<8x128xf32>
    %352 = tpu.matmul %351, %198, %cst_141 {dimension_numbers = #tpu.dot_dimension_numbers<[1], [0], [0], [1], [0, 0, 1, 1], [], []>} : vector<8x32xbf16>, vector<32x128xbf16>, vector<8x128xf32> -> vector<8x128xf32>
    %353 = arith.addf %350, %352 : vector<8x128xf32>
    %354 = arith.negf %353 : vector<8x128xf32>
    %355 = math.exp %354 : vector<8x128xf32>
    %cst_142 = arith.constant 1.000000e+00 : f32
    %356 = vector.broadcast %cst_142 : f32 to vector<8x128xf32>
    %357 = arith.addf %356, %355 : vector<8x128xf32>
    %358 = arith.divf %356, %357 : vector<8x128xf32>
    %359 = math.tanh %353 : vector<8x128xf32>
    %c64_i32_143 = arith.constant 64 : i32
    %360 = tpu.dynamic_rotate %359 by %c64_i32_143 dim 1 : vector<8x128xf32>, i32 -> vector<8x128xf32>
    %361 = arith.mulf %358, %360 : vector<8x128xf32>
    %362 = vector.extract_strided_slice %358 {offsets = [0, 32], sizes = [8, 32], strides = [1, 1]} : vector<8x128xf32> to vector<8x32xf32>
    %363 = arith.mulf %362, %344 : vector<8x32xf32>
    %364 = vector.extract_strided_slice %361 {offsets = [0, 0], sizes = [8, 32], strides = [1, 1]} : vector<8x128xf32> to vector<8x32xf32>
    %365 = arith.addf %363, %364 : vector<8x32xf32>
    %366 = vector.extract_strided_slice %358 {offsets = [0, 96], sizes = [8, 32], strides = [1, 1]} : vector<8x128xf32> to vector<8x32xf32>
    %367 = math.tanh %365 : vector<8x32xf32>
    %368 = arith.mulf %366, %367 : vector<8x32xf32>
    %369 = arith.truncf %368 : vector<8x32xf32> to vector<8x32xbf16>
    %c56_144 = arith.constant 56 : index
    %c0_145 = arith.constant 0 : index
    %370 = vector.load %arg11[%c56_144, %c0_145] : memref<64x32xbf16, #tpu.memory_space<vmem>>, vector<8x32xbf16>
    tpu.vector_store %arg11[%c56_144, %c0_145], %369 {strides = array<i32>} : memref<64x32xbf16, #tpu.memory_space<vmem>>, vector<8x32xbf16>,
    %c1_146 = arith.constant 1 : index
    %c0_147 = arith.constant 0 : index
    %c0_148 = arith.constant 0 : index
    %371 = vector.load %arg9[%c1_146, %c0_147, %c0_148] : memref<3x8x32xf32, #tpu.memory_space<vmem>>, vector<1x8x32xf32>
    %372 = vector.shape_cast %371 : vector<1x8x32xf32> to vector<8x32xf32>
    %373 = vector.shape_cast %368 : vector<8x32xf32> to vector<1x8x32xf32>
    tpu.vector_store %arg9[%c1_146, %c0_147, %c0_148], %373 {strides = array<i32>} : memref<3x8x32xf32, #tpu.memory_space<vmem>>, vector<1x8x32xf32>,
    %c1_149 = arith.constant 1 : index
    %c0_150 = arith.constant 0 : index
    %c0_151 = arith.constant 0 : index
    %374 = vector.load %arg10[%c1_149, %c0_150, %c0_151] : memref<3x8x32xf32, #tpu.memory_space<vmem>>, vector<1x8x32xf32>
    %375 = vector.shape_cast %374 : vector<1x8x32xf32> to vector<8x32xf32>
    %376 = vector.shape_cast %365 : vector<8x32xf32> to vector<1x8x32xf32>
    tpu.vector_store %arg10[%c1_149, %c0_150, %c0_151], %376 {strides = array<i32>} : memref<3x8x32xf32, #tpu.memory_space<vmem>>, vector<1x8x32xf32>,
    %c0_152 = arith.constant 0 : index
    %c0_153 = arith.constant 0 : index
    %377 = vector.load %arg11[%c0_152, %c0_153] : memref<64x32xbf16, #tpu.memory_space<vmem>>, vector<64x32xbf16>
    %c1_154 = arith.constant 1 : index
    %c0_155 = arith.constant 0 : index
    %c0_156 = arith.constant 0 : index
    %378 = vector.load %arg4[%c1_154, %c0_155, %c0_156] : memref<2x32x128xbf16, #tpu.memory_space<vmem>>, vector<1x32x128xbf16>
    %379 = vector.shape_cast %378 : vector<1x32x128xbf16> to vector<32x128xbf16>
    %cst_157 = arith.constant dense<0.000000e+00> : vector<64x128xf32>
    %380 = tpu.matmul %377, %379, %cst_157 {dimension_numbers = #tpu.dot_dimension_numbers<[1], [0], [0], [1], [0, 0, 1, 1], [], []>} : vector<64x32xbf16>, vector<32x128xbf16>, vector<64x128xf32> -> vector<64x128xf32>
    %c2 = arith.constant 2 : index
    %c0_158 = arith.constant 0 : index
    %c0_159 = arith.constant 0 : index
    %381 = vector.load %arg6[%c2, %c0_158, %c0_159] : memref<3x1x128xf32, #tpu.memory_space<vmem>>, vector<1x1x128xf32>
    %382 = vector.shape_cast %381 : vector<1x1x128xf32> to vector<1x128xf32>
    %383 = vector.broadcast %382 : vector<1x128xf32> to vector<64x128xf32>
    %384 = arith.addf %380, %383 : vector<64x128xf32>
    %c0_160 = arith.constant 0 : index
    %c0_161 = arith.constant 0 : index
    %385 = vector.load %arg12[%c0_160, %c0_161] : memref<64x128xf32, #tpu.memory_space<vmem>>, vector<64x128xf32>
    tpu.vector_store %arg12[%c0_160, %c0_161], %384 {strides = array<i32>} : memref<64x128xf32, #tpu.memory_space<vmem>>, vector<64x128xf32>,
    %c2_162 = arith.constant 2 : index
    %c0_163 = arith.constant 0 : index
    %c0_164 = arith.constant 0 : index
    %386 = vector.load %arg5[%c2_162, %c0_163, %c0_164] : memref<3x32x128xbf16, #tpu.memory_space<vmem>>, vector<1x32x128xbf16>
    %387 = vector.shape_cast %386 : vector<1x32x128xbf16> to vector<32x128xbf16>
    %c2_165 = arith.constant 2 : index
    %c0_166 = arith.constant 0 : index
    %c0_167 = arith.constant 0 : index
    %388 = vector.load %arg1[%c2_165, %c0_166, %c0_167] : memref<3x8x32xf32, #tpu.memory_space<vmem>>, vector<1x8x32xf32>
    %389 = vector.shape_cast %388 : vector<1x8x32xf32> to vector<8x32xf32>
    %c2_168 = arith.constant 2 : index
    %c0_169 = arith.constant 0 : index
    %c0_170 = arith.constant 0 : index
    %390 = vector.load %arg2[%c2_168, %c0_169, %c0_170] : memref<3x8x32xf32, #tpu.memory_space<vmem>>, vector<1x8x32xf32>
    %391 = vector.shape_cast %390 : vector<1x8x32xf32> to vector<8x32xf32>
    %c0_171 = arith.constant 0 : index
    %c0_172 = arith.constant 0 : index
    %392 = vector.load %arg12[%c0_171, %c0_172] : memref<64x128xf32, #tpu.memory_space<vmem>>, vector<8x128xf32>
    %393 = arith.truncf %389 : vector<8x32xf32> to vector<8x32xbf16>
    %cst_173 = arith.constant dense<0.000000e+00> : vector<8x128xf32>
    %394 = tpu.matmul %393, %387, %cst_173 {dimension_numbers = #tpu.dot_dimension_numbers<[1], [0], [0], [1], [0, 0, 1, 1], [], []>} : vector<8x32xbf16>, vector<32x128xbf16>, vector<8x128xf32> -> vector<8x128xf32>
    %395 = arith.addf %392, %394 : vector<8x128xf32>
    %396 = arith.negf %395 : vector<8x128xf32>
    %397 = math.exp %396 : vector<8x128xf32>
    %cst_174 = arith.constant 1.000000e+00 : f32
    %398 = vector.broadcast %cst_174 : f32 to vector<8x128xf32>
    %399 = arith.addf %398, %397 : vector<8x128xf32>
    %400 = arith.divf %398, %399 : vector<8x128xf32>
    %401 = math.tanh %395 : vector<8x128xf32>
    %c64_i32_175 = arith.constant 64 : i32
    %402 = tpu.dynamic_rotate %401 by %c64_i32_175 dim 1 : vector<8x128xf32>, i32 -> vector<8x128xf32>
    %403 = arith.mulf %400, %402 : vector<8x128xf32>
    %404 = vector.extract_strided_slice %400 {offsets = [0, 32], sizes = [8, 32], strides = [1, 1]} : vector<8x128xf32> to vector<8x32xf32>
    %405 = arith.mulf %404, %391 : vector<8x32xf32>
    %406 = vector.extract_strided_slice %403 {offsets = [0, 0], sizes = [8, 32], strides = [1, 1]} : vector<8x128xf32> to vector<8x32xf32>
    %407 = arith.addf %405, %406 : vector<8x32xf32>
    %408 = vector.extract_strided_slice %400 {offsets = [0, 96], sizes = [8, 32], strides = [1, 1]} : vector<8x128xf32> to vector<8x32xf32>
    %409 = math.tanh %407 : vector<8x32xf32>
    %410 = arith.mulf %408, %409 : vector<8x32xf32>
    %411 = arith.truncf %410 : vector<8x32xf32> to vector<8x32xbf16>
    %c0_176 = arith.constant 0 : index
    %c0_177 = arith.constant 0 : index
    %412 = vector.load %arg11[%c0_176, %c0_177] : memref<64x32xbf16, #tpu.memory_space<vmem>>, vector<8x32xbf16>
    tpu.vector_store %arg11[%c0_176, %c0_177], %411 {strides = array<i32>} : memref<64x32xbf16, #tpu.memory_space<vmem>>, vector<8x32xbf16>,
    %c8_178 = arith.constant 8 : index
    %c0_179 = arith.constant 0 : index
    %413 = vector.load %arg12[%c8_178, %c0_179] : memref<64x128xf32, #tpu.memory_space<vmem>>, vector<8x128xf32>
    %414 = arith.truncf %410 : vector<8x32xf32> to vector<8x32xbf16>
    %cst_180 = arith.constant dense<0.000000e+00> : vector<8x128xf32>
    %415 = tpu.matmul %414, %387, %cst_180 {dimension_numbers = #tpu.dot_dimension_numbers<[1], [0], [0], [1], [0, 0, 1, 1], [], []>} : vector<8x32xbf16>, vector<32x128xbf16>, vector<8x128xf32> -> vector<8x128xf32>
    %416 = arith.addf %413, %415 : vector<8x128xf32>
    %417 = arith.negf %416 : vector<8x128xf32>
    %418 = math.exp %417 : vector<8x128xf32>
    %cst_181 = arith.constant 1.000000e+00 : f32
    %419 = vector.broadcast %cst_181 : f32 to vector<8x128xf32>
    %420 = arith.addf %419, %418 : vector<8x128xf32>
    %421 = arith.divf %419, %420 : vector<8x128xf32>
    %422 = math.tanh %416 : vector<8x128xf32>
    %c64_i32_182 = arith.constant 64 : i32
    %423 = tpu.dynamic_rotate %422 by %c64_i32_182 dim 1 : vector<8x128xf32>, i32 -> vector<8x128xf32>
    %424 = arith.mulf %421, %423 : vector<8x128xf32>
    %425 = vector.extract_strided_slice %421 {offsets = [0, 32], sizes = [8, 32], strides = [1, 1]} : vector<8x128xf32> to vector<8x32xf32>
    %426 = arith.mulf %425, %407 : vector<8x32xf32>
    %427 = vector.extract_strided_slice %424 {offsets = [0, 0], sizes = [8, 32], strides = [1, 1]} : vector<8x128xf32> to vector<8x32xf32>
    %428 = arith.addf %426, %427 : vector<8x32xf32>
    %429 = vector.extract_strided_slice %421 {offsets = [0, 96], sizes = [8, 32], strides = [1, 1]} : vector<8x128xf32> to vector<8x32xf32>
    %430 = math.tanh %428 : vector<8x32xf32>
    %431 = arith.mulf %429, %430 : vector<8x32xf32>
    %432 = arith.truncf %431 : vector<8x32xf32> to vector<8x32xbf16>
    %c8_183 = arith.constant 8 : index
    %c0_184 = arith.constant 0 : index
    %433 = vector.load %arg11[%c8_183, %c0_184] : memref<64x32xbf16, #tpu.memory_space<vmem>>, vector<8x32xbf16>
    tpu.vector_store %arg11[%c8_183, %c0_184], %432 {strides = array<i32>} : memref<64x32xbf16, #tpu.memory_space<vmem>>, vector<8x32xbf16>,
    %c16_185 = arith.constant 16 : index
    %c0_186 = arith.constant 0 : index
    %434 = vector.load %arg12[%c16_185, %c0_186] : memref<64x128xf32, #tpu.memory_space<vmem>>, vector<8x128xf32>
    %435 = arith.truncf %431 : vector<8x32xf32> to vector<8x32xbf16>
    %cst_187 = arith.constant dense<0.000000e+00> : vector<8x128xf32>
    %436 = tpu.matmul %435, %387, %cst_187 {dimension_numbers = #tpu.dot_dimension_numbers<[1], [0], [0], [1], [0, 0, 1, 1], [], []>} : vector<8x32xbf16>, vector<32x128xbf16>, vector<8x128xf32> -> vector<8x128xf32>
    %437 = arith.addf %434, %436 : vector<8x128xf32>
    %438 = arith.negf %437 : vector<8x128xf32>
    %439 = math.exp %438 : vector<8x128xf32>
    %cst_188 = arith.constant 1.000000e+00 : f32
    %440 = vector.broadcast %cst_188 : f32 to vector<8x128xf32>
    %441 = arith.addf %440, %439 : vector<8x128xf32>
    %442 = arith.divf %440, %441 : vector<8x128xf32>
    %443 = math.tanh %437 : vector<8x128xf32>
    %c64_i32_189 = arith.constant 64 : i32
    %444 = tpu.dynamic_rotate %443 by %c64_i32_189 dim 1 : vector<8x128xf32>, i32 -> vector<8x128xf32>
    %445 = arith.mulf %442, %444 : vector<8x128xf32>
    %446 = vector.extract_strided_slice %442 {offsets = [0, 32], sizes = [8, 32], strides = [1, 1]} : vector<8x128xf32> to vector<8x32xf32>
    %447 = arith.mulf %446, %428 : vector<8x32xf32>
    %448 = vector.extract_strided_slice %445 {offsets = [0, 0], sizes = [8, 32], strides = [1, 1]} : vector<8x128xf32> to vector<8x32xf32>
    %449 = arith.addf %447, %448 : vector<8x32xf32>
    %450 = vector.extract_strided_slice %442 {offsets = [0, 96], sizes = [8, 32], strides = [1, 1]} : vector<8x128xf32> to vector<8x32xf32>
    %451 = math.tanh %449 : vector<8x32xf32>
    %452 = arith.mulf %450, %451 : vector<8x32xf32>
    %453 = arith.truncf %452 : vector<8x32xf32> to vector<8x32xbf16>
    %c16_190 = arith.constant 16 : index
    %c0_191 = arith.constant 0 : index
    %454 = vector.load %arg11[%c16_190, %c0_191] : memref<64x32xbf16, #tpu.memory_space<vmem>>, vector<8x32xbf16>
    tpu.vector_store %arg11[%c16_190, %c0_191], %453 {strides = array<i32>} : memref<64x32xbf16, #tpu.memory_space<vmem>>, vector<8x32xbf16>,
    %c24_192 = arith.constant 24 : index
    %c0_193 = arith.constant 0 : index
    %455 = vector.load %arg12[%c24_192, %c0_193] : memref<64x128xf32, #tpu.memory_space<vmem>>, vector<8x128xf32>
    %456 = arith.truncf %452 : vector<8x32xf32> to vector<8x32xbf16>
    %cst_194 = arith.constant dense<0.000000e+00> : vector<8x128xf32>
    %457 = tpu.matmul %456, %387, %cst_194 {dimension_numbers = #tpu.dot_dimension_numbers<[1], [0], [0], [1], [0, 0, 1, 1], [], []>} : vector<8x32xbf16>, vector<32x128xbf16>, vector<8x128xf32> -> vector<8x128xf32>
    %458 = arith.addf %455, %457 : vector<8x128xf32>
    %459 = arith.negf %458 : vector<8x128xf32>
    %460 = math.exp %459 : vector<8x128xf32>
    %cst_195 = arith.constant 1.000000e+00 : f32
    %461 = vector.broadcast %cst_195 : f32 to vector<8x128xf32>
    %462 = arith.addf %461, %460 : vector<8x128xf32>
    %463 = arith.divf %461, %462 : vector<8x128xf32>
    %464 = math.tanh %458 : vector<8x128xf32>
    %c64_i32_196 = arith.constant 64 : i32
    %465 = tpu.dynamic_rotate %464 by %c64_i32_196 dim 1 : vector<8x128xf32>, i32 -> vector<8x128xf32>
    %466 = arith.mulf %463, %465 : vector<8x128xf32>
    %467 = vector.extract_strided_slice %463 {offsets = [0, 32], sizes = [8, 32], strides = [1, 1]} : vector<8x128xf32> to vector<8x32xf32>
    %468 = arith.mulf %467, %449 : vector<8x32xf32>
    %469 = vector.extract_strided_slice %466 {offsets = [0, 0], sizes = [8, 32], strides = [1, 1]} : vector<8x128xf32> to vector<8x32xf32>
    %470 = arith.addf %468, %469 : vector<8x32xf32>
    %471 = vector.extract_strided_slice %463 {offsets = [0, 96], sizes = [8, 32], strides = [1, 1]} : vector<8x128xf32> to vector<8x32xf32>
    %472 = math.tanh %470 : vector<8x32xf32>
    %473 = arith.mulf %471, %472 : vector<8x32xf32>
    %474 = arith.truncf %473 : vector<8x32xf32> to vector<8x32xbf16>
    %c24_197 = arith.constant 24 : index
    %c0_198 = arith.constant 0 : index
    %475 = vector.load %arg11[%c24_197, %c0_198] : memref<64x32xbf16, #tpu.memory_space<vmem>>, vector<8x32xbf16>
    tpu.vector_store %arg11[%c24_197, %c0_198], %474 {strides = array<i32>} : memref<64x32xbf16, #tpu.memory_space<vmem>>, vector<8x32xbf16>,
    %c32_199 = arith.constant 32 : index
    %c0_200 = arith.constant 0 : index
    %476 = vector.load %arg12[%c32_199, %c0_200] : memref<64x128xf32, #tpu.memory_space<vmem>>, vector<8x128xf32>
    %477 = arith.truncf %473 : vector<8x32xf32> to vector<8x32xbf16>
    %cst_201 = arith.constant dense<0.000000e+00> : vector<8x128xf32>
    %478 = tpu.matmul %477, %387, %cst_201 {dimension_numbers = #tpu.dot_dimension_numbers<[1], [0], [0], [1], [0, 0, 1, 1], [], []>} : vector<8x32xbf16>, vector<32x128xbf16>, vector<8x128xf32> -> vector<8x128xf32>
    %479 = arith.addf %476, %478 : vector<8x128xf32>
    %480 = arith.negf %479 : vector<8x128xf32>
    %481 = math.exp %480 : vector<8x128xf32>
    %cst_202 = arith.constant 1.000000e+00 : f32
    %482 = vector.broadcast %cst_202 : f32 to vector<8x128xf32>
    %483 = arith.addf %482, %481 : vector<8x128xf32>
    %484 = arith.divf %482, %483 : vector<8x128xf32>
    %485 = math.tanh %479 : vector<8x128xf32>
    %c64_i32_203 = arith.constant 64 : i32
    %486 = tpu.dynamic_rotate %485 by %c64_i32_203 dim 1 : vector<8x128xf32>, i32 -> vector<8x128xf32>
    %487 = arith.mulf %484, %486 : vector<8x128xf32>
    %488 = vector.extract_strided_slice %484 {offsets = [0, 32], sizes = [8, 32], strides = [1, 1]} : vector<8x128xf32> to vector<8x32xf32>
    %489 = arith.mulf %488, %470 : vector<8x32xf32>
    %490 = vector.extract_strided_slice %487 {offsets = [0, 0], sizes = [8, 32], strides = [1, 1]} : vector<8x128xf32> to vector<8x32xf32>
    %491 = arith.addf %489, %490 : vector<8x32xf32>
    %492 = vector.extract_strided_slice %484 {offsets = [0, 96], sizes = [8, 32], strides = [1, 1]} : vector<8x128xf32> to vector<8x32xf32>
    %493 = math.tanh %491 : vector<8x32xf32>
    %494 = arith.mulf %492, %493 : vector<8x32xf32>
    %495 = arith.truncf %494 : vector<8x32xf32> to vector<8x32xbf16>
    %c32_204 = arith.constant 32 : index
    %c0_205 = arith.constant 0 : index
    %496 = vector.load %arg11[%c32_204, %c0_205] : memref<64x32xbf16, #tpu.memory_space<vmem>>, vector<8x32xbf16>
    tpu.vector_store %arg11[%c32_204, %c0_205], %495 {strides = array<i32>} : memref<64x32xbf16, #tpu.memory_space<vmem>>, vector<8x32xbf16>,
    %c40_206 = arith.constant 40 : index
    %c0_207 = arith.constant 0 : index
    %497 = vector.load %arg12[%c40_206, %c0_207] : memref<64x128xf32, #tpu.memory_space<vmem>>, vector<8x128xf32>
    %498 = arith.truncf %494 : vector<8x32xf32> to vector<8x32xbf16>
    %cst_208 = arith.constant dense<0.000000e+00> : vector<8x128xf32>
    %499 = tpu.matmul %498, %387, %cst_208 {dimension_numbers = #tpu.dot_dimension_numbers<[1], [0], [0], [1], [0, 0, 1, 1], [], []>} : vector<8x32xbf16>, vector<32x128xbf16>, vector<8x128xf32> -> vector<8x128xf32>
    %500 = arith.addf %497, %499 : vector<8x128xf32>
    %501 = arith.negf %500 : vector<8x128xf32>
    %502 = math.exp %501 : vector<8x128xf32>
    %cst_209 = arith.constant 1.000000e+00 : f32
    %503 = vector.broadcast %cst_209 : f32 to vector<8x128xf32>
    %504 = arith.addf %503, %502 : vector<8x128xf32>
    %505 = arith.divf %503, %504 : vector<8x128xf32>
    %506 = math.tanh %500 : vector<8x128xf32>
    %c64_i32_210 = arith.constant 64 : i32
    %507 = tpu.dynamic_rotate %506 by %c64_i32_210 dim 1 : vector<8x128xf32>, i32 -> vector<8x128xf32>
    %508 = arith.mulf %505, %507 : vector<8x128xf32>
    %509 = vector.extract_strided_slice %505 {offsets = [0, 32], sizes = [8, 32], strides = [1, 1]} : vector<8x128xf32> to vector<8x32xf32>
    %510 = arith.mulf %509, %491 : vector<8x32xf32>
    %511 = vector.extract_strided_slice %508 {offsets = [0, 0], sizes = [8, 32], strides = [1, 1]} : vector<8x128xf32> to vector<8x32xf32>
    %512 = arith.addf %510, %511 : vector<8x32xf32>
    %513 = vector.extract_strided_slice %505 {offsets = [0, 96], sizes = [8, 32], strides = [1, 1]} : vector<8x128xf32> to vector<8x32xf32>
    %514 = math.tanh %512 : vector<8x32xf32>
    %515 = arith.mulf %513, %514 : vector<8x32xf32>
    %516 = arith.truncf %515 : vector<8x32xf32> to vector<8x32xbf16>
    %c40_211 = arith.constant 40 : index
    %c0_212 = arith.constant 0 : index
    %517 = vector.load %arg11[%c40_211, %c0_212] : memref<64x32xbf16, #tpu.memory_space<vmem>>, vector<8x32xbf16>
    tpu.vector_store %arg11[%c40_211, %c0_212], %516 {strides = array<i32>} : memref<64x32xbf16, #tpu.memory_space<vmem>>, vector<8x32xbf16>,
    %c48_213 = arith.constant 48 : index
    %c0_214 = arith.constant 0 : index
    %518 = vector.load %arg12[%c48_213, %c0_214] : memref<64x128xf32, #tpu.memory_space<vmem>>, vector<8x128xf32>
    %519 = arith.truncf %515 : vector<8x32xf32> to vector<8x32xbf16>
    %cst_215 = arith.constant dense<0.000000e+00> : vector<8x128xf32>
    %520 = tpu.matmul %519, %387, %cst_215 {dimension_numbers = #tpu.dot_dimension_numbers<[1], [0], [0], [1], [0, 0, 1, 1], [], []>} : vector<8x32xbf16>, vector<32x128xbf16>, vector<8x128xf32> -> vector<8x128xf32>
    %521 = arith.addf %518, %520 : vector<8x128xf32>
    %522 = arith.negf %521 : vector<8x128xf32>
    %523 = math.exp %522 : vector<8x128xf32>
    %cst_216 = arith.constant 1.000000e+00 : f32
    %524 = vector.broadcast %cst_216 : f32 to vector<8x128xf32>
    %525 = arith.addf %524, %523 : vector<8x128xf32>
    %526 = arith.divf %524, %525 : vector<8x128xf32>
    %527 = math.tanh %521 : vector<8x128xf32>
    %c64_i32_217 = arith.constant 64 : i32
    %528 = tpu.dynamic_rotate %527 by %c64_i32_217 dim 1 : vector<8x128xf32>, i32 -> vector<8x128xf32>
    %529 = arith.mulf %526, %528 : vector<8x128xf32>
    %530 = vector.extract_strided_slice %526 {offsets = [0, 32], sizes = [8, 32], strides = [1, 1]} : vector<8x128xf32> to vector<8x32xf32>
    %531 = arith.mulf %530, %512 : vector<8x32xf32>
    %532 = vector.extract_strided_slice %529 {offsets = [0, 0], sizes = [8, 32], strides = [1, 1]} : vector<8x128xf32> to vector<8x32xf32>
    %533 = arith.addf %531, %532 : vector<8x32xf32>
    %534 = vector.extract_strided_slice %526 {offsets = [0, 96], sizes = [8, 32], strides = [1, 1]} : vector<8x128xf32> to vector<8x32xf32>
    %535 = math.tanh %533 : vector<8x32xf32>
    %536 = arith.mulf %534, %535 : vector<8x32xf32>
    %537 = arith.truncf %536 : vector<8x32xf32> to vector<8x32xbf16>
    %c48_218 = arith.constant 48 : index
    %c0_219 = arith.constant 0 : index
    %538 = vector.load %arg11[%c48_218, %c0_219] : memref<64x32xbf16, #tpu.memory_space<vmem>>, vector<8x32xbf16>
    tpu.vector_store %arg11[%c48_218, %c0_219], %537 {strides = array<i32>} : memref<64x32xbf16, #tpu.memory_space<vmem>>, vector<8x32xbf16>,
    %c56_220 = arith.constant 56 : index
    %c0_221 = arith.constant 0 : index
    %539 = vector.load %arg12[%c56_220, %c0_221] : memref<64x128xf32, #tpu.memory_space<vmem>>, vector<8x128xf32>
    %540 = arith.truncf %536 : vector<8x32xf32> to vector<8x32xbf16>
    %cst_222 = arith.constant dense<0.000000e+00> : vector<8x128xf32>
    %541 = tpu.matmul %540, %387, %cst_222 {dimension_numbers = #tpu.dot_dimension_numbers<[1], [0], [0], [1], [0, 0, 1, 1], [], []>} : vector<8x32xbf16>, vector<32x128xbf16>, vector<8x128xf32> -> vector<8x128xf32>
    %542 = arith.addf %539, %541 : vector<8x128xf32>
    %543 = arith.negf %542 : vector<8x128xf32>
    %544 = math.exp %543 : vector<8x128xf32>
    %cst_223 = arith.constant 1.000000e+00 : f32
    %545 = vector.broadcast %cst_223 : f32 to vector<8x128xf32>
    %546 = arith.addf %545, %544 : vector<8x128xf32>
    %547 = arith.divf %545, %546 : vector<8x128xf32>
    %548 = math.tanh %542 : vector<8x128xf32>
    %c64_i32_224 = arith.constant 64 : i32
    %549 = tpu.dynamic_rotate %548 by %c64_i32_224 dim 1 : vector<8x128xf32>, i32 -> vector<8x128xf32>
    %550 = arith.mulf %547, %549 : vector<8x128xf32>
    %551 = vector.extract_strided_slice %547 {offsets = [0, 32], sizes = [8, 32], strides = [1, 1]} : vector<8x128xf32> to vector<8x32xf32>
    %552 = arith.mulf %551, %533 : vector<8x32xf32>
    %553 = vector.extract_strided_slice %550 {offsets = [0, 0], sizes = [8, 32], strides = [1, 1]} : vector<8x128xf32> to vector<8x32xf32>
    %554 = arith.addf %552, %553 : vector<8x32xf32>
    %555 = vector.extract_strided_slice %547 {offsets = [0, 96], sizes = [8, 32], strides = [1, 1]} : vector<8x128xf32> to vector<8x32xf32>
    %556 = math.tanh %554 : vector<8x32xf32>
    %557 = arith.mulf %555, %556 : vector<8x32xf32>
    %558 = arith.truncf %557 : vector<8x32xf32> to vector<8x32xbf16>
    %c56_225 = arith.constant 56 : index
    %c0_226 = arith.constant 0 : index
    %559 = vector.load %arg11[%c56_225, %c0_226] : memref<64x32xbf16, #tpu.memory_space<vmem>>, vector<8x32xbf16>
    tpu.vector_store %arg11[%c56_225, %c0_226], %558 {strides = array<i32>} : memref<64x32xbf16, #tpu.memory_space<vmem>>, vector<8x32xbf16>,
    %c2_227 = arith.constant 2 : index
    %c0_228 = arith.constant 0 : index
    %c0_229 = arith.constant 0 : index
    %560 = vector.load %arg9[%c2_227, %c0_228, %c0_229] : memref<3x8x32xf32, #tpu.memory_space<vmem>>, vector<1x8x32xf32>
    %561 = vector.shape_cast %560 : vector<1x8x32xf32> to vector<8x32xf32>
    %562 = vector.shape_cast %557 : vector<8x32xf32> to vector<1x8x32xf32>
    tpu.vector_store %arg9[%c2_227, %c0_228, %c0_229], %562 {strides = array<i32>} : memref<3x8x32xf32, #tpu.memory_space<vmem>>, vector<1x8x32xf32>,
    %c2_230 = arith.constant 2 : index
    %c0_231 = arith.constant 0 : index
    %c0_232 = arith.constant 0 : index
    %563 = vector.load %arg10[%c2_230, %c0_231, %c0_232] : memref<3x8x32xf32, #tpu.memory_space<vmem>>, vector<1x8x32xf32>
    %564 = vector.shape_cast %563 : vector<1x8x32xf32> to vector<8x32xf32>
    %565 = vector.shape_cast %554 : vector<8x32xf32> to vector<1x8x32xf32>
    tpu.vector_store %arg10[%c2_230, %c0_231, %c0_232], %565 {strides = array<i32>} : memref<3x8x32xf32, #tpu.memory_space<vmem>>, vector<1x8x32xf32>,
    %c0_233 = arith.constant 0 : index
    %c0_234 = arith.constant 0 : index
    %566 = vector.load %arg11[%c0_233, %c0_234] : memref<64x32xbf16, #tpu.memory_space<vmem>>, vector<64x32xbf16>
    %c0_235 = arith.constant 0 : index
    %c0_236 = arith.constant 0 : index
    %567 = vector.load %arg7[%c0_235, %c0_236] : memref<32x16xbf16, #tpu.memory_space<vmem>>, vector<32x16xbf16>
    %cst_237 = arith.constant dense<0.000000e+00> : vector<64x16xf32>
    %568 = tpu.matmul %566, %567, %cst_237 {dimension_numbers = #tpu.dot_dimension_numbers<[1], [0], [0], [1], [0, 0, 1, 1], [], []>} : vector<64x32xbf16>, vector<32x16xbf16>, vector<64x16xf32> -> vector<64x16xf32>
    %c0_238 = arith.constant 0 : index
    %c0_239 = arith.constant 0 : index
    %569 = vector.load %arg8[%c0_238, %c0_239] : memref<64x16xf32, #tpu.memory_space<vmem>>, vector<64x16xf32>
    tpu.vector_store %arg8[%c0_238, %c0_239], %568 {strides = array<i32>} : memref<64x16xf32, #tpu.memory_space<vmem>>, vector<64x16xf32>,
    return
  }
}

</mosaic_0001>

<bundles_post_ra>
// kernel: tpu_custom_call.1
= control target key start
LH: loop header
LB: loop body
LE: loop exit
PB: predicated region body
PF: predicated region fallthrough
CT: control target
= control target key end

     0   :  { %16 = vsyncpa [#allocation5], 0  ;;  %s3977_s0 = inlined_call_operand.vmem [shape: bf16[64,32], index: 0, kind: input, shape index: {}]   ;;  %s3978_s1 = inlined_call_operand.hbm [shape: f32[3,8,32], index: 1, kind: input, shape index: {}]   ;;  %s3979_s2 = inlined_call_operand.hbm [shape: f32[3,8,32], index: 2, kind: input, shape index: {}]   ;;  %s3980_s3 = inlined_call_operand.hbm [shape: bf16[32,128], index: 3, kind: input, shape index: {}]   ;;  %s3981_s4 = inlined_call_operand.vmem [shape: bf16[2,32,128], index: 4, kind: input, shape index: {}]   ;;  %s3982_s5 = inlined_call_operand.vmem [shape: bf16[3,32,128], index: 5, kind: input, shape index: {}]   ;;  %s3983_s6 = inlined_call_operand.vmem [shape: f32[3,1,128], index: 6, kind: input, shape index: {}]   ;;  %s3984_s7 = inlined_call_operand.vmem [shape: bf16[32,16], index: 7, kind: input, shape index: {}]   ;;  %s3985_s8 = inlined_call_operand.vmem [shape: f32[64,16], index: 8, kind: output, shape index: {0}]   ;;  %s3986_s9 = inlined_call_operand.hbm [shape: f32[3,8,32], index: 9, kind: output, shape index: {1}]   ;;  %s3987_s10 = inlined_call_operand.hbm [shape: f32[3,8,32], index: 10, kind: output, shape index: {2}]  }
   0x1   :  { %17 = vsyncpa [#allocation8], 0 }
   0x2   :  { %18 = vsyncpa [#allocation6], 0 }
   0x3   :  { %19 = vsyncpa [#allocation12], 0  ;;  %s3257_s13 = smov [#allocation7]   ;;  %s3258_s15 = smov [#allocation4]  }
   0x4   :  { %s39_s14 = sshll.u32 %s3257_s13, 4  ;;  %s27_s16 = sshll.u32 %s3258_s15, 4  ;;  %s40_s14 = int_to_ptr.vmem [resolvable:$true] %s39_s14  ;;  %s3325_s16 = int_to_ptr.vmem [resolvable:$true] %s27_s16 }
   0x5   :  { %s3139_s19 = scalar_lea.hbm %s3979_s2, 384 }
   0x6   :  { %p3140_p0 = scmp.ne.s32.totalorder %s3979_s2, %s3139_s19  ;;  %p3143_p1 = scmp.lt.u32.totalorder %s3139_s19, %s3979_s2 }
   0x8   :  { %p3145_p2 = pnand %p3143_p1, %p3140_p0 }
   0xa   :  { %3148 = shalt.err (!%p3145_p2)
}
   0xb   :  { %s3149_s24 = scalar_lea.vmem %s40_s14, 384  ;;  %p3154_p4 = scmp.lt.s32.totalorder %s40_s14, %s40_s14 }
   0xc   :  { %p3150_p3 = scmp.ne.s32.totalorder %s40_s14, %s3149_s24  ;;  %p3155_p5 = scmp.lt.s32.totalorder %s3149_s24, %s3149_s24 }
   0xe   :  { %p3156_p6 = por %p3155_p5, %p3154_p4 }
  0x10   :  { %p3157_p7 = pnand %p3156_p6, %p3150_p3 }
  0x12   :  { %3160 = shalt.err (!%p3157_p7)
}
  0x13   :  { %s3259_s25 = smov 128   ;;  %s3260_s26 = smov 8  }
  0x14   :  { %45 = dma.hbm_to_vmem [thread:$0]  %s3979_s2, 384, %s40_s14, [#allocation8], %s3259_s25, %s3259_s25, %s3260_s26  }
  0x15   :  { %s3161_s11 = scalar_lea.hbm %s3978_s1, 384 }
  0x16   :  { %p3162_p8 = scmp.ne.s32.totalorder %s3978_s1, %s3161_s11  ;;  %p3165_p9 = scmp.lt.u32.totalorder %s3161_s11, %s3978_s1 }
  0x18   :  { %p3167_p10 = pnand %p3165_p9, %p3162_p8 }
  0x1a   :  { %3170 = shalt.err (!%p3167_p10)
}
  0x1b   :  { %s3171_s18 = scalar_lea.vmem %s3325_s16, 384  ;;  %p3176_p12 = scmp.lt.s32.totalorder %s3325_s16, %s3325_s16 }
  0x1c   :  { %p3172_p11 = scmp.ne.s32.totalorder %s3325_s16, %s3171_s18  ;;  %p3177_p13 = scmp.lt.s32.totalorder %s3171_s18, %s3171_s18 }
  0x1e   :  { %p3178_p0 = por %p3177_p13, %p3176_p12 }
  0x20   :  { %p3179_p1 = pnand %p3178_p0, %p3172_p11 }
  0x22   :  { %3182 = shalt.err (!%p3179_p1)
}
  0x23   :  { %33 = dma.hbm_to_vmem [thread:$0]  %s3978_s1, 384, %s3325_s16, [#allocation5], %s3259_s25, %s3259_s25, %s3260_s26  }
  0x24   :  { %s3261_s19 = smov [#allocation9]   ;;  %s3183_s23 = scalar_lea.hbm %s3980_s3, 256 }
  0x25   :  { %s51_s20 = sshll.u32 %s3261_s19, 4  ;;  %p3184_p2 = scmp.ne.s32.totalorder %s3980_s3, %s3183_s23  ;;  %s52_s20 = int_to_ptr.vmem [resolvable:$true] %s51_s20 }
  0x26   :  { %p3187_p3 = scmp.lt.u32.totalorder %s3183_s23, %s3980_s3 }
  0x28   :  { %p3189_p4 = pnand %p3187_p3, %p3184_p2 }
  0x2a   :  { %3192 = shalt.err (!%p3189_p4)
}
  0x2b   :  { %s3193_s30 = scalar_lea.vmem %s52_s20, 256  ;;  %p3198_p6 = scmp.lt.s32.totalorder %s52_s20, %s52_s20 }
  0x2c   :  { %p3194_p5 = scmp.ne.s32.totalorder %s52_s20, %s3193_s30  ;;  %p3199_p7 = scmp.lt.s32.totalorder %s3193_s30, %s3193_s30 }
  0x2e   :  { %p3200_p8 = por %p3199_p7, %p3198_p6 }
  0x30   :  { %p3201_p9 = pnand %p3200_p8, %p3194_p5 }
  0x32   :  { %3204 = shalt.err (!%p3201_p9)
}
  0x33   :  { %s3262_s1 = smov 64   ;;  %s3263_s16 = smov 4  }
  0x34   :  { %57 = dma.hbm_to_vmem [thread:$0]  %s3980_s3, 256, %s52_s20, [#allocation8], %s3262_s1, %s3262_s1, %s3263_s16  }
  0x35   :  { %3249 = dma.done.wait [#allocation5], 384  }
  0x36   :  { %3250 = vsyncadd [#allocation5], 4294966912 }
  0x37   :  { %3251 = dma.done.wait [#allocation8], 640  }
  0x38   :  { %3252 = vsyncadd [#allocation8], 4294966656  ;;  %v2929_v0 = vld [vmem:[#allocation9] sm:$0xff]   ;;  %v2930_v1 = vld [vmem:[#allocation9 + $0x8] sm:$0xff]   ;;  %vm127_vm0 = vcmask 261120   ;;  %v3264_v7 = vmov 0.0  }
  0x39   :  { %2912 = vmatprep.subr.bf16.mxu1 %v2929_v0  ;;  %2672 = vmatprep.subr.bf16.mxu0 %v2929_v0  ;;  %v2931_v2 = vld [vmem:[%s3977_s0 + $0x10] sm:$0xff]   ;;  %v2932_v3 = vld [vmem:[%s3977_s0 + $0x18] sm:$0xff]   ;;  %v2934_v4 = vld [vmem:[%s3977_s0] sm:$0xff]   ;;  %vm3265_vm1 = vmmov 0   ;;  %s3266_s27 = smov 32   ;;  %vm308_vm2 = vcmask 257024  }
  0x3a   :  { %2914 = vmatpush3.bf16.msra.mxu1 %v2929_v0  ;;  %2673 = vmatpush3.bf16.msra.mxu0 %v2929_v0  ;;  %v2935_v5 = vld [vmem:[%s3977_s0 + $0x8] sm:$0xff]   ;;  %v3392_v6 = vld [vmem:[%s3982_s5] sm:$0xff]   ;;  %v218_v34 = vld [vmem:[#allocation7] sm:$0xff]  ;;  %vm383_vm3 = vcmask 261124   ;;  %s3269_s29 = smov [#allocation11]  }
  0x3b   :  { %2913 = vmatprep.subr.bf16.mxu1 %v2930_v1  ;;  %2674 = vmatprep.subr.bf16.mxu0 %v2930_v1  ;;  %v3399_v8 = vld [vmem:[%s3982_s5 + $0x8] sm:$0xff]   ;;  %v217_v9 = vld [vmem:[#allocation4] sm:$0xff]  ;;  %s2458_s30 = sshll.u32 %s3269_s29, 4  ;;  %s3908_s30 = int_to_ptr.vmem [resolvable:$true] %s2458_s30 }
  0x3c   :  { %2680 = vmatprep.mubr.msk.bf16.mxu1 %vm127_vm0, %v2931_v2  ;;  %2676 = vmatprep.mubr.msk.bf16.mxu0 %vm127_vm0, %v2934_v4  ;;  %v220_v10 = vpack.c.bf16 %v217_v9, %v217_v9  ;;  %v2477_v11 = vld [vmem:[%s3983_s6] ss:$0 sm:$0xff] }
  0x3e   :  { %2915 = vmatpush3.bf16.msra.mxu1 %v2930_v1  ;;  %2675 = vmatpush3.bf16.msra.mxu0 %v2930_v1 }
  0x3f   :  { %2684 = vmatprep.subr.bf16.mxu1 %v3264_v7  ;;  %2700 = vmatprep.subr.bf16.mxu0 %v3264_v7 }
  0x41   :  { %2681 = vmatmul.mubr.msk.bf16.vlgmr.msra.gmra.mrb[0].mxu1 %vm127_vm0, %v2932_v3  ;;  %2677 = vmatmul.mubr.msk.bf16.vlgmr.msra.gmra.mrb[0].mxu0 %vm127_vm0, %v2935_v5 }
  0x42   :  { %2685 = vmatpush3.bf16.msra.mxu1 %v3392_v6  ;;  %2688 = vmatprep.mubr.msk.bf16.mxu1 %vm3265_vm1, %v3264_v7 }
  0x43   :  { %2686 = vmatprep.subr.bf16.mxu1 %v3264_v7  ;;  %2701 = vmatpush3.bf16.msra.mxu0 %v3392_v6 }
  0x44   :  { %2702 = vmatprep.subr.bf16.mxu0 %v3264_v7  ;;  %2704 = vmatprep.mubr.msk.bf16.mxu0 %vm3265_vm1, %v3264_v7 }
  0x46   :  { %2687 = vmatpush3.bf16.msra.mxu1 %v3399_v8 }
  0x47   :  { %2692 = vmatprep.subr.bf16.mxu1 %v3264_v7  ;;  %2703 = vmatpush3.bf16.msra.mxu0 %v3399_v8 }
  0x48   :  { %2716 = vmatprep.subr.bf16.mxu0 %v3264_v7 }
  0x49   :  { %2689 = vmatmul.mubr.msk.bf16.vlgmr.msra.gmra.mrb[4].mxu1 %vm127_vm0, %v220_v10 }
  0x4a   :  { %2693 = vmatpush3.bf16.msra.mxu1 %v3392_v6  ;;  %2696 = vmatprep.mubr.msk.bf16.mxu1 %vm3265_vm1, %v3264_v7 }
  0x4b   :  { %2694 = vmatprep.subr.bf16.mxu1 %v3264_v7 }
  0x4e   :  { %2695 = vmatpush3.bf16.msra.mxu1 %v3399_v8 }
  0x4f   :  { %2708 = vmatprep.subr.bf16.mxu1 %v3264_v7 }
 0x114   :  { %v2682_v12 = vpop.f32.mrb[0].mxu1  ;;  %v2678_v13 = vpop.f32.mrb[0].mxu0 }
 0x115   :  { %v3426_v14 = vadd.f32 %v2682_v12, %v2477_v11  ;;  %v190_v15 = vpop.f32.mrb[1].mxu1  ;;  %v3428_v16 = vadd.f32 %v2678_v13, %v2477_v11  ;;  %v174_v17 = vpop.f32.mrb[1].mxu0 }
 0x116   :  { %v3430_v18 = vadd.f32 %v2477_v11, %v190_v15  ;;  %v2683_v19 = vpop.f32.mrb[2].mxu1  ;;  %v2679_v20 = vpop.f32.mrb[2].mxu0  ;;  %v175_v27 = vadd.f32 %v2477_v11, %v174_v17 }
 0x117   :  { %v3432_v21 = vadd.f32 %v2683_v19, %v2477_v11  ;;  %v193_v22 = vpop.f32.mrb[3].mxu1  ;;  %v3434_v23 = vadd.f32 %v2679_v20, %v2477_v11  ;;  %v177_v24 = vpop.f32.mrb[3].mxu0 }
 0x118   :  { %v3436_v25 = vadd.f32 %v2477_v11, %v193_v22  ;;  %v178_v26 = vadd.f32 %v2477_v11, %v177_v24 }
 0x11c   :  { %v270_v28 = vpop.f32.mrb[4].mxu1 }
 0x11d   :  { %v276_v29 = vadd.f32 %v270_v28, %v175_v27  ;;  %v2690_v30 = vpop.f32.mrb[5].mxu1 }
 0x11e   :  { %v273_v31 = vpop.f32.mrb[6].mxu1 }
 0x11f   :  { %v2691_v32 = vpop.f32.mrb[7].mxu1  ;;  %2947 = vtanh.f32 %v276_v29  ;;  %v2491_v35 = vmul.f32 -1.442695, %v276_v29 }
 0x121   :  { %2949 = vpow2.f32 %v2491_v35 }
 0x129   :  { %v2948_v33 = vpop.eup %2947 }
 0x12a   :  { %284 = vrot.lane.b32.xlu0 %v2948_v33, %s3262_s1 }
 0x12b   :  { %v2950_v36 = vpop.eup %2949 }
 0x12c   :  { %v280_v37 = vadd.f32 1.0, %v2950_v36 }
 0x12e   :  { %288 = vrot.lane.b32.xlu0 %v218_v34, %s3266_s27  ;;  %2951 = vrcp.f32 %v280_v37 }
 0x138   :  { %v2952_v38 = vpop.eup %2951 }
 0x19c   :  { %v285_v39 = vpop.permute.xlu0 %284 }
 0x19d   :  { %v286_v40 = vmul.f32 %v2952_v38, %v285_v39 }
 0x19f   :  { %293 = vrot.lane.b32.xlu1 %v286_v40, %s3266_s27 }
 0x1a0   :  { %v289_v41 = vpop.permute.xlu0 %288 }
 0x1a1   :  { %v291_v42 = vmul.f32 %v2952_v38, %v289_v41 }
 0x211   :  { %v294_v43 = vpop.permute.xlu1 %293 }
 0x212   :  { %v296_v44 = vadd.f32 %v294_v43, %v291_v42 }
 0x214   :  { %2953 = vtanh.f32 %v296_v44 }
 0x21e   :  { %v2954_v45 = vpop.eup %2953 }
 0x21f   :  { %299 = vrot.lane.b32.xlu1 %v2954_v45, %s3262_s1 }
 0x291   :  { %v300_v46 = vpop.permute.xlu1 %299 }
 0x292   :  { %v302_v47 = vmul.f32 %v2952_v38, %v300_v46 }
 0x294   :  { %v303_v48 = vpack.c.bf16 %v302_v47, %v302_v47 }
 0x296   :  { %305 = vrot.lane.b32.xlu0 %v303_v48, %s3266_s27 }
 0x308   :  { %v306_v49 = vpop.permute.xlu0 %305 }
 0x309   :  { %309 = vst.msk [vmem:[#allocation2] sm:$0xf] %vm308_vm2, %v306_v49  ;;  %2697 = vmatmul.mubr.msk.bf16.vlgmr.msra.gmra.mrb[8].mxu1 %vm127_vm0, %v306_v49 }
 0x30a   :  { %2709 = vmatpush3.bf16.msra.mxu1 %v3392_v6  ;;  %2712 = vmatprep.mubr.msk.bf16.mxu1 %vm3265_vm1, %v3264_v7 }
 0x30b   :  { %2710 = vmatprep.subr.bf16.mxu1 %v3264_v7 }
 0x30e   :  { %2711 = vmatpush3.bf16.msra.mxu1 %v3399_v8 }
 0x30f   :  { %2724 = vmatprep.subr.bf16.mxu1 %v3264_v7 }
 0x3dc   :  { %v348_v50 = vpop.f32.mrb[8].mxu1 }
 0x3dd   :  { %v354_v51 = vadd.f32 %v348_v50, %v178_v26  ;;  %v2698_v52 = vpop.f32.mrb[9].mxu1 }
 0x3de   :  { %v351_v53 = vpop.f32.mrb[10].mxu1 }
 0x3df   :  { %2955 = vtanh.f32 %v354_v51  ;;  %v2699_v54 = vpop.f32.mrb[11].mxu1  ;;  %v2493_v56 = vmul.f32 -1.442695, %v354_v51 }
 0x3e1   :  { %2957 = vpow2.f32 %v2493_v56 }
 0x3e9   :  { %v2956_v55 = vpop.eup %2955 }
 0x3ea   :  { %362 = vrot.lane.b32.xlu1 %v2956_v55, %s3262_s1 }
 0x3eb   :  { %v2958_v57 = vpop.eup %2957 }
 0x3ec   :  { %v358_v58 = vadd.f32 1.0, %v2958_v57 }
 0x3ee   :  { %2959 = vrcp.f32 %v358_v58 }
 0x3f8   :  { %v2960_v59 = vpop.eup %2959 }
 0x3f9   :  { %v365_v62 = vmul.f32 %v2960_v59, %v296_v44 }
 0x45c   :  { %v363_v60 = vpop.permute.xlu1 %362 }
 0x45d   :  { %v364_v61 = vmul.f32 %v2960_v59, %v363_v60 }
 0x45f   :  { %367 = vrot.lane.b32.xlu0 %v364_v61, %s3266_s27 }
 0x4d1   :  { %v368_v63 = vpop.permute.xlu0 %367 }
 0x4d2   :  { %v370_v0 = vadd.f32 %v368_v63, %v365_v62 }
 0x4d4   :  { %2961 = vtanh.f32 %v370_v0 }
 0x4de   :  { %v2962_v1 = vpop.eup %2961 }
 0x4df   :  { %373 = vrot.lane.b32.xlu1 %v2962_v1, %s3262_s1 }
 0x551   :  { %v374_v2 = vpop.permute.xlu1 %373 }
 0x552   :  { %v376_v3 = vmul.f32 %v2960_v59, %v374_v2 }
 0x554   :  { %v3454_v4 = vpack.c.bf16 %v376_v3, %v376_v3 }
 0x556   :  { %386 = vrot.lane.b32.xlu0 %v3454_v4, %s3266_s27 }
 0x5c8   :  { %v387_v5 = vpop.permute.xlu0 %386 }
 0x5c9   :  { %2705 = vmatmul.mubr.msk.bf16.vlgmr.msra.gmra.mrb[4].mxu0 %vm127_vm0, %v387_v5 }
 0x5ca   :  { %2717 = vmatpush3.bf16.msra.mxu0 %v3392_v6  ;;  %2720 = vmatprep.mubr.msk.bf16.mxu0 %vm3265_vm1, %v3264_v7 }
 0x5cb   :  { %2718 = vmatprep.subr.bf16.mxu0 %v3264_v7 }
 0x5ce   :  { %2719 = vmatpush3.bf16.msra.mxu0 %v3399_v8 }
 0x5cf   :  { %2732 = vmatprep.subr.bf16.mxu0 %v3264_v7 }
 0x69c   :  { %v425_v9 = vpop.f32.mrb[4].mxu0 }
 0x69d   :  { %v431_v10 = vadd.f32 %v425_v9, %v3428_v16  ;;  %v2706_v11 = vpop.f32.mrb[5].mxu0 }
 0x69e   :  { %v428_v12 = vpop.f32.mrb[6].mxu0 }
 0x69f   :  { %2963 = vtanh.f32 %v431_v10  ;;  %v2707_v13 = vpop.f32.mrb[7].mxu0  ;;  %v2495_v17 = vmul.f32 -1.442695, %v431_v10 }
 0x6a1   :  { %2965 = vpow2.f32 %v2495_v17 }
 0x6a9   :  { %v2964_v15 = vpop.eup %2963 }
 0x6aa   :  { %439 = vrot.lane.b32.xlu1 %v2964_v15, %s3262_s1 }
 0x6ab   :  { %v2966_v19 = vpop.eup %2965 }
 0x6ac   :  { %v435_v20 = vadd.f32 1.0, %v2966_v19 }
 0x6ae   :  { %2967 = vrcp.f32 %v435_v20 }
 0x6b8   :  { %v2968_v22 = vpop.eup %2967 }
 0x6b9   :  { %v442_v27 = vmul.f32 %v2968_v22, %v370_v0 }
 0x71c   :  { %v440_v24 = vpop.permute.xlu1 %439 }
 0x71d   :  { %v441_v26 = vmul.f32 %v2968_v22, %v440_v24 }
 0x71f   :  { %444 = vrot.lane.b32.xlu0 %v441_v26, %s3266_s27 }
 0x791   :  { %v445_v28 = vpop.permute.xlu0 %444 }
 0x792   :  { %v447_v16 = vadd.f32 %v445_v28, %v442_v27 }
 0x794   :  { %2969 = vtanh.f32 %v447_v16 }
 0x79e   :  { %v2970_v29 = vpop.eup %2969 }
 0x79f   :  { %450 = vrot.lane.b32.xlu1 %v2970_v29, %s3262_s1 }
 0x811   :  { %v451_v30 = vpop.permute.xlu1 %450 }
 0x812   :  { %v453_v31 = vmul.f32 %v2968_v22, %v451_v30 }
 0x814   :  { %v454_v32 = vpack.c.bf16 %v453_v31, %v453_v31 }
 0x816   :  { %456 = vrot.lane.b32.xlu0 %v454_v32, %s3266_s27 }
 0x888   :  { %v457_v33 = vpop.permute.xlu0 %456 }
 0x889   :  { %459 = vst.msk [vmem:[#allocation2 + $0x8] sm:$0xf] %vm308_vm2, %v457_v33  ;;  %2713 = vmatmul.mubr.msk.bf16.vlgmr.msra.gmra.mrb[12].mxu1 %vm127_vm0, %v457_v33 }
 0x88a   :  { %2725 = vmatpush3.bf16.msra.mxu1 %v3392_v6  ;;  %2728 = vmatprep.mubr.msk.bf16.mxu1 %vm3265_vm1, %v3264_v7 }
 0x88b   :  { %2726 = vmatprep.subr.bf16.mxu1 %v3264_v7 }
 0x88e   :  { %2727 = vmatpush3.bf16.msra.mxu1 %v3399_v8 }
 0x88f   :  { %2740 = vmatprep.subr.bf16.mxu1 %v3264_v7 }
 0x95c   :  { %v498_v34 = vpop.f32.mrb[12].mxu1 }
 0x95d   :  { %v504_v35 = vadd.f32 %v498_v34, %v3434_v23  ;;  %v2714_v36 = vpop.f32.mrb[13].mxu1 }
 0x95e   :  { %v501_v37 = vpop.f32.mrb[14].mxu1 }
 0x95f   :  { %2971 = vtanh.f32 %v504_v35  ;;  %v2715_v38 = vpop.f32.mrb[15].mxu1  ;;  %v2497_v40 = vmul.f32 -1.442695, %v504_v35 }
 0x961   :  { %2973 = vpow2.f32 %v2497_v40 }
 0x969   :  { %v2972_v39 = vpop.eup %2971 }
 0x96a   :  { %512 = vrot.lane.b32.xlu1 %v2972_v39, %s3262_s1 }
 0x96b   :  { %v2974_v41 = vpop.eup %2973 }
 0x96c   :  { %v508_v42 = vadd.f32 1.0, %v2974_v41 }
 0x96e   :  { %2975 = vrcp.f32 %v508_v42 }
 0x978   :  { %v2976_v43 = vpop.eup %2975 }
 0x979   :  { %v515_v46 = vmul.f32 %v2976_v43, %v447_v16 }
 0x9dc   :  { %v513_v44 = vpop.permute.xlu1 %512 }
 0x9dd   :  { %v514_v45 = vmul.f32 %v2976_v43, %v513_v44 }
 0x9df   :  { %517 = vrot.lane.b32.xlu0 %v514_v45, %s3266_s27 }
 0xa51   :  { %v518_v47 = vpop.permute.xlu0 %517 }
 0xa52   :  { %v520_v23 = vadd.f32 %v518_v47, %v515_v46  ;;  %v379_v46 = vrot.slane %v3454_v4, 4  ;;  %v2938_v4 = vld [vmem:[%s3981_s4 + $0x8] sm:$0xff]  }
 0xa54   :  { %2977 = vtanh.f32 %v520_v23 }
 0xa5e   :  { %v2978_v48 = vpop.eup %2977 }
 0xa5f   :  { %523 = vrot.lane.b32.xlu1 %v2978_v48, %s3262_s1  ;;  %v2937_v48 = vld [vmem:[%s3981_s4] sm:$0xff]  }
 0xad1   :  { %v524_v49 = vpop.permute.xlu1 %523 }
 0xad2   :  { %v526_v50 = vmul.f32 %v2976_v43, %v524_v49 }
 0xad4   :  { %v3482_v51 = vpack.c.bf16 %v526_v50, %v526_v50 }
 0xad6   :  { %535 = vrot.lane.b32.xlu0 %v3482_v51, %s3266_s27 }
 0xb48   :  { %v536_v52 = vpop.permute.xlu0 %535 }
 0xb49   :  { %2721 = vmatmul.mubr.msk.bf16.vlgmr.msra.gmra.mrb[8].mxu0 %vm127_vm0, %v536_v52 }
 0xb4a   :  { %2733 = vmatpush3.bf16.msra.mxu0 %v3392_v6  ;;  %2736 = vmatprep.mubr.msk.bf16.mxu0 %vm3265_vm1, %v3264_v7 }
 0xb4b   :  { %2734 = vmatprep.subr.bf16.mxu0 %v3264_v7 }
 0xb4e   :  { %2735 = vmatpush3.bf16.msra.mxu0 %v3399_v8 }
 0xb4f   :  { %2748 = vmatprep.subr.bf16.mxu0 %v2937_v48 }
 0xc1c   :  { %v574_v53 = vpop.f32.mrb[8].mxu0 }
 0xc1d   :  { %v580_v54 = vadd.f32 %v574_v53, %v3430_v18  ;;  %v2722_v55 = vpop.f32.mrb[9].mxu0  ;;  %v529_v53 = vrot.slane %v3482_v51, 4  ;;  %v3547_v51 = vld [vmem:[%s3982_s5 + $0x18] sm:$0xff]  }
 0xc1e   :  { %v577_v56 = vpop.f32.mrb[10].mxu0 }
 0xc1f   :  { %2979 = vtanh.f32 %v580_v54  ;;  %v2723_v57 = vpop.f32.mrb[11].mxu0  ;;  %v2499_v59 = vmul.f32 -1.442695, %v580_v54 }
 0xc21   :  { %2981 = vpow2.f32 %v2499_v59  ;;  %v3539_v59 = vld [vmem:[%s3982_s5 + $0x10] sm:$0xff]  }
 0xc29   :  { %v2980_v58 = vpop.eup %2979 }
 0xc2a   :  { %588 = vrot.lane.b32.xlu1 %v2980_v58, %s3262_s1 }
 0xc2b   :  { %v2982_v60 = vpop.eup %2981 }
 0xc2c   :  { %v584_v61 = vadd.f32 1.0, %v2982_v60  ;;  %v963_v60 = vld [vmem:[#allocation7 + $0x8] sm:$0xff] }
 0xc2e   :  { %2983 = vrcp.f32 %v584_v61 }
 0xc38   :  { %v2984_v62 = vpop.eup %2983 }
 0xc39   :  { %v591_v1 = vmul.f32 %v2984_v62, %v520_v23 }
 0xc9c   :  { %v589_v63 = vpop.permute.xlu1 %588 }
 0xc9d   :  { %v590_v0 = vmul.f32 %v2984_v62, %v589_v63 }
 0xc9f   :  { %593 = vrot.lane.b32.xlu0 %v590_v0, %s3266_s27 }
 0xd11   :  { %v594_v2 = vpop.permute.xlu0 %593 }
 0xd12   :  { %v596_v18 = vadd.f32 %v594_v2, %v591_v1 }
 0xd14   :  { %2985 = vtanh.f32 %v596_v18 }
 0xd1e   :  { %v2986_v3 = vpop.eup %2985 }
 0xd1f   :  { %599 = vrot.lane.b32.xlu1 %v2986_v3, %s3262_s1 }
 0xd91   :  { %v600_v5 = vpop.permute.xlu1 %599 }
 0xd92   :  { %v602_v9 = vmul.f32 %v2984_v62, %v600_v5  ;;  %v961_v62 = vld [vmem:[#allocation4 + $0x8] sm:$0xff] }
 0xd93   :  { %v965_v63 = vpack.c.bf16 %v961_v62, %v961_v62 }
 0xd94   :  { %v603_v10 = vpack.c.bf16 %v602_v9, %v602_v9 }
 0xd96   :  { %605 = vrot.lane.b32.xlu0 %v603_v10, %s3266_s27 }
 0xe08   :  { %v606_v11 = vpop.permute.xlu0 %605 }
 0xe09   :  { %608 = vst.msk [vmem:[#allocation2 + $0x10] sm:$0xf] %vm308_vm2, %v606_v11  ;;  %2729 = vmatmul.mubr.msk.bf16.vlgmr.msra.gmra.mrb[16].mxu1 %vm127_vm0, %v606_v11 }
 0xe0a   :  { %2741 = vmatpush3.bf16.msra.mxu1 %v3392_v6  ;;  %2744 = vmatprep.mubr.msk.bf16.mxu1 %vm3265_vm1, %v3264_v7 }
 0xe0b   :  { %2742 = vmatprep.subr.bf16.mxu1 %v3264_v7 }
 0xe0e   :  { %2743 = vmatpush3.bf16.msra.mxu1 %v3399_v8 }
 0xe0f   :  { %2760 = vmatprep.subr.bf16.mxu1 %v3264_v7 }
 0xedc   :  { %v647_v12 = vpop.f32.mrb[16].mxu1 }
 0xedd   :  { %v653_v13 = vadd.f32 %v647_v12, %v3436_v25  ;;  %v2730_v15 = vpop.f32.mrb[17].mxu1  ;;  %v3577_v12 = vld [vmem:[%s3983_s6 + $0x1] ss:$0 sm:$0xff] }
 0xede   :  { %v650_v17 = vpop.f32.mrb[18].mxu1 }
 0xedf   :  { %2987 = vtanh.f32 %v653_v13  ;;  %v2731_v19 = vpop.f32.mrb[19].mxu1  ;;  %v2501_v6 = vmul.f32 -1.442695, %v653_v13 }
 0xee1   :  { %2989 = vpow2.f32 %v2501_v6 }
 0xee9   :  { %v2988_v20 = vpop.eup %2987 }
 0xeea   :  { %661 = vrot.lane.b32.xlu1 %v2988_v20, %s3262_s1 }
 0xeeb   :  { %v2990_v22 = vpop.eup %2989 }
 0xeec   :  { %v657_v24 = vadd.f32 1.0, %v2990_v22 }
 0xeee   :  { %2991 = vrcp.f32 %v657_v24 }
 0xef8   :  { %v2992_v26 = vpop.eup %2991 }
 0xef9   :  { %v664_v28 = vmul.f32 %v2992_v26, %v596_v18 }
 0xf5c   :  { %v662_v27 = vpop.permute.xlu1 %661 }
 0xf5d   :  { %v663_v8 = vmul.f32 %v2992_v26, %v662_v27 }
 0xf5f   :  { %666 = vrot.lane.b32.xlu0 %v663_v8, %s3266_s27 }
 0xfd1   :  { %v667_v16 = vpop.permute.xlu0 %666 }
 0xfd2   :  { %v669_v25 = vadd.f32 %v667_v16, %v664_v28 }
 0xfd4   :  { %2993 = vtanh.f32 %v669_v25 }
 0xfde   :  { %v2994_v29 = vpop.eup %2993 }
 0xfdf   :  { %672 = vrot.lane.b32.xlu1 %v2994_v29, %s3262_s1 }
0x1051   :  { %v673_v30 = vpop.permute.xlu1 %672 }
0x1052   :  { %v675_v31 = vmul.f32 %v2992_v26, %v673_v30 }
0x1054   :  { %v3509_v32 = vpack.c.bf16 %v675_v31, %v675_v31 }
0x1056   :  { %684 = vrot.lane.b32.xlu0 %v3509_v32, %s3266_s27 }
0x10c8   :  { %v685_v33 = vpop.permute.xlu0 %684 }
0x10c9   :  { %2737 = vmatmul.mubr.msk.bf16.vlgmr.msra.gmra.mrb[12].mxu0 %vm127_vm0, %v685_v33 }
0x10ca   :  { %2749 = vmatpush3.bf16.msra.mxu0 %v2937_v48 }
0x10cb   :  { %2750 = vmatprep.subr.bf16.mxu0 %v2938_v4 }
0x10ce   :  { %2751 = vmatpush3.bf16.msra.mxu0 %v2938_v4 }
0x10cf   :  { %2776 = vmatprep.subr.bf16.mxu0 %v3264_v7 }
0x119c   :  { %v723_v34 = vpop.f32.mrb[12].mxu0 }
0x119d   :  { %v729_v35 = vadd.f32 %v723_v34, %v3426_v14  ;;  %v2738_v36 = vpop.f32.mrb[13].mxu0 }
0x119e   :  { %v726_v37 = vpop.f32.mrb[14].mxu0 }
0x119f   :  { %2995 = vtanh.f32 %v729_v35  ;;  %v2739_v38 = vpop.f32.mrb[15].mxu0  ;;  %v2503_v40 = vmul.f32 -1.442695, %v729_v35 }
0x11a1   :  { %2997 = vpow2.f32 %v2503_v40 }
0x11a9   :  { %v2996_v39 = vpop.eup %2995 }
0x11aa   :  { %737 = vrot.lane.b32.xlu1 %v2996_v39, %s3262_s1 }
0x11ab   :  { %v2998_v41 = vpop.eup %2997 }
0x11ac   :  { %v733_v42 = vadd.f32 1.0, %v2998_v41 }
0x11ae   :  { %2999 = vrcp.f32 %v733_v42 }
0x11b8   :  { %v3000_v43 = vpop.eup %2999 }
0x11b9   :  { %v740_v14 = vmul.f32 %v3000_v43, %v669_v25 }
0x121c   :  { %v738_v44 = vpop.permute.xlu1 %737 }
0x121d   :  { %v739_v45 = vmul.f32 %v3000_v43, %v738_v44 }
0x121f   :  { %742 = vrot.lane.b32.xlu0 %v739_v45, %s3266_s27 }
0x1223   :  { %380 = vrot.lane.b32.xlu0 %v379_v46, %s3266_s27 }
0x1291   :  { %v743_v47 = vpop.permute.xlu0 %742 }
0x1292   :  { %v3519_v23 = vadd.f32 %v743_v47, %v740_v14  ;;  %v678_v47 = vrot.slane %v3509_v32, 4 }
0x1294   :  { %3001 = vtanh.f32 %v3519_v23 }
0x1295   :  { %v381_v49 = vpop.permute.xlu0 %380 }
0x1296   :  { %384 = vst.msk [vmem:[#allocation2] sm:$0xf0] %vm383_vm3, %v381_v49 }
0x129d   :  { %v842_v50 = vld [vmem:[#allocation2] sm:$0xff] }
0x129e   :  { %v3002_v52 = vpop.eup %3001  ;;  %2752 = vmatprep.mubr.msk.bf16.mxu0 %vm127_vm0, %v842_v50 }
0x129f   :  { %748 = vrot.lane.b32.xlu1 %v3002_v52, %s3262_s1 }
0x12a3   :  { %530 = vrot.lane.b32.xlu1 %v529_v53, %s3266_s27 }
0x1311   :  { %v749_v54 = vpop.permute.xlu1 %748 }
0x1312   :  { %v751_v55 = vmul.f32 %v3000_v43, %v749_v54 }
0x1314   :  { %v752_v56 = vpack.c.bf16 %v751_v55, %v751_v55 }
0x1315   :  { %v531_v57 = vpop.permute.xlu1 %530 }
0x1316   :  { %533 = vst.msk [vmem:[#allocation2 + $0x8] sm:$0xf0] %vm383_vm3, %v531_v57  ;;  %754 = vrot.lane.b32.xlu0 %v752_v56, %s3266_s27 }
0x131a   :  { %1033 = vrot.lane.b32.xlu0 %v963_v60, %s3266_s27 }
0x131d   :  { %v843_v58 = vld [vmem:[#allocation2 + $0x8] sm:$0xff] }
0x131e   :  { %2753 = vmatmul.mubr.msk.bf16.vlgmr.msra.gmra.mrb[16].mxu0 %vm127_vm0, %v843_v58 }
0x131f   :  { %2777 = vmatpush3.bf16.msra.mxu0 %v3539_v59 }
0x1320   :  { %2778 = vmatprep.subr.bf16.mxu0 %v3264_v7 }
0x1323   :  { %2779 = vmatpush3.bf16.msra.mxu0 %v3547_v51 }
0x1324   :  { %2792 = vmatprep.subr.bf16.mxu0 %v3264_v7 }
0x1388   :  { %v755_v61 = vpop.permute.xlu0 %754 }
0x1389   :  { %757 = vst.msk [vmem:[#allocation2 + $0x18] sm:$0xf] %vm308_vm2, %v755_v61  ;;  %2745 = vmatmul.mubr.msk.bf16.vlgmr.msra.gmra.mrb[20].mxu1 %vm127_vm0, %v755_v61 }
0x138a   :  { %2761 = vmatpush3.bf16.msra.mxu1 %v3539_v59  ;;  %2764 = vmatprep.mubr.msk.bf16.mxu1 %vm3265_vm1, %v3264_v7 }
0x138b   :  { %2762 = vmatprep.subr.bf16.mxu1 %v3264_v7 }
0x138c   :  { %v1034_v16 = vpop.permute.xlu0 %1033 }
0x138e   :  { %2763 = vmatpush3.bf16.msra.mxu1 %v3547_v51 }
0x138f   :  { %2768 = vmatprep.subr.bf16.mxu1 %v3264_v7 }
0x1391   :  { %2765 = vmatmul.mubr.msk.bf16.vlgmr.msra.gmra.mrb[24].mxu1 %vm127_vm0, %v965_v63 }
0x1392   :  { %2769 = vmatpush3.bf16.msra.mxu1 %v3539_v59  ;;  %2772 = vmatprep.mubr.msk.bf16.mxu1 %vm3265_vm1, %v3264_v7 }
0x1393   :  { %2770 = vmatprep.subr.bf16.mxu1 %v3264_v7 }
0x1396   :  { %2771 = vmatpush3.bf16.msra.mxu1 %v3547_v51 }
0x1397   :  { %2784 = vmatprep.subr.bf16.mxu1 %v3264_v7 }
0x13f1   :  { %v3567_v0 = vpop.f32.mrb[16].mxu0 }
0x13f2   :  { %v916_v1 = vpop.f32.mrb[17].mxu0 }
0x13f3   :  { %v3569_v2 = vpop.f32.mrb[18].mxu0  ;;  %v917_v13 = vadd.f32 %v3577_v12, %v916_v1 }
0x13f4   :  { %v3571_v18 = vpop.f32.mrb[19].mxu0 }
0x13f5   :  { %v920_v4 = vadd.f32 %v3577_v12, %v3571_v18 }
0x145c   :  { %v796_v3 = vpop.f32.mrb[20].mxu1 }
0x145d   :  { %v802_v5 = vadd.f32 %v796_v3, %v3432_v21  ;;  %v2746_v9 = vpop.f32.mrb[21].mxu1 }
0x145e   :  { %v799_v10 = vpop.f32.mrb[22].mxu1 }
0x145f   :  { %v2747_v11 = vpop.f32.mrb[23].mxu1  ;;  %v2505_v34 = vmul.f32 -1.442695, %v802_v5 }
0x1464   :  { %v1015_v15 = vpop.f32.mrb[24].mxu1 }
0x1465   :  { %v1021_v17 = vadd.f32 %v1015_v15, %v917_v13  ;;  %v2766_v19 = vpop.f32.mrb[25].mxu1 }
0x1466   :  { %v1018_v20 = vpop.f32.mrb[26].mxu1 }
0x1467   :  { %3003 = vtanh.f32 %v1021_v17  ;;  %v2767_v6 = vpop.f32.mrb[27].mxu1  ;;  %v2521_v21 = vmul.f32 -1.442695, %v1021_v17 }
0x1469   :  { %3005 = vpow2.f32 %v2521_v21 }
0x1471   :  { %v3004_v22 = vpop.eup %3003 }
0x1472   :  { %1029 = vrot.lane.b32.xlu1 %v3004_v22, %s3262_s1 }
0x1473   :  { %v3006_v24 = vpop.eup %3005 }
0x1474   :  { %v1025_v26 = vadd.f32 1.0, %v3006_v24 }
0x1476   :  { %3007 = vrcp.f32 %v1025_v26  ;;  %v925_v26 = vadd.f32 %v3567_v0, %v3577_v12 }
0x1480   :  { %v3008_v27 = vpop.eup %3007 }
0x1481   :  { %v1036_v25 = vmul.f32 %v3008_v27, %v1034_v16 }
0x14e4   :  { %v1030_v8 = vpop.permute.xlu1 %1029 }
0x14e5   :  { %v1031_v28 = vmul.f32 %v3008_v27, %v1030_v8 }
0x14e7   :  { %1038 = vrot.lane.b32.xlu1 %v1031_v28, %s3266_s27 }
0x1559   :  { %v1039_v29 = vpop.permute.xlu1 %1038 }
0x155a   :  { %v1041_v30 = vadd.f32 %v1039_v29, %v1036_v25 }
0x155c   :  { %3009 = vtanh.f32 %v1041_v30 }
0x155d   :  { %3011 = vtanh.f32 %v802_v5 }
0x155e   :  { %3013 = vpow2.f32 %v2505_v34 }
0x1566   :  { %v3010_v31 = vpop.eup %3009 }
0x1567   :  { %1044 = vrot.lane.b32.xlu0 %v3010_v31, %s3262_s1  ;;  %v3012_v33 = vpop.eup %3011 }
0x1568   :  { %v3014_v35 = vpop.eup %3013 }
0x1569   :  { %v806_v36 = vadd.f32 1.0, %v3014_v35 }
0x156b   :  { %810 = vrot.lane.b32.xlu0 %v3012_v33, %s3262_s1  ;;  %3015 = vrcp.f32 %v806_v36 }
0x1575   :  { %v3016_v40 = vpop.eup %3015 }
0x1576   :  { %v813_v44 = vmul.f32 %v3016_v40, %v3519_v23 }
0x15d9   :  { %v1045_v37 = vpop.permute.xlu0 %1044 }
0x15da   :  { %v1047_v38 = vmul.f32 %v3008_v27, %v1045_v37 }
0x15dc   :  { %v1048_v39 = vpack.c.bf16 %v1047_v38, %v1047_v38 }
0x15dd   :  { %v811_v41 = vpop.permute.xlu0 %810 }
0x15de   :  { %v812_v42 = vmul.f32 %v3016_v40, %v811_v41  ;;  %1050 = vrot.lane.b32.xlu1 %v1048_v39, %s3266_s27 }
0x15e0   :  { %815 = vrot.lane.b32.xlu0 %v812_v42, %s3266_s27 }
0x1650   :  { %v1051_v43 = vpop.permute.xlu1 %1050 }
0x1651   :  { %1053 = vst.msk [vmem:[#allocation2] sm:$0xf] %vm308_vm2, %v1051_v43  ;;  %2773 = vmatmul.mubr.msk.bf16.vlgmr.msra.gmra.mrb[28].mxu1 %vm127_vm0, %v1051_v43 }
0x1652   :  { %v816_v45 = vpop.permute.xlu0 %815  ;;  %2785 = vmatpush3.bf16.msra.mxu1 %v3539_v59  ;;  %2788 = vmatprep.mubr.msk.bf16.mxu1 %vm3265_vm1, %v3264_v7 }
0x1653   :  { %v3592_v46 = vadd.f32 %v816_v45, %v813_v44  ;;  %2786 = vmatprep.subr.bf16.mxu1 %v3264_v7  ;;  %v928_v44 = vadd.f32 %v3569_v2, %v3577_v12 }
0x1655   :  { %3017 = vtanh.f32 %v3592_v46 }
0x1656   :  { %2787 = vmatpush3.bf16.msra.mxu1 %v3547_v51 }
0x1657   :  { %2800 = vmatprep.subr.bf16.mxu1 %v3264_v7 }
0x165f   :  { %v3018_v14 = vpop.eup %3017 }
0x1660   :  { %821 = vrot.lane.b32.xlu0 %v3018_v14, %s3262_s1 }
0x1664   :  { %679 = vrot.lane.b32.xlu0 %v678_v47, %s3266_s27 }
0x16d2   :  { %v822_v23 = vpop.permute.xlu0 %821 }
0x16d3   :  { %v3607_v3 = vmul.f32 %v3016_v40, %v822_v23 }
0x16d5   :  { %v825_v5 = vpack.c.bf16 %v3607_v3, %v3607_v3 }
0x16d6   :  { %v680_v48 = vpop.permute.xlu0 %679 }
0x16d7   :  { %682 = vst.msk [vmem:[#allocation2 + $0x10] sm:$0xf0] %vm383_vm3, %v680_v48  ;;  %v827_v10 = vrot.slane %v825_v5, 4 }
0x16de   :  { %v844_v49 = vld [vmem:[#allocation2 + $0x10] sm:$0xff] }
0x16df   :  { %2756 = vmatprep.mubr.msk.bf16.mxu0 %vm127_vm0, %v844_v49 }
0x1724   :  { %v1092_v50 = vpop.f32.mrb[28].mxu1 }
0x1725   :  { %v1098_v52 = vadd.f32 %v1092_v50, %v920_v4  ;;  %v2774_v53 = vpop.f32.mrb[29].mxu1 }
0x1726   :  { %v1095_v54 = vpop.f32.mrb[30].mxu1 }
0x1727   :  { %3019 = vtanh.f32 %v1098_v52  ;;  %v2775_v55 = vpop.f32.mrb[31].mxu1  ;;  %v2523_v32 = vmul.f32 -1.442695, %v1098_v52 }
0x1729   :  { %3021 = vpow2.f32 %v2523_v32 }
0x1731   :  { %v3020_v56 = vpop.eup %3019 }
0x1732   :  { %1106 = vrot.lane.b32.xlu1 %v3020_v56, %s3262_s1 }
0x1733   :  { %v3022_v57 = vpop.eup %3021 }
0x1734   :  { %v1102_v58 = vadd.f32 1.0, %v3022_v57 }
0x1736   :  { %3023 = vrcp.f32 %v1102_v58 }
0x1740   :  { %v3024_v60 = vpop.eup %3023 }
0x1741   :  { %v1109_v63 = vmul.f32 %v3024_v60, %v1041_v30 }
0x17a4   :  { %v1107_v61 = vpop.permute.xlu1 %1106 }
0x17a5   :  { %v1108_v62 = vmul.f32 %v3024_v60, %v1107_v61 }
0x17a7   :  { %1111 = vrot.lane.b32.xlu1 %v1108_v62, %s3266_s27 }
0x1819   :  { %v1112_v1 = vpop.permute.xlu1 %1111 }
0x181a   :  { %v1114_v18 = vadd.f32 %v1112_v1, %v1109_v63 }
0x181c   :  { %3025 = vtanh.f32 %v1114_v18 }
0x1826   :  { %v3026_v9 = vpop.eup %3025 }
0x1827   :  { %1117 = vrot.lane.b32.xlu1 %v3026_v9, %s3262_s1 }
0x182b   :  { %828 = vrot.lane.b32.xlu1 %v827_v10, %s3266_s27 }
0x1899   :  { %v1118_v11 = vpop.permute.xlu1 %1117 }
0x189a   :  { %v1120_v13 = vmul.f32 %v3024_v60, %v1118_v11 }
0x189c   :  { %v3613_v15 = vpack.c.bf16 %v1120_v13, %v1120_v13 }
0x189d   :  { %v829_v17 = vpop.permute.xlu1 %828 }
0x189e   :  { %831 = vst.msk [vmem:[#allocation2 + $0x18] sm:$0xf0] %vm383_vm3, %v829_v17  ;;  %1129 = vrot.lane.b32.xlu0 %v3613_v15, %s3266_s27 }
0x18a5   :  { %v845_v19 = vld [vmem:[#allocation2 + $0x18] sm:$0xff] }
0x18a6   :  { %2757 = vmatmul.mubr.msk.bf16.gmra.mrb[20].mxu0 %vm127_vm0, %v845_v19 }
0x18a7   :  { %2780 = vmatprep.mubr.msk.bf16.mxu0 %vm3265_vm1, %v3264_v7 }
0x1910   :  { %v1130_v20 = vpop.permute.xlu0 %1129 }
0x1911   :  { %2781 = vmatmul.mubr.msk.bf16.vlgmr.msra.gmra.mrb[24].mxu0 %vm127_vm0, %v1130_v20 }
0x1912   :  { %2793 = vmatpush3.bf16.msra.mxu0 %v3539_v59  ;;  %2796 = vmatprep.mubr.msk.bf16.mxu0 %vm3265_vm1, %v3264_v7 }
0x1913   :  { %2794 = vmatprep.subr.bf16.mxu0 %v3264_v7 }
0x1916   :  { %2795 = vmatpush3.bf16.msra.mxu0 %v3547_v51 }
0x1917   :  { %2808 = vmatprep.subr.bf16.mxu0 %v3264_v7 }
0x1979   :  { %v3628_v6 = vpop.f32.mrb[20].mxu0 }
0x197a   :  { %v3630_v22 = vpop.f32.mrb[21].mxu0 }
0x197b   :  { %v3632_v21 = vpop.f32.mrb[22].mxu0  ;;  %v933_v63 = vadd.f32 %v3577_v12, %v3630_v22 }
0x197c   :  { %v3634_v24 = vpop.f32.mrb[23].mxu0 }
0x19e4   :  { %v1168_v27 = vpop.f32.mrb[24].mxu0 }
0x19e5   :  { %v1174_v8 = vadd.f32 %v1168_v27, %v925_v26  ;;  %v2782_v28 = vpop.f32.mrb[25].mxu0 }
0x19e6   :  { %v1171_v16 = vpop.f32.mrb[26].mxu0 }
0x19e7   :  { %3027 = vtanh.f32 %v1174_v8  ;;  %v2783_v25 = vpop.f32.mrb[27].mxu0  ;;  %v2525_v30 = vmul.f32 -1.442695, %v1174_v8 }
0x19e9   :  { %3029 = vpow2.f32 %v2525_v30 }
0x19f1   :  { %v3028_v29 = vpop.eup %3027 }
0x19f2   :  { %1182 = vrot.lane.b32.xlu1 %v3028_v29, %s3262_s1 }
0x19f3   :  { %v3030_v31 = vpop.eup %3029 }
0x19f4   :  { %v1178_v33 = vadd.f32 1.0, %v3030_v31 }
0x19f6   :  { %3031 = vrcp.f32 %v1178_v33  ;;  %v936_v33 = vadd.f32 %v3577_v12, %v3634_v24 }
0x1a00   :  { %v3032_v34 = vpop.eup %3031 }
0x1a01   :  { %v1185_v0 = vmul.f32 %v3032_v34, %v1114_v18 }
0x1a64   :  { %v1183_v35 = vpop.permute.xlu1 %1182 }
0x1a65   :  { %v1184_v36 = vmul.f32 %v3032_v34, %v1183_v35 }
0x1a67   :  { %1187 = vrot.lane.b32.xlu0 %v1184_v36, %s3266_s27 }
0x1ad9   :  { %v1188_v37 = vpop.permute.xlu0 %1187 }
0x1ada   :  { %v1190_v38 = vadd.f32 %v1188_v37, %v1185_v0 }
0x1adc   :  { %3033 = vtanh.f32 %v1190_v38 }
0x1ae6   :  { %v3034_v39 = vpop.eup %3033 }
0x1ae7   :  { %1193 = vrot.lane.b32.xlu1 %v3034_v39, %s3262_s1 }
0x1b59   :  { %v1194_v40 = vpop.permute.xlu1 %1193 }
0x1b5a   :  { %v1196_v41 = vmul.f32 %v3032_v34, %v1194_v40 }
0x1b5c   :  { %v1197_v42 = vpack.c.bf16 %v1196_v41, %v1196_v41 }
0x1b5e   :  { %1199 = vrot.lane.b32.xlu0 %v1197_v42, %s3266_s27 }
0x1bd0   :  { %v1200_v43 = vpop.permute.xlu0 %1199 }
0x1bd1   :  { %1202 = vst.msk [vmem:[#allocation2 + $0x8] sm:$0xf] %vm308_vm2, %v1200_v43  ;;  %2789 = vmatmul.mubr.msk.bf16.vlgmr.msra.gmra.mrb[32].mxu1 %vm127_vm0, %v1200_v43 }
0x1bd2   :  { %2801 = vmatpush3.bf16.msra.mxu1 %v3539_v59  ;;  %2804 = vmatprep.mubr.msk.bf16.mxu1 %vm3265_vm1, %v3264_v7 }
0x1bd3   :  { %2802 = vmatprep.subr.bf16.mxu1 %v3264_v7 }
0x1bd6   :  { %2803 = vmatpush3.bf16.msra.mxu1 %v3547_v51 }
0x1bd7   :  { %2816 = vmatprep.subr.bf16.mxu1 %v3264_v7 }
0x1ca4   :  { %v1241_v45 = vpop.f32.mrb[32].mxu1 }
0x1ca5   :  { %v1247_v14 = vadd.f32 %v1241_v45, %v928_v44  ;;  %v2790_v47 = vpop.f32.mrb[33].mxu1 }
0x1ca6   :  { %v1244_v23 = vpop.f32.mrb[34].mxu1 }
0x1ca7   :  { %3035 = vtanh.f32 %v1247_v14  ;;  %v2791_v48 = vpop.f32.mrb[35].mxu1  ;;  %v2527_v4 = vmul.f32 -1.442695, %v1247_v14 }
0x1ca9   :  { %3037 = vpow2.f32 %v2527_v4 }
0x1cb1   :  { %v3036_v49 = vpop.eup %3035 }
0x1cb2   :  { %1255 = vrot.lane.b32.xlu1 %v3036_v49, %s3262_s1  ;;  %v941_v49 = vadd.f32 %v3628_v6, %v3577_v12  ;;  %v1123_v6 = vrot.slane %v3613_v15, 4  ;;  %v2942_v15 = vld [vmem:[%s3981_s4 + $0x18] sm:$0xff]  }
0x1cb3   :  { %v3038_v50 = vpop.eup %3037 }
0x1cb4   :  { %v1251_v52 = vadd.f32 1.0, %v3038_v50 }
0x1cb6   :  { %3039 = vrcp.f32 %v1251_v52 }
0x1cc0   :  { %v3040_v53 = vpop.eup %3039 }
0x1cc1   :  { %v1258_v2 = vmul.f32 %v3040_v53, %v1190_v38 }
0x1d24   :  { %v1256_v54 = vpop.permute.xlu1 %1255 }
0x1d25   :  { %v1257_v55 = vmul.f32 %v3040_v53, %v1256_v54 }
0x1d27   :  { %1260 = vrot.lane.b32.xlu0 %v1257_v55, %s3266_s27 }
0x1d99   :  { %v1261_v56 = vpop.permute.xlu0 %1260 }
0x1d9a   :  { %v1263_v32 = vadd.f32 %v1261_v56, %v1258_v2 }
0x1d9c   :  { %3041 = vtanh.f32 %v1263_v32 }
0x1da6   :  { %v3042_v57 = vpop.eup %3041 }
0x1da7   :  { %1266 = vrot.lane.b32.xlu1 %v3042_v57, %s3262_s1 }
0x1e19   :  { %v1267_v58 = vpop.permute.xlu1 %1266 }
0x1e1a   :  { %v1269_v60 = vmul.f32 %v3040_v53, %v1267_v58 }
0x1e1c   :  { %v3655_v61 = vpack.c.bf16 %v1269_v60, %v1269_v60 }
0x1e1e   :  { %1278 = vrot.lane.b32.xlu0 %v3655_v61, %s3266_s27 }
0x1e90   :  { %v1279_v62 = vpop.permute.xlu0 %1278 }
0x1e91   :  { %2797 = vmatmul.mubr.msk.bf16.vlgmr.msra.gmra.mrb[28].mxu0 %vm127_vm0, %v1279_v62 }
0x1e92   :  { %2809 = vmatpush3.bf16.msra.mxu0 %v3539_v59  ;;  %2812 = vmatprep.mubr.msk.bf16.mxu0 %vm3265_vm1, %v3264_v7 }
0x1e93   :  { %2810 = vmatprep.subr.bf16.mxu0 %v3264_v7 }
0x1e96   :  { %2811 = vmatpush3.bf16.msra.mxu0 %v3547_v51 }
0x1f64   :  { %v1317_v1 = vpop.f32.mrb[28].mxu0 }
0x1f65   :  { %v1323_v18 = vadd.f32 %v1317_v1, %v933_v63  ;;  %v2798_v5 = vpop.f32.mrb[29].mxu0 }
0x1f66   :  { %v1320_v9 = vpop.f32.mrb[30].mxu0 }
0x1f67   :  { %3043 = vtanh.f32 %v1323_v18  ;;  %v2799_v10 = vpop.f32.mrb[31].mxu0  ;;  %v2529_v13 = vmul.f32 -1.442695, %v1323_v18  ;;  %v2941_v18 = vld [vmem:[%s3981_s4 + $0x10] sm:$0xff]  }
0x1f68   :  { %2824 = vmatprep.subr.bf16.mxu0 %v2941_v18 }
0x1f69   :  { %3045 = vpow2.f32 %v2529_v13 }
0x1f71   :  { %v3044_v11 = vpop.eup %3043 }
0x1f72   :  { %1331 = vrot.lane.b32.xlu1 %v3044_v11, %s3262_s1  ;;  %v1272_v11 = vrot.slane %v3655_v61, 4  ;;  %v3723_v61 = vld [vmem:[%s3982_s5 + $0x28] sm:$0xff]  }
0x1f73   :  { %v3046_v17 = vpop.eup %3045 }
0x1f74   :  { %v1327_v19 = vadd.f32 1.0, %v3046_v17 }
0x1f76   :  { %3047 = vrcp.f32 %v1327_v19 }
0x1f80   :  { %v3048_v20 = vpop.eup %3047 }
0x1f81   :  { %v1334_v22 = vmul.f32 %v3048_v20, %v1263_v32 }
0x1fe4   :  { %v1332_v26 = vpop.permute.xlu1 %1331 }
0x1fe5   :  { %v1333_v27 = vmul.f32 %v3048_v20, %v1332_v26 }
0x1fe7   :  { %1336 = vrot.lane.b32.xlu0 %v1333_v27, %s3266_s27  ;;  %v3715_v27 = vld [vmem:[%s3982_s5 + $0x20] sm:$0xff]  }
0x2059   :  { %v1337_v8 = vpop.permute.xlu0 %1336 }
0x205a   :  { %v1339_v28 = vadd.f32 %v1337_v8, %v1334_v22  ;;  %v1709_v22 = vld [vmem:[#allocation7 + $0x10] sm:$0xff] }
0x205c   :  { %3049 = vtanh.f32 %v1339_v28 }
0x2066   :  { %v3050_v16 = vpop.eup %3049 }
0x2067   :  { %1342 = vrot.lane.b32.xlu1 %v3050_v16, %s3262_s1 }
0x20d9   :  { %v1343_v25 = vpop.permute.xlu1 %1342 }
0x20da   :  { %v1345_v29 = vmul.f32 %v3048_v20, %v1343_v25 }
0x20dc   :  { %v1346_v30 = vpack.c.bf16 %v1345_v29, %v1345_v29 }
0x20de   :  { %1348 = vrot.lane.b32.xlu0 %v1346_v30, %s3266_s27 }
0x2150   :  { %v1349_v31 = vpop.permute.xlu0 %1348 }
0x2151   :  { %1351 = vst.msk [vmem:[#allocation2 + $0x10] sm:$0xf] %vm308_vm2, %v1349_v31  ;;  %2805 = vmatmul.mubr.msk.bf16.vlgmr.msra.gmra.mrb[36].mxu1 %vm127_vm0, %v1349_v31 }
0x2152   :  { %2817 = vmatpush3.bf16.msra.mxu1 %v3539_v59  ;;  %2820 = vmatprep.mubr.msk.bf16.mxu1 %vm3265_vm1, %v3264_v7 }
0x2153   :  { %2818 = vmatprep.subr.bf16.mxu1 %v3264_v7 }
0x2156   :  { %2819 = vmatpush3.bf16.msra.mxu1 %v3547_v51 }
0x2157   :  { %2836 = vmatprep.subr.bf16.mxu1 %v3264_v7 }
0x2224   :  { %v1390_v34 = vpop.f32.mrb[36].mxu1 }
0x2225   :  { %v1396_v35 = vadd.f32 %v1390_v34, %v936_v33  ;;  %v2806_v36 = vpop.f32.mrb[37].mxu1  ;;  %v944_v33 = vadd.f32 %v3632_v21, %v3577_v12 }
0x2226   :  { %v1393_v0 = vpop.f32.mrb[38].mxu1 }
0x2227   :  { %3051 = vtanh.f32 %v1396_v35  ;;  %v2807_v37 = vpop.f32.mrb[39].mxu1  ;;  %v2531_v59 = vmul.f32 -1.442695, %v1396_v35 }
0x2229   :  { %3053 = vpow2.f32 %v2531_v59 }
0x2231   :  { %v3052_v38 = vpop.eup %3051 }
0x2232   :  { %1404 = vrot.lane.b32.xlu1 %v3052_v38, %s3262_s1  ;;  %v3754_v38 = vld [vmem:[%s3983_s6 + $0x2] ss:$0 sm:$0xff] }
0x2233   :  { %v3054_v39 = vpop.eup %3053 }
0x2234   :  { %v1400_v40 = vadd.f32 1.0, %v3054_v39 }
0x2236   :  { %3055 = vrcp.f32 %v1400_v40 }
0x2240   :  { %v3056_v51 = vpop.eup %3055 }
0x2241   :  { %v1407_v24 = vmul.f32 %v3056_v51, %v1339_v28  ;;  %v1707_v28 = vld [vmem:[#allocation4 + $0x10] sm:$0xff] }
0x2242   :  { %v1711_v16 = vpack.c.bf16 %v1707_v28, %v1707_v28 }
0x22a4   :  { %v1405_v41 = vpop.permute.xlu1 %1404 }
0x22a5   :  { %v1406_v42 = vmul.f32 %v3056_v51, %v1405_v41 }
0x22a7   :  { %1409 = vrot.lane.b32.xlu0 %v1406_v42, %s3266_s27 }
0x2319   :  { %v1410_v43 = vpop.permute.xlu0 %1409 }
0x231a   :  { %v1412_v44 = vadd.f32 %v1410_v43, %v1407_v24 }
0x231c   :  { %3057 = vtanh.f32 %v1412_v44 }
0x2326   :  { %v3058_v45 = vpop.eup %3057 }
0x2327   :  { %1415 = vrot.lane.b32.xlu1 %v3058_v45, %s3262_s1 }
0x2399   :  { %v1416_v14 = vpop.permute.xlu1 %1415 }
0x239a   :  { %v1418_v47 = vmul.f32 %v3056_v51, %v1416_v14 }
0x239c   :  { %v3684_v23 = vpack.c.bf16 %v1418_v47, %v1418_v47 }
0x239e   :  { %1427 = vrot.lane.b32.xlu0 %v3684_v23, %s3266_s27 }
0x2410   :  { %v1428_v48 = vpop.permute.xlu0 %1427 }
0x2411   :  { %2813 = vmatmul.mubr.msk.bf16.vlgmr.msra.gmra.mrb[32].mxu0 %vm127_vm0, %v1428_v48 }
0x2412   :  { %2825 = vmatpush3.bf16.msra.mxu0 %v2941_v18 }
0x2413   :  { %2826 = vmatprep.subr.bf16.mxu0 %v2942_v15 }
0x2416   :  { %2827 = vmatpush3.bf16.msra.mxu0 %v2942_v15 }
0x2417   :  { %2852 = vmatprep.subr.bf16.mxu0 %v3264_v7 }
0x24e4   :  { %v1466_v4 = vpop.f32.mrb[32].mxu0 }
0x24e5   :  { %v1472_v50 = vadd.f32 %v1466_v4, %v941_v49  ;;  %v2814_v52 = vpop.f32.mrb[33].mxu0 }
0x24e6   :  { %v1469_v53 = vpop.f32.mrb[34].mxu0 }
0x24e7   :  { %3059 = vtanh.f32 %v1472_v50  ;;  %v2815_v54 = vpop.f32.mrb[35].mxu0  ;;  %v2533_v2 = vmul.f32 -1.442695, %v1472_v50 }
0x24e9   :  { %3061 = vpow2.f32 %v2533_v2 }
0x24f1   :  { %v3060_v55 = vpop.eup %3059 }
0x24f2   :  { %1480 = vrot.lane.b32.xlu1 %v3060_v55, %s3262_s1 }
0x24f3   :  { %v3062_v56 = vpop.eup %3061 }
0x24f4   :  { %v1476_v32 = vadd.f32 1.0, %v3062_v56 }
0x24f6   :  { %3063 = vrcp.f32 %v1476_v32 }
0x2500   :  { %v3064_v57 = vpop.eup %3063 }
0x2501   :  { %v1483_v62 = vmul.f32 %v3064_v57, %v1412_v44 }
0x2564   :  { %v1481_v58 = vpop.permute.xlu1 %1480 }
0x2565   :  { %v1482_v60 = vmul.f32 %v3064_v57, %v1481_v58 }
0x2567   :  { %1485 = vrot.lane.b32.xlu0 %v1482_v60, %s3266_s27 }
0x256b   :  { %1124 = vrot.lane.b32.xlu0 %v1123_v6, %s3266_s27 }
0x25d9   :  { %v1486_v63 = vpop.permute.xlu0 %1485 }
0x25da   :  { %v3695_v1 = vadd.f32 %v1486_v63, %v1483_v62 }
0x25dc   :  { %3065 = vtanh.f32 %v3695_v1 }
0x25dd   :  { %v1125_v5 = vpop.permute.xlu0 %1124 }
0x25de   :  { %1127 = vst.msk [vmem:[#allocation2] sm:$0xf0] %vm383_vm3, %v1125_v5 }
0x25e5   :  { %v1587_v9 = vld [vmem:[#allocation2] sm:$0xff] }
0x25e6   :  { %v3066_v10 = vpop.eup %3065  ;;  %2828 = vmatprep.mubr.msk.bf16.mxu0 %vm127_vm0, %v1587_v9 }
0x25e7   :  { %1491 = vrot.lane.b32.xlu1 %v3066_v10, %s3262_s1 }
0x25eb   :  { %1273 = vrot.lane.b32.xlu1 %v1272_v11, %s3266_s27 }
0x2659   :  { %v1492_v13 = vpop.permute.xlu1 %1491 }
0x265a   :  { %v1494_v17 = vmul.f32 %v3064_v57, %v1492_v13 }
0x265c   :  { %v1495_v19 = vpack.c.bf16 %v1494_v17, %v1494_v17 }
0x265d   :  { %v1274_v20 = vpop.permute.xlu1 %1273 }
0x265e   :  { %1276 = vst.msk [vmem:[#allocation2 + $0x8] sm:$0xf0] %vm383_vm3, %v1274_v20  ;;  %1497 = vrot.lane.b32.xlu0 %v1495_v19, %s3266_s27 }
0x2662   :  { %1779 = vrot.lane.b32.xlu0 %v1709_v22, %s3266_s27 }
0x2665   :  { %v1588_v26 = vld [vmem:[#allocation2 + $0x8] sm:$0xff] }
0x2666   :  { %2829 = vmatmul.mubr.msk.bf16.vlgmr.msra.gmra.mrb[36].mxu0 %vm127_vm0, %v1588_v26 }
0x2667   :  { %2853 = vmatpush3.bf16.msra.mxu0 %v3715_v27 }
0x2668   :  { %2854 = vmatprep.subr.bf16.mxu0 %v3264_v7 }
0x266b   :  { %2855 = vmatpush3.bf16.msra.mxu0 %v3723_v61 }
0x266c   :  { %2868 = vmatprep.subr.bf16.mxu0 %v3264_v7 }
0x26d0   :  { %v1498_v8 = vpop.permute.xlu0 %1497 }
0x26d1   :  { %1500 = vst.msk [vmem:[#allocation2 + $0x18] sm:$0xf] %vm308_vm2, %v1498_v8  ;;  %2821 = vmatmul.mubr.msk.bf16.vlgmr.msra.gmra.mrb[40].mxu1 %vm127_vm0, %v1498_v8 }
0x26d2   :  { %2837 = vmatpush3.bf16.msra.mxu1 %v3715_v27  ;;  %2840 = vmatprep.mubr.msk.bf16.mxu1 %vm3265_vm1, %v3264_v7 }
0x26d3   :  { %2838 = vmatprep.subr.bf16.mxu1 %v3264_v7 }
0x26d4   :  { %v1780_v47 = vpop.permute.xlu0 %1779 }
0x26d6   :  { %2839 = vmatpush3.bf16.msra.mxu1 %v3723_v61 }
0x26d7   :  { %2844 = vmatprep.subr.bf16.mxu1 %v3264_v7 }
0x26d9   :  { %2841 = vmatmul.mubr.msk.bf16.vlgmr.msra.gmra.mrb[44].mxu1 %vm127_vm0, %v1711_v16 }
0x26da   :  { %2845 = vmatpush3.bf16.msra.mxu1 %v3715_v27  ;;  %2848 = vmatprep.mubr.msk.bf16.mxu1 %vm3265_vm1, %v3264_v7 }
0x26db   :  { %2846 = vmatprep.subr.bf16.mxu1 %v3264_v7 }
0x26de   :  { %2847 = vmatpush3.bf16.msra.mxu1 %v3723_v61 }
0x26df   :  { %2860 = vmatprep.subr.bf16.mxu1 %v3264_v7 }
0x2739   :  { %v3743_v25 = vpop.f32.mrb[36].mxu0 }
0x273a   :  { %v1662_v29 = vpop.f32.mrb[37].mxu0 }
0x273b   :  { %v3745_v30 = vpop.f32.mrb[38].mxu0  ;;  %v1663_v59 = vadd.f32 %v3754_v38, %v1662_v29 }
0x273c   :  { %v3747_v31 = vpop.f32.mrb[39].mxu0 }
0x273d   :  { %v1666_v11 = vadd.f32 %v3754_v38, %v3747_v31 }
0x27a4   :  { %v1539_v34 = vpop.f32.mrb[40].mxu1 }
0x27a5   :  { %v1545_v35 = vadd.f32 %v1539_v34, %v944_v33  ;;  %v2822_v36 = vpop.f32.mrb[41].mxu1 }
0x27a6   :  { %v1542_v0 = vpop.f32.mrb[42].mxu1 }
0x27a7   :  { %v2823_v37 = vpop.f32.mrb[43].mxu1  ;;  %v2535_v53 = vmul.f32 -1.442695, %v1545_v35 }
0x27ac   :  { %v1761_v39 = vpop.f32.mrb[44].mxu1 }
0x27ad   :  { %v1767_v40 = vadd.f32 %v1761_v39, %v1663_v59  ;;  %v2842_v51 = vpop.f32.mrb[45].mxu1 }
0x27ae   :  { %v1764_v41 = vpop.f32.mrb[46].mxu1 }
0x27af   :  { %3067 = vtanh.f32 %v1767_v40  ;;  %v2843_v42 = vpop.f32.mrb[47].mxu1  ;;  %v2555_v12 = vmul.f32 -1.442695, %v1767_v40 }
0x27b1   :  { %3069 = vpow2.f32 %v2555_v12 }
0x27b9   :  { %v3068_v24 = vpop.eup %3067 }
0x27ba   :  { %1775 = vrot.lane.b32.xlu1 %v3068_v24, %s3262_s1 }
0x27bb   :  { %v3070_v21 = vpop.eup %3069 }
0x27bc   :  { %v1771_v43 = vadd.f32 1.0, %v3070_v21 }
0x27be   :  { %3071 = vrcp.f32 %v1771_v43 }
0x27c8   :  { %v3072_v44 = vpop.eup %3071 }
0x27c9   :  { %v1782_v48 = vmul.f32 %v3072_v44, %v1780_v47 }
0x282c   :  { %v1776_v45 = vpop.permute.xlu1 %1775 }
0x282d   :  { %v1777_v14 = vmul.f32 %v3072_v44, %v1776_v45  ;;  %v1671_v45 = vadd.f32 %v3743_v25, %v3754_v38 }
0x282f   :  { %1784 = vrot.lane.b32.xlu1 %v1777_v14, %s3266_s27 }
0x28a1   :  { %v1785_v49 = vpop.permute.xlu1 %1784 }
0x28a2   :  { %v1787_v4 = vadd.f32 %v1785_v49, %v1782_v48 }
0x28a4   :  { %3073 = vtanh.f32 %v1787_v4 }
0x28a5   :  { %3075 = vtanh.f32 %v1545_v35 }
0x28a6   :  { %3077 = vpow2.f32 %v2535_v53 }
0x28ae   :  { %v3074_v50 = vpop.eup %3073 }
0x28af   :  { %1790 = vrot.lane.b32.xlu0 %v3074_v50, %s3262_s1  ;;  %v3076_v52 = vpop.eup %3075 }
0x28b0   :  { %v3078_v54 = vpop.eup %3077 }
0x28b1   :  { %v1549_v55 = vadd.f32 1.0, %v3078_v54 }
0x28b3   :  { %1553 = vrot.lane.b32.xlu0 %v3076_v52, %s3262_s1  ;;  %3079 = vrcp.f32 %v1549_v55 }
0x28bd   :  { %v3080_v57 = vpop.eup %3079 }
0x28be   :  { %v1556_v62 = vmul.f32 %v3080_v57, %v3695_v1  ;;  %v1421_v1 = vrot.slane %v3684_v23, 4 }
0x2921   :  { %v1791_v2 = vpop.permute.xlu0 %1790 }
0x2922   :  { %v1793_v56 = vmul.f32 %v3072_v44, %v1791_v2 }
0x2924   :  { %v1794_v32 = vpack.c.bf16 %v1793_v56, %v1793_v56 }
0x2925   :  { %v1554_v58 = vpop.permute.xlu0 %1553 }
0x2926   :  { %v1555_v60 = vmul.f32 %v3080_v57, %v1554_v58  ;;  %1796 = vrot.lane.b32.xlu1 %v1794_v32, %s3266_s27 }
0x2928   :  { %1558 = vrot.lane.b32.xlu0 %v1555_v60, %s3266_s27 }
0x2998   :  { %v1797_v6 = vpop.permute.xlu1 %1796 }
0x2999   :  { %1799 = vst.msk [vmem:[#allocation2] sm:$0xf] %vm308_vm2, %v1797_v6  ;;  %2849 = vmatmul.mubr.msk.bf16.vlgmr.msra.gmra.mrb[48].mxu1 %vm127_vm0, %v1797_v6 }
0x299a   :  { %v1559_v63 = vpop.permute.xlu0 %1558  ;;  %2861 = vmatpush3.bf16.msra.mxu1 %v3715_v27  ;;  %2864 = vmatprep.mubr.msk.bf16.mxu1 %vm3265_vm1, %v3264_v7 }
0x299b   :  { %v3769_v18 = vadd.f32 %v1559_v63, %v1556_v62  ;;  %2862 = vmatprep.subr.bf16.mxu1 %v3264_v7 }
0x299d   :  { %3081 = vtanh.f32 %v3769_v18 }
0x299e   :  { %2863 = vmatpush3.bf16.msra.mxu1 %v3723_v61 }
0x299f   :  { %2876 = vmatprep.subr.bf16.mxu1 %v3264_v7 }
0x29a7   :  { %v3082_v5 = vpop.eup %3081 }
0x29a8   :  { %1564 = vrot.lane.b32.xlu0 %v3082_v5, %s3262_s1  ;;  %v1674_v5 = vadd.f32 %v3745_v30, %v3754_v38 }
0x29ac   :  { %1422 = vrot.lane.b32.xlu0 %v1421_v1, %s3266_s27 }
0x2a1a   :  { %v1565_v15 = vpop.permute.xlu0 %1564 }
0x2a1b   :  { %v3784_v36 = vmul.f32 %v3080_v57, %v1565_v15 }
0x2a1d   :  { %v1568_v0 = vpack.c.bf16 %v3784_v36, %v3784_v36 }
0x2a1e   :  { %v1423_v9 = vpop.permute.xlu0 %1422 }
0x2a1f   :  { %1425 = vst.msk [vmem:[#allocation2 + $0x10] sm:$0xf0] %vm383_vm3, %v1423_v9  ;;  %v1570_v59 = vrot.slane %v1568_v0, 4 }
0x2a26   :  { %v1589_v10 = vld [vmem:[#allocation2 + $0x10] sm:$0xff] }
0x2a27   :  { %2832 = vmatprep.mubr.msk.bf16.mxu0 %vm127_vm0, %v1589_v10 }
0x2a6c   :  { %v1838_v13 = vpop.f32.mrb[48].mxu1 }
0x2a6d   :  { %v1844_v17 = vadd.f32 %v1838_v13, %v1666_v11  ;;  %v2850_v19 = vpop.f32.mrb[49].mxu1 }
0x2a6e   :  { %v1841_v20 = vpop.f32.mrb[50].mxu1 }
0x2a6f   :  { %3083 = vtanh.f32 %v1844_v17  ;;  %v2851_v26 = vpop.f32.mrb[51].mxu1  ;;  %v2557_v23 = vmul.f32 -1.442695, %v1844_v17 }
0x2a71   :  { %3085 = vpow2.f32 %v2557_v23 }
0x2a79   :  { %v3084_v22 = vpop.eup %3083 }
0x2a7a   :  { %1852 = vrot.lane.b32.xlu1 %v3084_v22, %s3262_s1 }
0x2a7b   :  { %v3086_v8 = vpop.eup %3085 }
0x2a7c   :  { %v1848_v28 = vadd.f32 1.0, %v3086_v8 }
0x2a7e   :  { %3087 = vrcp.f32 %v1848_v28 }
0x2a88   :  { %v3088_v16 = vpop.eup %3087 }
0x2a89   :  { %v1855_v31 = vmul.f32 %v3088_v16, %v1787_v4 }
0x2aec   :  { %v1853_v29 = vpop.permute.xlu1 %1852 }
0x2aed   :  { %v1854_v33 = vmul.f32 %v3088_v16, %v1853_v29 }
0x2aef   :  { %1857 = vrot.lane.b32.xlu1 %v1854_v33, %s3266_s27 }
0x2b61   :  { %v1858_v34 = vpop.permute.xlu1 %1857 }
0x2b62   :  { %v1860_v35 = vadd.f32 %v1858_v34, %v1855_v31 }
0x2b64   :  { %3089 = vtanh.f32 %v1860_v35 }
0x2b6e   :  { %v3090_v37 = vpop.eup %3089 }
0x2b6f   :  { %1863 = vrot.lane.b32.xlu1 %v3090_v37, %s3262_s1 }
0x2b73   :  { %1571 = vrot.lane.b32.xlu1 %v1570_v59, %s3266_s27 }
0x2be1   :  { %v1864_v39 = vpop.permute.xlu1 %1863 }
0x2be2   :  { %v1866_v40 = vmul.f32 %v3088_v16, %v1864_v39 }
0x2be4   :  { %v3790_v51 = vpack.c.bf16 %v1866_v40, %v1866_v40 }
0x2be5   :  { %v1572_v41 = vpop.permute.xlu1 %1571 }
0x2be6   :  { %1574 = vst.msk [vmem:[#allocation2 + $0x18] sm:$0xf0] %vm383_vm3, %v1572_v41  ;;  %1875 = vrot.lane.b32.xlu0 %v3790_v51, %s3266_s27 }
0x2bed   :  { %v1590_v42 = vld [vmem:[#allocation2 + $0x18] sm:$0xff] }
0x2bee   :  { %2833 = vmatmul.mubr.msk.bf16.gmra.mrb[40].mxu0 %vm127_vm0, %v1590_v42 }
0x2bef   :  { %2856 = vmatprep.mubr.msk.bf16.mxu0 %vm3265_vm1, %v3264_v7 }
0x2c58   :  { %v1876_v24 = vpop.permute.xlu0 %1875 }
0x2c59   :  { %2857 = vmatmul.mubr.msk.bf16.vlgmr.msra.gmra.mrb[44].mxu0 %vm127_vm0, %v1876_v24 }
0x2c5a   :  { %2869 = vmatpush3.bf16.msra.mxu0 %v3715_v27  ;;  %2872 = vmatprep.mubr.msk.bf16.mxu0 %vm3265_vm1, %v3264_v7 }
0x2c5b   :  { %2870 = vmatprep.subr.bf16.mxu0 %v3264_v7 }
0x2c5e   :  { %2871 = vmatpush3.bf16.msra.mxu0 %v3723_v61 }
0x2c5f   :  { %2884 = vmatprep.subr.bf16.mxu0 %v3264_v7 }
0x2cc1   :  { %v3805_v12 = vpop.f32.mrb[40].mxu0 }
0x2cc2   :  { %v3807_v21 = vpop.f32.mrb[41].mxu0 }
0x2cc3   :  { %v3809_v43 = vpop.f32.mrb[42].mxu0 }
0x2cc4   :  { %v3811_v44 = vpop.f32.mrb[43].mxu0 }
0x2d2c   :  { %v1914_v14 = vpop.f32.mrb[44].mxu0 }
0x2d2d   :  { %v1920_v47 = vadd.f32 %v1914_v14, %v1671_v45  ;;  %v2858_v48 = vpop.f32.mrb[45].mxu0 }
0x2d2e   :  { %v1917_v49 = vpop.f32.mrb[46].mxu0 }
0x2d2f   :  { %3091 = vtanh.f32 %v1920_v47  ;;  %v2859_v4 = vpop.f32.mrb[47].mxu0  ;;  %v2559_v52 = vmul.f32 -1.442695, %v1920_v47 }
0x2d31   :  { %3093 = vpow2.f32 %v2559_v52 }
0x2d39   :  { %v3092_v50 = vpop.eup %3091 }
0x2d3a   :  { %1928 = vrot.lane.b32.xlu1 %v3092_v50, %s3262_s1 }
0x2d3b   :  { %v3094_v53 = vpop.eup %3093 }
0x2d3c   :  { %v1924_v54 = vadd.f32 1.0, %v3094_v53 }
0x2d3e   :  { %3095 = vrcp.f32 %v1924_v54 }
0x2d48   :  { %v3096_v55 = vpop.eup %3095 }
0x2d49   :  { %v1931_v25 = vmul.f32 %v3096_v55, %v1860_v35  ;;  %v1679_v35 = vadd.f32 %v3754_v38, %v3807_v21 }
0x2dac   :  { %v1929_v2 = vpop.permute.xlu1 %1928 }
0x2dad   :  { %v1930_v56 = vmul.f32 %v3096_v55, %v1929_v2  ;;  %v1682_v2 = vadd.f32 %v3754_v38, %v3811_v44 }
0x2daf   :  { %1933 = vrot.lane.b32.xlu0 %v1930_v56, %s3266_s27 }
0x2e21   :  { %v1934_v32 = vpop.permute.xlu0 %1933 }
0x2e22   :  { %v1936_v57 = vadd.f32 %v1934_v32, %v1931_v25 }
0x2e24   :  { %3097 = vtanh.f32 %v1936_v57 }
0x2e2e   :  { %v3098_v58 = vpop.eup %3097 }
0x2e2f   :  { %1939 = vrot.lane.b32.xlu1 %v3098_v58, %s3262_s1 }
0x2ea1   :  { %v1940_v60 = vpop.permute.xlu1 %1939 }
0x2ea2   :  { %v1942_v6 = vmul.f32 %v3096_v55, %v1940_v60 }
0x2ea4   :  { %v1943_v62 = vpack.c.bf16 %v1942_v6, %v1942_v6 }
0x2ea6   :  { %1945 = vrot.lane.b32.xlu0 %v1943_v62, %s3266_s27 }
0x2f18   :  { %v1946_v63 = vpop.permute.xlu0 %1945 }
0x2f19   :  { %1948 = vst.msk [vmem:[#allocation2 + $0x8] sm:$0xf] %vm308_vm2, %v1946_v63  ;;  %2865 = vmatmul.mubr.msk.bf16.vlgmr.msra.gmra.mrb[52].mxu1 %vm127_vm0, %v1946_v63 }
0x2f1a   :  { %2877 = vmatpush3.bf16.msra.mxu1 %v3715_v27  ;;  %2880 = vmatprep.mubr.msk.bf16.mxu1 %vm3265_vm1, %v3264_v7 }
0x2f1b   :  { %2878 = vmatprep.subr.bf16.mxu1 %v3264_v7 }
0x2f1e   :  { %2879 = vmatpush3.bf16.msra.mxu1 %v3723_v61 }
0x2f1f   :  { %2892 = vmatprep.subr.bf16.mxu1 %v3264_v7 }
0x2fec   :  { %v1987_v1 = vpop.f32.mrb[52].mxu1 }
0x2fed   :  { %v1993_v15 = vadd.f32 %v1987_v1, %v1674_v5  ;;  %v2866_v9 = vpop.f32.mrb[53].mxu1 }
0x2fee   :  { %v1990_v10 = vpop.f32.mrb[54].mxu1 }
0x2fef   :  { %3099 = vtanh.f32 %v1993_v15  ;;  %v2867_v11 = vpop.f32.mrb[55].mxu1  ;;  %v2561_v17 = vmul.f32 -1.442695, %v1993_v15 }
0x2ff1   :  { %3101 = vpow2.f32 %v2561_v17  ;;  %v1687_v17 = vadd.f32 %v3805_v12, %v3754_v38 }
0x2ff9   :  { %v3100_v13 = vpop.eup %3099 }
0x2ffa   :  { %2001 = vrot.lane.b32.xlu1 %v3100_v13, %s3262_s1 }
0x2ffb   :  { %v3102_v19 = vpop.eup %3101 }
0x2ffc   :  { %v1997_v20 = vadd.f32 1.0, %v3102_v19 }
0x2ffe   :  { %3103 = vrcp.f32 %v1997_v20 }
0x3008   :  { %v3104_v26 = vpop.eup %3103 }
0x3009   :  { %v2004_v30 = vmul.f32 %v3104_v26, %v1936_v57 }
0x306c   :  { %v2002_v22 = vpop.permute.xlu1 %2001 }
0x306d   :  { %v2003_v23 = vmul.f32 %v3104_v26, %v2002_v22 }
0x306f   :  { %2006 = vrot.lane.b32.xlu0 %v2003_v23, %s3266_s27 }
0x30e1   :  { %v2007_v8 = vpop.permute.xlu0 %2006 }
0x30e2   :  { %v2009_v28 = vadd.f32 %v2007_v8, %v2004_v30 }
0x30e4   :  { %3105 = vtanh.f32 %v2009_v28 }
0x30ee   :  { %v3106_v16 = vpop.eup %3105 }
0x30ef   :  { %2012 = vrot.lane.b32.xlu1 %v3106_v16, %s3262_s1 }
0x3161   :  { %v2013_v29 = vpop.permute.xlu1 %2012 }
0x3162   :  { %v2015_v33 = vmul.f32 %v3104_v26, %v2013_v29 }
0x3164   :  { %v3832_v31 = vpack.c.bf16 %v2015_v33, %v2015_v33 }
0x3166   :  { %2024 = vrot.lane.b32.xlu0 %v3832_v31, %s3266_s27 }
0x31d8   :  { %v2025_v34 = vpop.permute.xlu0 %2024 }
0x31d9   :  { %2873 = vmatmul.mubr.msk.bf16.vlgmr.msra.gmra.mrb[48].mxu0 %vm127_vm0, %v2025_v34 }
0x31da   :  { %2885 = vmatpush3.bf16.msra.mxu0 %v3715_v27  ;;  %2888 = vmatprep.mubr.msk.bf16.mxu0 %vm3265_vm1, %v3264_v7 }
0x31db   :  { %2886 = vmatprep.subr.bf16.mxu0 %v3264_v7 }
0x31de   :  { %2887 = vmatpush3.bf16.msra.mxu0 %v3723_v61 }
0x32ac   :  { %v2063_v0 = vpop.f32.mrb[48].mxu0 }
0x32ad   :  { %v2069_v37 = vadd.f32 %v2063_v0, %v1679_v35  ;;  %v2874_v59 = vpop.f32.mrb[49].mxu0 }
0x32ae   :  { %v2066_v39 = vpop.f32.mrb[50].mxu0 }
0x32af   :  { %3107 = vtanh.f32 %v2069_v37  ;;  %v2875_v40 = vpop.f32.mrb[51].mxu0  ;;  %v2563_v42 = vmul.f32 -1.442695, %v2069_v37 }
0x32b1   :  { %3109 = vpow2.f32 %v2563_v42  ;;  %v1690_v42 = vadd.f32 %v3809_v43, %v3754_v38  ;;  %v1869_v38 = vrot.slane %v3790_v51, 4 }
0x32b9   :  { %v3108_v41 = vpop.eup %3107 }
0x32ba   :  { %2077 = vrot.lane.b32.xlu1 %v3108_v41, %s3262_s1 }
0x32bb   :  { %v3110_v24 = vpop.eup %3109 }
0x32bc   :  { %v2073_v45 = vadd.f32 1.0, %v3110_v24 }
0x32be   :  { %3111 = vrcp.f32 %v2073_v45 }
0x32c8   :  { %v3112_v14 = vpop.eup %3111 }
0x32c9   :  { %v2080_v21 = vmul.f32 %v3112_v14, %v2009_v28 }
0x332c   :  { %v2078_v47 = vpop.permute.xlu1 %2077 }
0x332d   :  { %v2079_v48 = vmul.f32 %v3112_v14, %v2078_v47 }
0x332f   :  { %2082 = vrot.lane.b32.xlu0 %v2079_v48, %s3266_s27 }
0x33a1   :  { %v2083_v49 = vpop.permute.xlu0 %2082 }
0x33a2   :  { %v2085_v4 = vadd.f32 %v2083_v49, %v2080_v21 }
0x33a4   :  { %3113 = vtanh.f32 %v2085_v4 }
0x33ae   :  { %v3114_v50 = vpop.eup %3113 }
0x33af   :  { %2088 = vrot.lane.b32.xlu1 %v3114_v50, %s3262_s1 }
0x3421   :  { %v2089_v52 = vpop.permute.xlu1 %2088 }
0x3422   :  { %v2091_v53 = vmul.f32 %v3112_v14, %v2089_v52 }
0x3424   :  { %v2092_v54 = vpack.c.bf16 %v2091_v53, %v2091_v53 }
0x3426   :  { %2094 = vrot.lane.b32.xlu0 %v2092_v54, %s3266_s27 }
0x3498   :  { %v2095_v55 = vpop.permute.xlu0 %2094 }
0x3499   :  { %2097 = vst.msk [vmem:[#allocation2 + $0x10] sm:$0xf] %vm308_vm2, %v2095_v55  ;;  %2881 = vmatmul.mubr.msk.bf16.vlgmr.msra.gmra.mrb[56].mxu1 %vm127_vm0, %v2095_v55 }
0x349a   :  { %2893 = vmatpush3.bf16.msra.mxu1 %v3715_v27  ;;  %2896 = vmatprep.mubr.msk.bf16.mxu1 %vm3265_vm1, %v3264_v7 }
0x349b   :  { %2894 = vmatprep.subr.bf16.mxu1 %v3264_v7 }
0x349e   :  { %2895 = vmatpush3.bf16.msra.mxu1 %v3723_v61 }
0x356c   :  { %v2136_v56 = vpop.f32.mrb[56].mxu1 }
0x356d   :  { %v2142_v25 = vadd.f32 %v2136_v56, %v1682_v2  ;;  %v2882_v32 = vpop.f32.mrb[57].mxu1 }
0x356e   :  { %v2139_v57 = vpop.f32.mrb[58].mxu1 }
0x356f   :  { %3115 = vtanh.f32 %v2142_v25  ;;  %v2883_v58 = vpop.f32.mrb[59].mxu1  ;;  %v2565_v27 = vmul.f32 -1.442695, %v2142_v25  ;;  %v2945_v25 = vld [vmem:[%s3984_s7] sm:$0xff]  }
0x3570   :  { %2900 = vmatprep.subr.bf16.mxu0 %v2945_v25 }
0x3571   :  { %3117 = vpow2.f32 %v2565_v27 }
0x3579   :  { %v3116_v60 = vpop.eup %3115 }
0x357a   :  { %2150 = vrot.lane.b32.xlu1 %v3116_v60, %s3262_s1  ;;  %v2018_v60 = vrot.slane %v3832_v31, 4 }
0x357b   :  { %v3118_v6 = vpop.eup %3117 }
0x357c   :  { %v2146_v62 = vadd.f32 1.0, %v3118_v6 }
0x357e   :  { %3119 = vrcp.f32 %v2146_v62 }
0x3588   :  { %v3120_v7 = vpop.eup %3119 }
0x3589   :  { %v2153_v44 = vmul.f32 %v3120_v7, %v2085_v4 }
0x35ec   :  { %v2151_v63 = vpop.permute.xlu1 %2150 }
0x35ed   :  { %v2152_v61 = vmul.f32 %v3120_v7, %v2151_v63 }
0x35ef   :  { %2155 = vrot.lane.b32.xlu0 %v2152_v61, %s3266_s27 }
0x3661   :  { %v2156_v5 = vpop.permute.xlu0 %2155 }
0x3662   :  { %v2158_v1 = vadd.f32 %v2156_v5, %v2153_v44 }
0x3664   :  { %3121 = vtanh.f32 %v2158_v1 }
0x366e   :  { %v3122_v15 = vpop.eup %3121 }
0x366f   :  { %2161 = vrot.lane.b32.xlu1 %v3122_v15, %s3262_s1 }
0x36e1   :  { %v2162_v9 = vpop.permute.xlu1 %2161 }
0x36e2   :  { %v2164_v10 = vmul.f32 %v3120_v7, %v2162_v9 }
0x36e4   :  { %v2165_v11 = vpack.c.bf16 %v2164_v10, %v2164_v10 }
0x36e6   :  { %2173 = vrot.lane.b32.xlu0 %v2165_v11, %s3266_s27  ;;  %v2167_v43 = vrot.slane %v2165_v11, 4 }
0x3758   :  { %v2174_v13 = vpop.permute.xlu0 %2173 }
0x3759   :  { %2889 = vmatmul.mubr.msk.bf16.vlgmr.msra.gmra.mrb[52].mxu0 %vm127_vm0, %v2174_v13 }
0x375a   :  { %2901 = vmatpush3.bf16.msra.mxu0 %v2945_v25 }
0x382c   :  { %v2212_v19 = vpop.f32.mrb[52].mxu0 }
0x382d   :  { %v2218_v20 = vadd.f32 %v2212_v19, %v1687_v17  ;;  %v2890_v26 = vpop.f32.mrb[53].mxu0 }
0x382e   :  { %v2215_v22 = vpop.f32.mrb[54].mxu0 }
0x382f   :  { %3123 = vtanh.f32 %v2218_v20  ;;  %v2891_v23 = vpop.f32.mrb[55].mxu0  ;;  %v2567_v8 = vmul.f32 -1.442695, %v2218_v20 }
0x3831   :  { %3125 = vpow2.f32 %v2567_v8 }
0x3839   :  { %v3124_v30 = vpop.eup %3123 }
0x383a   :  { %2226 = vrot.lane.b32.xlu1 %v3124_v30, %s3262_s1 }
0x383b   :  { %v3126_v28 = vpop.eup %3125 }
0x383c   :  { %v2222_v16 = vadd.f32 1.0, %v3126_v28 }
0x383e   :  { %3127 = vrcp.f32 %v2222_v16 }
0x3848   :  { %v3128_v29 = vpop.eup %3127 }
0x3849   :  { %v2229_v12 = vmul.f32 %v3128_v29, %v2158_v1 }
0x38ac   :  { %v2227_v33 = vpop.permute.xlu1 %2226 }
0x38ad   :  { %v2228_v34 = vmul.f32 %v3128_v29, %v2227_v33 }
0x38af   :  { %2231 = vrot.lane.b32.xlu0 %v2228_v34, %s3266_s27 }
0x3921   :  { %v2232_v35 = vpop.permute.xlu0 %2231 }
0x3922   :  { %v2234_v0 = vadd.f32 %v2232_v35, %v2229_v12 }
0x3924   :  { %3129 = vtanh.f32 %v2234_v0 }
0x392e   :  { %v3130_v37 = vpop.eup %3129 }
0x392f   :  { %2237 = vrot.lane.b32.xlu1 %v3130_v37, %s3262_s1 }
0x39a1   :  { %v2238_v59 = vpop.permute.xlu1 %2237 }
0x39a2   :  { %v2240_v39 = vmul.f32 %v3128_v29, %v2238_v59 }
0x39a4   :  { %v2241_v40 = vpack.c.bf16 %v2240_v39, %v2240_v39 }
0x39a6   :  { %2243 = vrot.lane.b32.xlu0 %v2241_v40, %s3266_s27 }
0x3a18   :  { %v2244_v41 = vpop.permute.xlu0 %2243 }
0x3a19   :  { %2246 = vst.msk [vmem:[#allocation2 + $0x18] sm:$0xf] %vm308_vm2, %v2244_v41  ;;  %2897 = vmatmul.mubr.msk.bf16.vlgmr.msra.gmra.mrb[60].mxu1 %vm127_vm0, %v2244_v41 }
0x3aec   :  { %v2285_v24 = vpop.f32.mrb[60].mxu1 }
0x3aed   :  { %v2291_v45 = vadd.f32 %v2285_v24, %v1690_v42  ;;  %v2898_v14 = vpop.f32.mrb[61].mxu1 }
0x3aee   :  { %v2288_v47 = vpop.f32.mrb[62].mxu1 }
0x3aef   :  { %3131 = vtanh.f32 %v2291_v45  ;;  %v2899_v48 = vpop.f32.mrb[63].mxu1  ;;  %v2569_v49 = vmul.f32 -1.442695, %v2291_v45 }
0x3af1   :  { %3133 = vpow2.f32 %v2569_v49 }
0x3af9   :  { %v3132_v21 = vpop.eup %3131 }
0x3afa   :  { %2299 = vrot.lane.b32.xlu1 %v3132_v21, %s3262_s1 }
0x3afb   :  { %v3134_v4 = vpop.eup %3133 }
0x3afc   :  { %v2295_v50 = vadd.f32 1.0, %v3134_v4 }
0x3afe   :  { %3135 = vrcp.f32 %v2295_v50 }
0x3b08   :  { %v3136_v52 = vpop.eup %3135 }
0x3b09   :  { %v2302_v55 = vmul.f32 %v3136_v52, %v2234_v0 }
0x3b6c   :  { %v2300_v53 = vpop.permute.xlu1 %2299 }
0x3b6d   :  { %v2301_v54 = vmul.f32 %v3136_v52, %v2300_v53 }
0x3b6f   :  { %2304 = vrot.lane.b32.xlu0 %v2301_v54, %s3266_s27 }
0x3b73   :  { %1870 = vrot.lane.b32.xlu0 %v1869_v38, %s3266_s27 }
0x3b77   :  { %2168 = vrot.lane.b32.xlu0 %v2167_v43, %s3266_s27 }
0x3b7b   :  { %833 = vrot.lane.b32.xlu0 %v3607_v3, %s3266_s27  ;;  %v2946_v3 = vld [vmem:[%s3984_s7 + $0x8] sm:$0xff]   ;;  %s3267_s7 = smov 96  }
0x3b7c   :  { %2902 = vmatprep.subr.bf16.mxu0 %v2946_v3 }
0x3b7d   :  { %2903 = vmatpush3.bf16.msra.mxu0 %v2946_v3 }
0x3b7f   :  { %1576 = vrot.lane.b32.xlu0 %v3784_v36, %s3266_s27 }
0x3be1   :  { %v2305_v2 = vpop.permute.xlu0 %2304 }
0x3be2   :  { %v2307_v56 = vadd.f32 %v2305_v2, %v2302_v55 }
0x3be4   :  { %3137 = vtanh.f32 %v2307_v56 }
0x3be5   :  { %v1871_v51 = vpop.permute.xlu0 %1870 }
0x3be6   :  { %1873 = vst.msk [vmem:[#allocation2] sm:$0xf0] %vm383_vm3, %v1871_v51 }
0x3be9   :  { %v2169_v32 = vpop.permute.xlu0 %2168 }
0x3bea   :  { %2171 = vst.msk [vmem:[#allocation2 + $0x10] sm:$0xf0] %vm383_vm3, %v2169_v32 }
0x3bed   :  { %v834_v36 = vpop.permute.xlu0 %833  ;;  %v2333_v57 = vld [vmem:[#allocation2] sm:$0xff] }
0x3bee   :  { %v3138_v58 = vpop.eup %3137  ;;  %836 = vst.msk [vmem:[#allocation10] sm:$0xff] %vm127_vm0, %v834_v36  ;;  %2904 = vmatprep.mubr.msk.bf16.mxu0 %vm127_vm0, %v2333_v57 }
0x3bef   :  { %2310 = vrot.lane.b32.xlu1 %v3138_v58, %s3262_s1  ;;  %s3268_s1 = smov [#allocation10]  }
0x3bf1   :  { %v1577_v27 = vpop.permute.xlu0 %1576  ;;  %v2335_v44 = vld [vmem:[#allocation2 + $0x10] sm:$0xff] }
0x3bf2   :  { %1580 = vst.msk [vmem:[#allocation10 + $0x8] sm:$0xff] %vm127_vm0, %v1577_v27 }
0x3bf3   :  { %2019 = vrot.lane.b32.xlu1 %v2018_v60, %s3266_s27 }
0x3c61   :  { %v2311_v6 = vpop.permute.xlu1 %2310 }
0x3c62   :  { %v2313_v62 = vmul.f32 %v3136_v52, %v2311_v6 }
0x3c64   :  { %v2314_v7 = vpack.c.bf16 %v2313_v62, %v2313_v62  ;;  %2322 = vrot.lane.b32.xlu0 %v2313_v62, %s3266_s27 }
0x3c65   :  { %v2020_v63 = vpop.permute.xlu1 %2019 }
0x3c66   :  { %v2316_v61 = vrot.slane %v2314_v7, 4  ;;  %2022 = vst.msk [vmem:[#allocation2 + $0x8] sm:$0xf0] %vm383_vm3, %v2020_v63 }
0x3c68   :  { %2317 = vrot.lane.b32.xlu1 %v2316_v61, %s3266_s27  ;;  %s2446_s27 = sshll.u32 %s3268_s1, 4  ;;  %s2447_s27 = int_to_ptr.vmem [resolvable:$true] %s2446_s27 }
0x3c69   :  { %s3205_s16 = scalar_lea.vmem %s2447_s27, 384  ;;  %p3210_p11 = scmp.lt.s32.totalorder %s2447_s27, %s2447_s27 }
0x3c6a   :  { %p3206_p10 = scmp.ne.s32.totalorder %s2447_s27, %s3205_s16  ;;  %p3211_p12 = scmp.lt.s32.totalorder %s3205_s16, %s3205_s16 }
0x3c6c   :  { %838 = vrot.lane.b32.xlu1 %v3592_v46, %s3267_s7  ;;  %p3212_p13 = por %p3211_p12, %p3210_p11 }
0x3c6d   :  { %v2334_v31 = vld [vmem:[#allocation2 + $0x8] sm:$0xff] }
0x3c6e   :  { %2905 = vmatmul.mubr.msk.bf16.vlgmr.msra.gmra.mrb[56].mxu0 %vm127_vm0, %v2334_v31  ;;  %p3213_p0 = pnand %p3212_p13, %p3206_p10 }
0x3c6f   :  { %2908 = vmatprep.mubr.msk.bf16.mxu0 %vm127_vm0, %v2335_v44 }
0x3c70   :  { %1582 = vrot.lane.b32.xlu1 %v3769_v18, %s3267_s7 }
0x3c74   :  { %2328 = vrot.lane.b32.xlu1 %v2307_v56, %s3267_s7 }
0x3cd6   :  { %v2323_v5 = vpop.permute.xlu0 %2322 }
0x3cd7   :  { %2326 = vst.msk [vmem:[#allocation10 + $0x10] sm:$0xff] %vm127_vm0, %v2323_v5 }
0x3cda   :  { %v2318_v1 = vpop.permute.xlu1 %2317 }
0x3cdb   :  { %2320 = vst.msk [vmem:[#allocation2 + $0x18] sm:$0xf0] %vm383_vm3, %v2318_v1 }
0x3cde   :  { %v839_v15 = vpop.permute.xlu1 %838 }
0x3cdf   :  { %841 = vst.msk [vmem:[#allocation11] sm:$0xff] %vm127_vm0, %v839_v15 }
0x3ce2   :  { %v1583_v9 = vpop.permute.xlu1 %1582  ;;  %v2336_v46 = vld [vmem:[#allocation2 + $0x18] sm:$0xff] }
0x3ce3   :  { %1586 = vst.msk [vmem:[#allocation11 + $0x8] sm:$0xff] %vm127_vm0, %v1583_v9  ;;  %2909 = vmatmul.mubr.msk.bf16.gmra.mrb[60].mxu0 %vm127_vm0, %v2336_v46 }
0x3ce6   :  { %v2329_v10 = vpop.permute.xlu1 %2328 }
0x3ce7   :  { %2332 = vst.msk [vmem:[#allocation11 + $0x10] sm:$0xff] %vm127_vm0, %v2329_v10 }
0x3ce8   :  { %3216 = shalt.err (!%p3213_p0)
}
0x3ce9   :  { %s3217_s13 = scalar_lea.hbm %s3986_s9, 384 }
0x3cea   :  { %p3218_p1 = scmp.ne.s32.totalorder %s3986_s9, %s3217_s13  ;;  %p3221_p2 = scmp.lt.u32.totalorder %s3217_s13, %s3986_s9 }
0x3cec   :  { %p3223_p3 = pnand %p3221_p2, %p3218_p1 }
0x3cee   :  { %3226 = shalt.err (!%p3223_p3)
}
0x3cef   :  { %2452 = dma.vmem_to_hbm [thread:$0]  %s2447_s27, 384, %s3986_s9, [#allocation6], %s3259_s25, %s3259_s25, %s3260_s26  }
0x3cf0   :  { %s3227_s19 = scalar_lea.vmem %s3908_s30, 384  ;;  %p3232_p5 = scmp.lt.s32.totalorder %s3908_s30, %s3908_s30 }
0x3cf1   :  { %p3228_p4 = scmp.ne.s32.totalorder %s3908_s30, %s3227_s19  ;;  %p3233_p6 = scmp.lt.s32.totalorder %s3227_s19, %s3227_s19 }
0x3cf3   :  { %p3234_p7 = por %p3233_p6, %p3232_p5 }
0x3cf5   :  { %p3235_p8 = pnand %p3234_p7, %p3228_p4 }
0x3cf7   :  { %3238 = shalt.err (!%p3235_p8)
}
0x3cf8   :  { %s3239_s21 = scalar_lea.hbm %s3987_s10, 384 }
0x3cf9   :  { %p3240_p9 = scmp.ne.s32.totalorder %s3987_s10, %s3239_s21  ;;  %p3243_p10 = scmp.lt.u32.totalorder %s3239_s21, %s3987_s10 }
0x3cfb   :  { %p3245_p11 = pnand %p3243_p10, %p3240_p9 }
0x3cfd   :  { %3248 = shalt.err (!%p3245_p11)
}
0x3cfe   :  { %2464 = dma.vmem_to_hbm [thread:$0]  %s3908_s30, 384, %s3987_s10, [#allocation12], %s3259_s25, %s3259_s25, %s3260_s26   ;;  %vm2430_vm4 = vcmask 130048  }
0x3d41   :  { %v2906_v18 = vpop.f32.mrb[56].mxu0 }
0x3d42   :  { %2433 = vst.msk [vmem:[%s3985_s8 + $0x10] sm:$0xff] %vm2430_vm4, %v2906_v18  ;;  %v2399_v11 = vpop.f32.mrb[57].mxu0 }
0x3d43   :  { %2431 = vst.msk [vmem:[%s3985_s8] sm:$0xff] %vm2430_vm4, %v2399_v11  ;;  %v2907_v13 = vpop.f32.mrb[58].mxu0 }
0x3d44   :  { %2434 = vst.msk [vmem:[%s3985_s8 + $0x18] sm:$0xff] %vm2430_vm4, %v2907_v13  ;;  %v2402_v17 = vpop.f32.mrb[59].mxu0 }
0x3d45   :  { %2432 = vst.msk [vmem:[%s3985_s8 + $0x8] sm:$0xff] %vm2430_vm4, %v2402_v17 }
0x3db6   :  { %v2910_v19 = vpop.f32.mrb[60].mxu0 }
0x3db7   :  { %2437 = vst.msk [vmem:[%s3985_s8 + $0x30] sm:$0xff] %vm2430_vm4, %v2910_v19  ;;  %v2415_v20 = vpop.f32.mrb[61].mxu0 }
0x3db8   :  { %2435 = vst.msk [vmem:[%s3985_s8 + $0x20] sm:$0xff] %vm2430_vm4, %v2415_v20  ;;  %v2911_v26 = vpop.f32.mrb[62].mxu0 }
0x3db9   :  { %2438 = vst.msk [vmem:[%s3985_s8 + $0x38] sm:$0xff] %vm2430_vm4, %v2911_v26  ;;  %v2418_v22 = vpop.f32.mrb[63].mxu0 }
0x3dba   :  { %2436 = vst.msk [vmem:[%s3985_s8 + $0x28] sm:$0xff] %vm2430_vm4, %v2418_v22 }
0x3dbb   :  { %3253 = dma.done.wait [#allocation6], 384  }
0x3dbc   :  { %3254 = vsyncadd [#allocation6], 4294966912 }
0x3dbd   :  { %3255 = dma.done.wait [#allocation12], 384  }
0x3dbe   :  { %3256 = vsyncadd [#allocation12], 4294966912 }
0x3dbf   :  { %2473 = vsyncpa [#allocation5], 1 }
0x3dc0   :  { %2474 = vsyncpa [#allocation8], 1 }
0x3dc1   :  { %2475 = vsyncpa [#allocation6], 1 }
0x3dc2   :  { %2476 = vsyncpa [#allocation12], 1 }

</bundles_post_ra>
